<compile_context>
chip_gen: v7x
topology: tpu7x:2x2x1
jax: 0.10.0
libtpu: 0.0.40
codegen_flags: <defaults>
</compile_context>

<pallas_src>
import math

import jax
import jax.numpy as jnp
from jax import lax
from jax.experimental import pallas as pl
from jax.experimental.pallas import tpu as pltpu

# ----------------------------- model config (small, synthetic) ----------------
VOCAB = 64
MAX_POS = 32
SEQ = 8
HIDDEN = 128
N_HEADS = 4
HEAD_DIM = HIDDEN // N_HEADS
N_LAYERS = 2
MLP_DIM = 4 * HIDDEN
NUM_LABELS = 5
CLS_PAD = 128            # lane-dense classifier / logits width (>= NUM_LABELS)
BATCH = 2
M_ROWS = BATCH * SEQ     # batch folded into the sublane/token dimension

_NEG_BIG = -1e9
_SQRT_2_OVER_PI = 0.7978845608028654


# ----------------------------- in-kernel helpers -------------------------------
def _layernorm(x, g, b, eps=1e-5):
    # x: [M, H] f32, g/b: [1, H] f32
    mu = jnp.mean(x, axis=-1, keepdims=True)
    var = jnp.mean((x - mu) ** 2, axis=-1, keepdims=True)
    return (x - mu) * lax.rsqrt(var + eps) * g + b


def _gelu_new(h):
    # GPT-2 "gelu_new" (tanh approximation), f32
    return 0.5 * h * (1.0 + jnp.tanh(_SQRT_2_OVER_PI * (h + 0.044715 * h * h * h)))


# ----------------------------- fused kernel ------------------------------------
def _gpt_fused_kernel(
    tok_lab_ref,      # [M, 2]  int32  (col 0 = input ids, col 1 = labels)
    attn_bias_ref,    # [M, M]  f32    block-diagonal causal+pad additive bias
    wte_ref,          # [VOCAB, H] f32
    wpe_ref,          # [M, H]  f32    positional embeddings, pre-tiled per batch
    ln_ref,           # [4L+2, H] f32  packed LN params
    bias_ref,         # [4L+1, MLP] f32 packed matmul biases
    w_qkv_ref,        # [L, H, 3H]  bf16
    w_proj_ref,       # [L, H, H]   bf16
    w_fc_ref,         # [L, H, MLP] bf16
    w_mproj_ref,      # [L, MLP, H] bf16
    w_cls_ref,        # [H, CLS_PAD] bf16
    logits_ref,       # [M, CLS_PAD] f32 out
    loss_ref,         # [1, CLS_PAD] f32 out (scalar loss, lane-broadcast)
):
    ids = tok_lab_ref[:, 0:1]                  # [M, 1] int32
    labels = tok_lab_ref[:, 1:2]               # [M, 1] int32
    attn_bias = attn_bias_ref[...]             # [M, M] f32
    scale = 1.0 / math.sqrt(HEAD_DIM)

    # ---- embedding: one-hot token gather on the MXU + tiled positional add ----
    vcol = lax.broadcasted_iota(jnp.int32, (M_ROWS, VOCAB), 1)
    onehot = (vcol == ids).astype(jnp.float32)                 # [M, VOCAB]
    x = (jnp.dot(onehot, wte_ref[...], preferred_element_type=jnp.float32)
         + wpe_ref[...])                                       # [M, H] f32

    for l in range(N_LAYERS):
        ln1_g = ln_ref[4 * l + 0:4 * l + 1, :]
        ln1_b = ln_ref[4 * l + 1:4 * l + 2, :]
        ln2_g = ln_ref[4 * l + 2:4 * l + 3, :]
        ln2_b = ln_ref[4 * l + 3:4 * l + 4, :]
        b_qkv = bias_ref[4 * l + 0:4 * l + 1, 0:3 * HIDDEN]
        b_proj = bias_ref[4 * l + 1:4 * l + 2, 0:HIDDEN]
        b_fc = bias_ref[4 * l + 2:4 * l + 3, 0:MLP_DIM]
        b_mproj = bias_ref[4 * l + 3:4 * l + 4, 0:HIDDEN]

        # ---- attention sub-block (LN1 -> QKV -> causal MHA -> proj + residual) -
        h = _layernorm(x, ln1_g, ln1_b)
        qkv = (jnp.dot(h.astype(jnp.bfloat16), w_qkv_ref[l],
                       preferred_element_type=jnp.float32) + b_qkv)   # [M, 3H]
        qkv_b = qkv.astype(jnp.bfloat16)       # cast once; per-head slices reuse it
        attn = jnp.zeros((M_ROWS, HIDDEN), jnp.float32)
        for hd in range(N_HEADS):
            lo = hd * HEAD_DIM
            hi = lo + HEAD_DIM
            q = qkv_b[:, lo:hi]                                   # [M, 32] bf16
            k = qkv_b[:, HIDDEN + lo:HIDDEN + hi]
            v = qkv_b[:, 2 * HIDDEN + lo:2 * HIDDEN + hi]
            # q @ k^T without materializing a transpose
            s = lax.dot_general(
                q, k, (((1,), (1,)), ((), ())),
                preferred_element_type=jnp.float32) * scale + attn_bias  # [M, M]
            m = jnp.max(s, axis=-1, keepdims=True)
            p = jnp.exp(s - m)
            p = p * pl.reciprocal(jnp.sum(p, axis=-1, keepdims=True), approx=True)
            o_h = jnp.dot(p.astype(jnp.bfloat16), v,
                          preferred_element_type=jnp.float32)     # [M, 32]
            # fold the output projection per head (no lane concat)
            attn = attn + jnp.dot(o_h.astype(jnp.bfloat16),
                                  w_proj_ref[l, lo:hi, :],
                                  preferred_element_type=jnp.float32)
        x = x + attn + b_proj                                     # residual + bias

        # ---- MLP sub-block (LN2 -> FC + gelu_new -> proj + residual) ----------
        h = _layernorm(x, ln2_g, ln2_b)
        mlp = _gelu_new(jnp.dot(h.astype(jnp.bfloat16), w_fc_ref[l],
                                preferred_element_type=jnp.float32) + b_fc)
        x = x + jnp.dot(mlp.astype(jnp.bfloat16), w_mproj_ref[l],
                        preferred_element_type=jnp.float32) + b_mproj

    # ---- final LN + classifier (padded to CLS_PAD lanes) -----------------------
    lnf_g = ln_ref[4 * N_LAYERS + 0:4 * N_LAYERS + 1, :]
    lnf_b = ln_ref[4 * N_LAYERS + 1:4 * N_LAYERS + 2, :]
    b_cls = bias_ref[4 * N_LAYERS:4 * N_LAYERS + 1, 0:CLS_PAD]
    xf = _layernorm(x, lnf_g, lnf_b)
    logits = (jnp.dot(xf.astype(jnp.bfloat16), w_cls_ref[...],
                      preferred_element_type=jnp.float32) + b_cls)    # [M, CLS_PAD]
    logits_ref[...] = logits

    # ---- in-kernel masked cross-entropy (ignore_index = -100), mean over valid -
    col = lax.broadcasted_iota(jnp.int32, (M_ROWS, CLS_PAD), 1)
    real_col = col < NUM_LABELS
    masked = jnp.where(real_col, logits, _NEG_BIG)
    mx = jnp.max(masked, axis=-1, keepdims=True)
    lse = jnp.log(jnp.sum(jnp.exp(masked - mx), axis=-1, keepdims=True)) + mx
    tgt = jnp.sum(jnp.where(col == labels, logits, 0.0), axis=-1, keepdims=True)
    valid = (labels != -100).astype(jnp.float32)                     # [M, 1]
    nll = (lse - tgt) * valid                                        # [M, 1]
    nll_sum = jnp.sum(nll, axis=0, keepdims=True)                    # [1, 1]
    cnt = jnp.sum(valid, axis=0, keepdims=True)                      # [1, 1]
    loss = nll_sum / jnp.maximum(cnt, 1.0)
    loss_ref[...] = jnp.broadcast_to(loss, (1, CLS_PAD))             # lane-dense


# ----------------------------- parameter init ----------------------------------
def init_params(key):
    std = 0.02

    def nrm(k, shape):
        return jax.random.normal(k, shape, jnp.float32) * std

    keys = jax.random.split(key, 7)

    # packed LN slab: rows [4l+0]=ln1_g, [4l+1]=ln1_b, [4l+2]=ln2_g, [4l+3]=ln2_b,
    # then lnf_g, lnf_b.
    ln_slab = jnp.zeros((4 * N_LAYERS + 2, HIDDEN), jnp.float32)
    gamma_rows = [4 * l + 0 for l in range(N_LAYERS)] + \
                 [4 * l + 2 for l in range(N_LAYERS)] + [4 * N_LAYERS]
    ln_slab = ln_slab.at[jnp.array(gamma_rows)].set(1.0)

    # packed bias slab (all zeros at init): rows [4l+0]=b_qkv(0:384), [4l+1]=b_proj,
    # [4l+2]=b_fc(0:512), [4l+3]=b_mproj, last row = b_cls.
    bias_slab = jnp.zeros((4 * N_LAYERS + 1, MLP_DIM), jnp.float32)

    w_cls = nrm(keys[2], (HIDDEN, NUM_LABELS))
    w_cls_pad = jnp.zeros((HIDDEN, CLS_PAD), jnp.float32).at[:, :NUM_LABELS].set(w_cls)

    return {
        "wte": nrm(keys[0], (VOCAB, HIDDEN)),
        "wpe": nrm(keys[1], (MAX_POS, HIDDEN)),
        "ln_slab": ln_slab,
        "bias_slab": bias_slab,
        # matmul weights stored bf16 (MXU operands), f32 accumulation in-kernel
        "w_qkv": nrm(keys[3], (N_LAYERS, HIDDEN, 3 * HIDDEN)).astype(jnp.bfloat16),
        "w_proj": nrm(keys[4], (N_LAYERS, HIDDEN, HIDDEN)).astype(jnp.bfloat16),
        "w_fc": nrm(keys[5], (N_LAYERS, HIDDEN, MLP_DIM)).astype(jnp.bfloat16),
        "w_mproj": nrm(keys[6], (N_LAYERS, MLP_DIM, HIDDEN)).astype(jnp.bfloat16),
        "w_cls": w_cls_pad.astype(jnp.bfloat16),
    }


# ----------------------------- forward pass -------------------------------------
def gpt_token_classification_forward(params, input_ids, attn_mask, labels):
    B, S = input_ids.shape
    assert B == BATCH and S == SEQ
    M = B * S

    # ints packed into one [M,2] array (ids, labels)
    tok_lab = jnp.stack(
        [input_ids.reshape(M), labels.reshape(M)], axis=1).astype(jnp.int32)

    # positional embeddings tiled per batch row (tiny, param-derived)
    wpe_t = jnp.tile(params["wpe"][:S], (B, 1)).astype(jnp.float32)   # [M, H]

    # block-diagonal causal + padding additive bias over the folded token dim
    batch_id = jnp.repeat(jnp.arange(B), S)
    pos = jnp.tile(jnp.arange(S), B)
    same_b = batch_id[:, None] == batch_id[None, :]
    causal = pos[None, :] <= pos[:, None]
    key_ok = (attn_mask.reshape(M) > 0)[None, :]
    attn_bias = jnp.where(same_b & causal & key_ok, 0.0, _NEG_BIG).astype(jnp.float32)

    def full_spec(a):
        n = a.ndim
        return pl.BlockSpec(a.shape, lambda i, _n=n: (0,) * _n)

    inputs = (
        tok_lab, attn_bias, params["wte"], wpe_t,
        params["ln_slab"], params["bias_slab"],
        params["w_qkv"], params["w_proj"], params["w_fc"],
        params["w_mproj"], params["w_cls"],
    )
    in_specs = [full_spec(a) for a in inputs]
    out_specs = [
        pl.BlockSpec((M, CLS_PAD), lambda i: (0, 0)),
        pl.BlockSpec((1, CLS_PAD), lambda i: (0, 0)),
    ]
    out_shape = (
        jax.ShapeDtypeStruct((M, CLS_PAD), jnp.float32),   # padded logits
        jax.ShapeDtypeStruct((1, CLS_PAD), jnp.float32),   # scalar loss (lane bcast)
    )

    logits_pad, loss_out = pl.pallas_call(
        _gpt_fused_kernel,
        grid=(1,),                          # single step: batch folded into rows
        in_specs=in_specs,
        out_specs=out_specs,
        out_shape=out_shape,
        compiler_params=pltpu.CompilerParams(
            dimension_semantics=("arbitrary",)),
    )(*inputs)

    loss = loss_out[0, 0]
    logits = logits_pad[:, :NUM_LABELS].reshape(B, S, NUM_LABELS)
    # return_dict=False with labels -> (loss, logits)
    return loss, logits


# ----------------------------- main ---------------------------------------------
if __name__ == "__main__":
    key = jax.random.PRNGKey(0)
    k_param, k_ids, k_lab = jax.random.split(key, 3)

    params = init_params(k_param)

    input_ids = jax.random.randint(k_ids, (BATCH, SEQ), 0, VOCAB, dtype=jnp.int32)
    attn_mask = jnp.ones((BATCH, SEQ), dtype=jnp.int32)
    labels = jax.random.randint(k_lab, (BATCH, SEQ), 0, NUM_LABELS, dtype=jnp.int32)
    # exercise the ignore_index=-100 path on one token
    labels = labels.at[0, 0].set(-100)

    fwd = jax.jit(gpt_token_classification_forward)
    loss, logits = fwd(params, input_ids, attn_mask, labels)
    jax.block_until_ready((loss, logits))

    assert logits.shape == (BATCH, SEQ, NUM_LABELS)
    assert loss.shape == ()
    assert bool(jnp.isfinite(loss))
    print("KERNEL_OK")
</pallas_src>

<mosaic_0001>
module attributes {stable_mosaic.version = 11 : i64} {
  func.func @_gpt_fused_kernel(%arg0: i32, %arg1: memref<16x2xi32, #tpu.memory_space<vmem>>, %arg2: memref<16x16xf32, #tpu.memory_space<vmem>>, %arg3: memref<64x128xf32, #tpu.memory_space<vmem>>, %arg4: memref<16x128xf32, #tpu.memory_space<vmem>>, %arg5: memref<10x128xf32, #tpu.memory_space<vmem>>, %arg6: memref<9x512xf32, #tpu.memory_space<vmem>>, %arg7: memref<2x128x384xbf16, #tpu.memory_space<vmem>>, %arg8: memref<2x128x128xbf16, #tpu.memory_space<vmem>>, %arg9: memref<2x128x512xbf16, #tpu.memory_space<vmem>>, %arg10: memref<2x512x128xbf16, #tpu.memory_space<vmem>>, %arg11: memref<128x128xbf16, #tpu.memory_space<vmem>>, %arg12: memref<16x128xf32, #tpu.memory_space<vmem>>, %arg13: memref<1x128xf32, #tpu.memory_space<vmem>>) attributes {dimension_semantics = [#tpu.dimension_semantics<arbitrary>], iteration_bounds = array<i64: 1>, scalar_prefetch = 0 : i64, scratch_operands = 0 : i64, tpu.core_type = #tpu.core_type<tc>, window_params = [{pipeline_mode = #tpu.pipeline_mode<synchronous>, transform_indices = @transform_0, window_bounds = array<i64: 16, 2>}, {pipeline_mode = #tpu.pipeline_mode<synchronous>, transform_indices = @transform_1, window_bounds = array<i64: 16, 16>}, {pipeline_mode = #tpu.pipeline_mode<synchronous>, transform_indices = @transform_2, window_bounds = array<i64: 64, 128>}, {pipeline_mode = #tpu.pipeline_mode<synchronous>, transform_indices = @transform_3, window_bounds = array<i64: 16, 128>}, {pipeline_mode = #tpu.pipeline_mode<synchronous>, transform_indices = @transform_4, window_bounds = array<i64: 10, 128>}, {pipeline_mode = #tpu.pipeline_mode<synchronous>, transform_indices = @transform_5, window_bounds = array<i64: 9, 512>}, {pipeline_mode = #tpu.pipeline_mode<synchronous>, transform_indices = @transform_6, window_bounds = array<i64: 2, 128, 384>}, {pipeline_mode = #tpu.pipeline_mode<synchronous>, transform_indices = @transform_7, window_bounds = array<i64: 2, 128, 128>}, {pipeline_mode = #tpu.pipeline_mode<synchronous>, transform_indices = @transform_8, window_bounds = array<i64: 2, 128, 512>}, {pipeline_mode = #tpu.pipeline_mode<synchronous>, transform_indices = @transform_9, window_bounds = array<i64: 2, 512, 128>}, {pipeline_mode = #tpu.pipeline_mode<synchronous>, transform_indices = @transform_10, window_bounds = array<i64: 128, 128>}, {pipeline_mode = #tpu.pipeline_mode<synchronous>, transform_indices = @transform_11, window_bounds = array<i64: 16, 128>}, {pipeline_mode = #tpu.pipeline_mode<synchronous>, transform_indices = @transform_12, window_bounds = array<i64: 1, 128>}]} {
    %c0 = arith.constant 0 : index
    %c0_0 = arith.constant 0 : index
    %0 = vector.load %arg1[%c0, %c0_0] : memref<16x2xi32, #tpu.memory_space<vmem>>, vector<16x1xi32>
    %c0_1 = arith.constant 0 : index
    %c1 = arith.constant 1 : index
    %1 = vector.load %arg1[%c0_1, %c1] : memref<16x2xi32, #tpu.memory_space<vmem>>, vector<16x1xi32>
    %c0_2 = arith.constant 0 : index
    %c0_3 = arith.constant 0 : index
    %2 = vector.load %arg2[%c0_2, %c0_3] : memref<16x16xf32, #tpu.memory_space<vmem>>, vector<16x16xf32>
    %3 = tpu.iota {dimensions = array<i32: 1>} : vector<16x64xi32>
    %4 = vector.broadcast %0 : vector<16x1xi32> to vector<16x64xi32>
    %5 = arith.cmpi eq, %3, %4 : vector<16x64xi32>
    %6 = arith.extui %5 : vector<16x64xi1> to vector<16x64xi32>
    %7 = arith.sitofp %6 : vector<16x64xi32> to vector<16x64xf32>
    %c0_4 = arith.constant 0 : index
    %c0_5 = arith.constant 0 : index
    %8 = vector.load %arg3[%c0_4, %c0_5] : memref<64x128xf32, #tpu.memory_space<vmem>>, vector<64x128xf32>
    %cst = arith.constant dense<0.000000e+00> : vector<16x128xf32>
    %9 = tpu.matmul %7, %8, %cst {dimension_numbers = #tpu.dot_dimension_numbers<[1], [0], [0], [1], [0, 0, 1, 1], [], []>} : vector<16x64xf32>, vector<64x128xf32>, vector<16x128xf32> -> vector<16x128xf32>
    %c0_6 = arith.constant 0 : index
    %c0_7 = arith.constant 0 : index
    %10 = vector.load %arg4[%c0_6, %c0_7] : memref<16x128xf32, #tpu.memory_space<vmem>>, vector<16x128xf32>
    %11 = arith.addf %9, %10 : vector<16x128xf32>
    %c0_8 = arith.constant 0 : index
    %c0_9 = arith.constant 0 : index
    %12 = vector.load %arg5[%c0_8, %c0_9] : memref<10x128xf32, #tpu.memory_space<vmem>>, vector<1x128xf32>
    %c1_10 = arith.constant 1 : index
    %c0_11 = arith.constant 0 : index
    %13 = vector.load %arg5[%c1_10, %c0_11] : memref<10x128xf32, #tpu.memory_space<vmem>>, vector<1x128xf32>
    %c2 = arith.constant 2 : index
    %c0_12 = arith.constant 0 : index
    %14 = vector.load %arg5[%c2, %c0_12] : memref<10x128xf32, #tpu.memory_space<vmem>>, vector<1x128xf32>
    %c3 = arith.constant 3 : index
    %c0_13 = arith.constant 0 : index
    %15 = vector.load %arg5[%c3, %c0_13] : memref<10x128xf32, #tpu.memory_space<vmem>>, vector<1x128xf32>
    %c0_14 = arith.constant 0 : index
    %c0_15 = arith.constant 0 : index
    %16 = vector.load %arg6[%c0_14, %c0_15] : memref<9x512xf32, #tpu.memory_space<vmem>>, vector<1x384xf32>
    %c1_16 = arith.constant 1 : index
    %c0_17 = arith.constant 0 : index
    %17 = vector.load %arg6[%c1_16, %c0_17] : memref<9x512xf32, #tpu.memory_space<vmem>>, vector<1x128xf32>
    %c2_18 = arith.constant 2 : index
    %c0_19 = arith.constant 0 : index
    %18 = vector.load %arg6[%c2_18, %c0_19] : memref<9x512xf32, #tpu.memory_space<vmem>>, vector<1x512xf32>
    %c3_20 = arith.constant 3 : index
    %c0_21 = arith.constant 0 : index
    %19 = vector.load %arg6[%c3_20, %c0_21] : memref<9x512xf32, #tpu.memory_space<vmem>>, vector<1x128xf32>
    %cst_22 = arith.constant dense<0.000000e+00> : vector<16xf32>
    %20 = vector.multi_reduction <add>, %11, %cst_22 [1] : vector<16x128xf32> to vector<16xf32>
    %21 = vector.shape_cast %20 : vector<16xf32> to vector<16x1xf32>
    %cst_23 = arith.constant 1.280000e+02 : f32
    %22 = vector.broadcast %cst_23 : f32 to vector<16x1xf32>
    %23 = arith.divf %21, %22 : vector<16x1xf32>
    %24 = vector.broadcast %23 : vector<16x1xf32> to vector<16x128xf32>
    %25 = arith.subf %11, %24 : vector<16x128xf32>
    %26 = arith.mulf %25, %25 : vector<16x128xf32>
    %cst_24 = arith.constant dense<0.000000e+00> : vector<16xf32>
    %27 = vector.multi_reduction <add>, %26, %cst_24 [1] : vector<16x128xf32> to vector<16xf32>
    %28 = vector.shape_cast %27 : vector<16xf32> to vector<16x1xf32>
    %cst_25 = arith.constant 1.280000e+02 : f32
    %29 = vector.broadcast %cst_25 : f32 to vector<16x1xf32>
    %30 = arith.divf %28, %29 : vector<16x1xf32>
    %31 = vector.broadcast %23 : vector<16x1xf32> to vector<16x128xf32>
    %32 = arith.subf %11, %31 : vector<16x128xf32>
    %cst_26 = arith.constant 9.99999974E-6 : f32
    %33 = vector.broadcast %cst_26 : f32 to vector<16x1xf32>
    %34 = arith.addf %30, %33 : vector<16x1xf32>
    %35 = math.rsqrt %34 : vector<16x1xf32>
    %36 = vector.broadcast %35 : vector<16x1xf32> to vector<16x128xf32>
    %37 = arith.mulf %32, %36 : vector<16x128xf32>
    %38 = vector.broadcast %12 : vector<1x128xf32> to vector<16x128xf32>
    %39 = arith.mulf %37, %38 : vector<16x128xf32>
    %40 = vector.broadcast %13 : vector<1x128xf32> to vector<16x128xf32>
    %41 = arith.addf %39, %40 : vector<16x128xf32>
    %42 = arith.truncf %41 : vector<16x128xf32> to vector<16x128xbf16>
    %c0_27 = arith.constant 0 : index
    %c0_28 = arith.constant 0 : index
    %c0_29 = arith.constant 0 : index
    %43 = vector.load %arg7[%c0_27, %c0_28, %c0_29] : memref<2x128x384xbf16, #tpu.memory_space<vmem>>, vector<1x128x384xbf16>
    %44 = vector.shape_cast %43 : vector<1x128x384xbf16> to vector<128x384xbf16>
    %cst_30 = arith.constant dense<0.000000e+00> : vector<16x384xf32>
    %45 = tpu.matmul %42, %44, %cst_30 {dimension_numbers = #tpu.dot_dimension_numbers<[1], [0], [0], [1], [0, 0, 1, 1], [], []>} : vector<16x128xbf16>, vector<128x384xbf16>, vector<16x384xf32> -> vector<16x384xf32>
    %46 = vector.broadcast %16 : vector<1x384xf32> to vector<16x384xf32>
    %47 = arith.addf %45, %46 : vector<16x384xf32>
    %48 = arith.truncf %47 : vector<16x384xf32> to vector<16x384xbf16>
    %cst_31 = arith.constant 0.000000e+00 : f32
    %49 = vector.broadcast %cst_31 : f32 to vector<16x128xf32>
    %50 = vector.extract_strided_slice %48 {offsets = [0, 0], sizes = [16, 32], strides = [1, 1]} : vector<16x384xbf16> to vector<16x32xbf16>
    %51 = vector.extract_strided_slice %48 {offsets = [0, 128], sizes = [16, 32], strides = [1, 1]} : vector<16x384xbf16> to vector<16x32xbf16>
    %52 = vector.extract_strided_slice %48 {offsets = [0, 256], sizes = [16, 32], strides = [1, 1]} : vector<16x384xbf16> to vector<16x32xbf16>
    %cst_32 = arith.constant dense<0.000000e+00> : vector<16x16xf32>
    %53 = tpu.matmul %50, %51, %cst_32 {dimension_numbers = #tpu.dot_dimension_numbers<[1], [1], [0], [0], [0, 0, 1, 0], [], []>} : vector<16x32xbf16>, vector<16x32xbf16>, vector<16x16xf32> -> vector<16x16xf32>
    %cst_33 = arith.constant 0.176776692 : f32
    %54 = vector.broadcast %cst_33 : f32 to vector<16x16xf32>
    %55 = arith.mulf %53, %54 : vector<16x16xf32>
    %56 = arith.addf %55, %2 : vector<16x16xf32>
    %cst_34 = arith.constant dense<0xFF800000> : vector<16xf32>
    %57 = vector.multi_reduction <maximumf>, %56, %cst_34 [1] : vector<16x16xf32> to vector<16xf32>
    %58 = vector.shape_cast %57 : vector<16xf32> to vector<16x1xf32>
    %59 = vector.broadcast %58 : vector<16x1xf32> to vector<16x16xf32>
    %60 = arith.subf %56, %59 : vector<16x16xf32>
    %61 = math.exp %60 : vector<16x16xf32>
    %cst_35 = arith.constant dense<0.000000e+00> : vector<16xf32>
    %62 = vector.multi_reduction <add>, %61, %cst_35 [1] : vector<16x16xf32> to vector<16xf32>
    %63 = vector.shape_cast %62 : vector<16xf32> to vector<16x1xf32>
    %64 = tpu.reciprocal %63 {approx = true} : vector<16x1xf32> -> vector<16x1xf32>
    %65 = vector.broadcast %64 : vector<16x1xf32> to vector<16x16xf32>
    %66 = arith.mulf %61, %65 : vector<16x16xf32>
    %67 = arith.truncf %66 : vector<16x16xf32> to vector<16x16xbf16>
    %cst_36 = arith.constant dense<0.000000e+00> : vector<16x32xf32>
    %68 = tpu.matmul %67, %52, %cst_36 {dimension_numbers = #tpu.dot_dimension_numbers<[1], [0], [0], [1], [0, 0, 1, 1], [], []>} : vector<16x16xbf16>, vector<16x32xbf16>, vector<16x32xf32> -> vector<16x32xf32>
    %69 = arith.truncf %68 : vector<16x32xf32> to vector<16x32xbf16>
    %c0_37 = arith.constant 0 : index
    %c0_38 = arith.constant 0 : index
    %c0_39 = arith.constant 0 : index
    %70 = vector.load %arg8[%c0_37, %c0_38, %c0_39] : memref<2x128x128xbf16, #tpu.memory_space<vmem>>, vector<1x32x128xbf16>
    %71 = vector.shape_cast %70 : vector<1x32x128xbf16> to vector<32x128xbf16>
    %cst_40 = arith.constant dense<0.000000e+00> : vector<16x128xf32>
    %72 = tpu.matmul %69, %71, %cst_40 {dimension_numbers = #tpu.dot_dimension_numbers<[1], [0], [0], [1], [0, 0, 1, 1], [], []>} : vector<16x32xbf16>, vector<32x128xbf16>, vector<16x128xf32> -> vector<16x128xf32>
    %73 = arith.addf %49, %72 : vector<16x128xf32>
    %74 = vector.extract_strided_slice %48 {offsets = [0, 32], sizes = [16, 32], strides = [1, 1]} : vector<16x384xbf16> to vector<16x32xbf16>
    %75 = vector.extract_strided_slice %48 {offsets = [0, 160], sizes = [16, 32], strides = [1, 1]} : vector<16x384xbf16> to vector<16x32xbf16>
    %76 = vector.extract_strided_slice %48 {offsets = [0, 288], sizes = [16, 32], strides = [1, 1]} : vector<16x384xbf16> to vector<16x32xbf16>
    %cst_41 = arith.constant dense<0.000000e+00> : vector<16x16xf32>
    %77 = tpu.matmul %74, %75, %cst_41 {dimension_numbers = #tpu.dot_dimension_numbers<[1], [1], [0], [0], [0, 0, 1, 0], [], []>} : vector<16x32xbf16>, vector<16x32xbf16>, vector<16x16xf32> -> vector<16x16xf32>
    %cst_42 = arith.constant 0.176776692 : f32
    %78 = vector.broadcast %cst_42 : f32 to vector<16x16xf32>
    %79 = arith.mulf %77, %78 : vector<16x16xf32>
    %80 = arith.addf %79, %2 : vector<16x16xf32>
    %cst_43 = arith.constant dense<0xFF800000> : vector<16xf32>
    %81 = vector.multi_reduction <maximumf>, %80, %cst_43 [1] : vector<16x16xf32> to vector<16xf32>
    %82 = vector.shape_cast %81 : vector<16xf32> to vector<16x1xf32>
    %83 = vector.broadcast %82 : vector<16x1xf32> to vector<16x16xf32>
    %84 = arith.subf %80, %83 : vector<16x16xf32>
    %85 = math.exp %84 : vector<16x16xf32>
    %cst_44 = arith.constant dense<0.000000e+00> : vector<16xf32>
    %86 = vector.multi_reduction <add>, %85, %cst_44 [1] : vector<16x16xf32> to vector<16xf32>
    %87 = vector.shape_cast %86 : vector<16xf32> to vector<16x1xf32>
    %88 = tpu.reciprocal %87 {approx = true} : vector<16x1xf32> -> vector<16x1xf32>
    %89 = vector.broadcast %88 : vector<16x1xf32> to vector<16x16xf32>
    %90 = arith.mulf %85, %89 : vector<16x16xf32>
    %91 = arith.truncf %90 : vector<16x16xf32> to vector<16x16xbf16>
    %cst_45 = arith.constant dense<0.000000e+00> : vector<16x32xf32>
    %92 = tpu.matmul %91, %76, %cst_45 {dimension_numbers = #tpu.dot_dimension_numbers<[1], [0], [0], [1], [0, 0, 1, 1], [], []>} : vector<16x16xbf16>, vector<16x32xbf16>, vector<16x32xf32> -> vector<16x32xf32>
    %93 = arith.truncf %92 : vector<16x32xf32> to vector<16x32xbf16>
    %c0_46 = arith.constant 0 : index
    %c32 = arith.constant 32 : index
    %c0_47 = arith.constant 0 : index
    %94 = vector.load %arg8[%c0_46, %c32, %c0_47] : memref<2x128x128xbf16, #tpu.memory_space<vmem>>, vector<1x32x128xbf16>
    %95 = vector.shape_cast %94 : vector<1x32x128xbf16> to vector<32x128xbf16>
    %cst_48 = arith.constant dense<0.000000e+00> : vector<16x128xf32>
    %96 = tpu.matmul %93, %95, %cst_48 {dimension_numbers = #tpu.dot_dimension_numbers<[1], [0], [0], [1], [0, 0, 1, 1], [], []>} : vector<16x32xbf16>, vector<32x128xbf16>, vector<16x128xf32> -> vector<16x128xf32>
    %97 = arith.addf %73, %96 : vector<16x128xf32>
    %98 = vector.extract_strided_slice %48 {offsets = [0, 64], sizes = [16, 32], strides = [1, 1]} : vector<16x384xbf16> to vector<16x32xbf16>
    %99 = vector.extract_strided_slice %48 {offsets = [0, 192], sizes = [16, 32], strides = [1, 1]} : vector<16x384xbf16> to vector<16x32xbf16>
    %100 = vector.extract_strided_slice %48 {offsets = [0, 320], sizes = [16, 32], strides = [1, 1]} : vector<16x384xbf16> to vector<16x32xbf16>
    %cst_49 = arith.constant dense<0.000000e+00> : vector<16x16xf32>
    %101 = tpu.matmul %98, %99, %cst_49 {dimension_numbers = #tpu.dot_dimension_numbers<[1], [1], [0], [0], [0, 0, 1, 0], [], []>} : vector<16x32xbf16>, vector<16x32xbf16>, vector<16x16xf32> -> vector<16x16xf32>
    %cst_50 = arith.constant 0.176776692 : f32
    %102 = vector.broadcast %cst_50 : f32 to vector<16x16xf32>
    %103 = arith.mulf %101, %102 : vector<16x16xf32>
    %104 = arith.addf %103, %2 : vector<16x16xf32>
    %cst_51 = arith.constant dense<0xFF800000> : vector<16xf32>
    %105 = vector.multi_reduction <maximumf>, %104, %cst_51 [1] : vector<16x16xf32> to vector<16xf32>
    %106 = vector.shape_cast %105 : vector<16xf32> to vector<16x1xf32>
    %107 = vector.broadcast %106 : vector<16x1xf32> to vector<16x16xf32>
    %108 = arith.subf %104, %107 : vector<16x16xf32>
    %109 = math.exp %108 : vector<16x16xf32>
    %cst_52 = arith.constant dense<0.000000e+00> : vector<16xf32>
    %110 = vector.multi_reduction <add>, %109, %cst_52 [1] : vector<16x16xf32> to vector<16xf32>
    %111 = vector.shape_cast %110 : vector<16xf32> to vector<16x1xf32>
    %112 = tpu.reciprocal %111 {approx = true} : vector<16x1xf32> -> vector<16x1xf32>
    %113 = vector.broadcast %112 : vector<16x1xf32> to vector<16x16xf32>
    %114 = arith.mulf %109, %113 : vector<16x16xf32>
    %115 = arith.truncf %114 : vector<16x16xf32> to vector<16x16xbf16>
    %cst_53 = arith.constant dense<0.000000e+00> : vector<16x32xf32>
    %116 = tpu.matmul %115, %100, %cst_53 {dimension_numbers = #tpu.dot_dimension_numbers<[1], [0], [0], [1], [0, 0, 1, 1], [], []>} : vector<16x16xbf16>, vector<16x32xbf16>, vector<16x32xf32> -> vector<16x32xf32>
    %117 = arith.truncf %116 : vector<16x32xf32> to vector<16x32xbf16>
    %c0_54 = arith.constant 0 : index
    %c64 = arith.constant 64 : index
    %c0_55 = arith.constant 0 : index
    %118 = vector.load %arg8[%c0_54, %c64, %c0_55] : memref<2x128x128xbf16, #tpu.memory_space<vmem>>, vector<1x32x128xbf16>
    %119 = vector.shape_cast %118 : vector<1x32x128xbf16> to vector<32x128xbf16>
    %cst_56 = arith.constant dense<0.000000e+00> : vector<16x128xf32>
    %120 = tpu.matmul %117, %119, %cst_56 {dimension_numbers = #tpu.dot_dimension_numbers<[1], [0], [0], [1], [0, 0, 1, 1], [], []>} : vector<16x32xbf16>, vector<32x128xbf16>, vector<16x128xf32> -> vector<16x128xf32>
    %121 = arith.addf %97, %120 : vector<16x128xf32>
    %122 = vector.extract_strided_slice %48 {offsets = [0, 96], sizes = [16, 32], strides = [1, 1]} : vector<16x384xbf16> to vector<16x32xbf16>
    %123 = vector.extract_strided_slice %48 {offsets = [0, 224], sizes = [16, 32], strides = [1, 1]} : vector<16x384xbf16> to vector<16x32xbf16>
    %124 = vector.extract_strided_slice %48 {offsets = [0, 352], sizes = [16, 32], strides = [1, 1]} : vector<16x384xbf16> to vector<16x32xbf16>
    %cst_57 = arith.constant dense<0.000000e+00> : vector<16x16xf32>
    %125 = tpu.matmul %122, %123, %cst_57 {dimension_numbers = #tpu.dot_dimension_numbers<[1], [1], [0], [0], [0, 0, 1, 0], [], []>} : vector<16x32xbf16>, vector<16x32xbf16>, vector<16x16xf32> -> vector<16x16xf32>
    %cst_58 = arith.constant 0.176776692 : f32
    %126 = vector.broadcast %cst_58 : f32 to vector<16x16xf32>
    %127 = arith.mulf %125, %126 : vector<16x16xf32>
    %128 = arith.addf %127, %2 : vector<16x16xf32>
    %cst_59 = arith.constant dense<0xFF800000> : vector<16xf32>
    %129 = vector.multi_reduction <maximumf>, %128, %cst_59 [1] : vector<16x16xf32> to vector<16xf32>
    %130 = vector.shape_cast %129 : vector<16xf32> to vector<16x1xf32>
    %131 = vector.broadcast %130 : vector<16x1xf32> to vector<16x16xf32>
    %132 = arith.subf %128, %131 : vector<16x16xf32>
    %133 = math.exp %132 : vector<16x16xf32>
    %cst_60 = arith.constant dense<0.000000e+00> : vector<16xf32>
    %134 = vector.multi_reduction <add>, %133, %cst_60 [1] : vector<16x16xf32> to vector<16xf32>
    %135 = vector.shape_cast %134 : vector<16xf32> to vector<16x1xf32>
    %136 = tpu.reciprocal %135 {approx = true} : vector<16x1xf32> -> vector<16x1xf32>
    %137 = vector.broadcast %136 : vector<16x1xf32> to vector<16x16xf32>
    %138 = arith.mulf %133, %137 : vector<16x16xf32>
    %139 = arith.truncf %138 : vector<16x16xf32> to vector<16x16xbf16>
    %cst_61 = arith.constant dense<0.000000e+00> : vector<16x32xf32>
    %140 = tpu.matmul %139, %124, %cst_61 {dimension_numbers = #tpu.dot_dimension_numbers<[1], [0], [0], [1], [0, 0, 1, 1], [], []>} : vector<16x16xbf16>, vector<16x32xbf16>, vector<16x32xf32> -> vector<16x32xf32>
    %141 = arith.truncf %140 : vector<16x32xf32> to vector<16x32xbf16>
    %c0_62 = arith.constant 0 : index
    %c96 = arith.constant 96 : index
    %c0_63 = arith.constant 0 : index
    %142 = vector.load %arg8[%c0_62, %c96, %c0_63] : memref<2x128x128xbf16, #tpu.memory_space<vmem>>, vector<1x32x128xbf16>
    %143 = vector.shape_cast %142 : vector<1x32x128xbf16> to vector<32x128xbf16>
    %cst_64 = arith.constant dense<0.000000e+00> : vector<16x128xf32>
    %144 = tpu.matmul %141, %143, %cst_64 {dimension_numbers = #tpu.dot_dimension_numbers<[1], [0], [0], [1], [0, 0, 1, 1], [], []>} : vector<16x32xbf16>, vector<32x128xbf16>, vector<16x128xf32> -> vector<16x128xf32>
    %145 = arith.addf %121, %144 : vector<16x128xf32>
    %146 = arith.addf %11, %145 : vector<16x128xf32>
    %147 = vector.broadcast %17 : vector<1x128xf32> to vector<16x128xf32>
    %148 = arith.addf %146, %147 : vector<16x128xf32>
    %cst_65 = arith.constant dense<0.000000e+00> : vector<16xf32>
    %149 = vector.multi_reduction <add>, %148, %cst_65 [1] : vector<16x128xf32> to vector<16xf32>
    %150 = vector.shape_cast %149 : vector<16xf32> to vector<16x1xf32>
    %cst_66 = arith.constant 1.280000e+02 : f32
    %151 = vector.broadcast %cst_66 : f32 to vector<16x1xf32>
    %152 = arith.divf %150, %151 : vector<16x1xf32>
    %153 = vector.broadcast %152 : vector<16x1xf32> to vector<16x128xf32>
    %154 = arith.subf %148, %153 : vector<16x128xf32>
    %155 = arith.mulf %154, %154 : vector<16x128xf32>
    %cst_67 = arith.constant dense<0.000000e+00> : vector<16xf32>
    %156 = vector.multi_reduction <add>, %155, %cst_67 [1] : vector<16x128xf32> to vector<16xf32>
    %157 = vector.shape_cast %156 : vector<16xf32> to vector<16x1xf32>
    %cst_68 = arith.constant 1.280000e+02 : f32
    %158 = vector.broadcast %cst_68 : f32 to vector<16x1xf32>
    %159 = arith.divf %157, %158 : vector<16x1xf32>
    %160 = vector.broadcast %152 : vector<16x1xf32> to vector<16x128xf32>
    %161 = arith.subf %148, %160 : vector<16x128xf32>
    %cst_69 = arith.constant 9.99999974E-6 : f32
    %162 = vector.broadcast %cst_69 : f32 to vector<16x1xf32>
    %163 = arith.addf %159, %162 : vector<16x1xf32>
    %164 = math.rsqrt %163 : vector<16x1xf32>
    %165 = vector.broadcast %164 : vector<16x1xf32> to vector<16x128xf32>
    %166 = arith.mulf %161, %165 : vector<16x128xf32>
    %167 = vector.broadcast %14 : vector<1x128xf32> to vector<16x128xf32>
    %168 = arith.mulf %166, %167 : vector<16x128xf32>
    %169 = vector.broadcast %15 : vector<1x128xf32> to vector<16x128xf32>
    %170 = arith.addf %168, %169 : vector<16x128xf32>
    %171 = arith.truncf %170 : vector<16x128xf32> to vector<16x128xbf16>
    %c0_70 = arith.constant 0 : index
    %c0_71 = arith.constant 0 : index
    %c0_72 = arith.constant 0 : index
    %172 = vector.load %arg9[%c0_70, %c0_71, %c0_72] : memref<2x128x512xbf16, #tpu.memory_space<vmem>>, vector<1x128x512xbf16>
    %173 = vector.shape_cast %172 : vector<1x128x512xbf16> to vector<128x512xbf16>
    %cst_73 = arith.constant dense<0.000000e+00> : vector<16x512xf32>
    %174 = tpu.matmul %171, %173, %cst_73 {dimension_numbers = #tpu.dot_dimension_numbers<[1], [0], [0], [1], [0, 0, 1, 1], [], []>} : vector<16x128xbf16>, vector<128x512xbf16>, vector<16x512xf32> -> vector<16x512xf32>
    %175 = vector.broadcast %18 : vector<1x512xf32> to vector<16x512xf32>
    %176 = arith.addf %174, %175 : vector<16x512xf32>
    %cst_74 = arith.constant 5.000000e-01 : f32
    %177 = vector.broadcast %cst_74 : f32 to vector<16x512xf32>
    %178 = arith.mulf %177, %176 : vector<16x512xf32>
    %cst_75 = arith.constant 4.471500e-02 : f32
    %179 = vector.broadcast %cst_75 : f32 to vector<16x512xf32>
    %180 = arith.mulf %179, %176 : vector<16x512xf32>
    %181 = arith.mulf %180, %176 : vector<16x512xf32>
    %182 = arith.mulf %181, %176 : vector<16x512xf32>
    %183 = arith.addf %176, %182 : vector<16x512xf32>
    %cst_76 = arith.constant 0.797884583 : f32
    %184 = vector.broadcast %cst_76 : f32 to vector<16x512xf32>
    %185 = arith.mulf %184, %183 : vector<16x512xf32>
    %186 = math.tanh %185 : vector<16x512xf32>
    %cst_77 = arith.constant 1.000000e+00 : f32
    %187 = vector.broadcast %cst_77 : f32 to vector<16x512xf32>
    %188 = arith.addf %187, %186 : vector<16x512xf32>
    %189 = arith.mulf %178, %188 : vector<16x512xf32>
    %190 = arith.truncf %189 : vector<16x512xf32> to vector<16x512xbf16>
    %c0_78 = arith.constant 0 : index
    %c0_79 = arith.constant 0 : index
    %c0_80 = arith.constant 0 : index
    %191 = vector.load %arg10[%c0_78, %c0_79, %c0_80] : memref<2x512x128xbf16, #tpu.memory_space<vmem>>, vector<1x512x128xbf16>
    %192 = vector.shape_cast %191 : vector<1x512x128xbf16> to vector<512x128xbf16>
    %cst_81 = arith.constant dense<0.000000e+00> : vector<16x128xf32>
    %193 = tpu.matmul %190, %192, %cst_81 {dimension_numbers = #tpu.dot_dimension_numbers<[1], [0], [0], [1], [0, 0, 1, 1], [], []>} : vector<16x512xbf16>, vector<512x128xbf16>, vector<16x128xf32> -> vector<16x128xf32>
    %194 = arith.addf %148, %193 : vector<16x128xf32>
    %195 = vector.broadcast %19 : vector<1x128xf32> to vector<16x128xf32>
    %196 = arith.addf %194, %195 : vector<16x128xf32>
    %c4 = arith.constant 4 : index
    %c0_82 = arith.constant 0 : index
    %197 = vector.load %arg5[%c4, %c0_82] : memref<10x128xf32, #tpu.memory_space<vmem>>, vector<1x128xf32>
    %c5 = arith.constant 5 : index
    %c0_83 = arith.constant 0 : index
    %198 = vector.load %arg5[%c5, %c0_83] : memref<10x128xf32, #tpu.memory_space<vmem>>, vector<1x128xf32>
    %c6 = arith.constant 6 : index
    %c0_84 = arith.constant 0 : index
    %199 = vector.load %arg5[%c6, %c0_84] : memref<10x128xf32, #tpu.memory_space<vmem>>, vector<1x128xf32>
    %c7 = arith.constant 7 : index
    %c0_85 = arith.constant 0 : index
    %200 = vector.load %arg5[%c7, %c0_85] : memref<10x128xf32, #tpu.memory_space<vmem>>, vector<1x128xf32>
    %c4_86 = arith.constant 4 : index
    %c0_87 = arith.constant 0 : index
    %201 = vector.load %arg6[%c4_86, %c0_87] : memref<9x512xf32, #tpu.memory_space<vmem>>, vector<1x384xf32>
    %c5_88 = arith.constant 5 : index
    %c0_89 = arith.constant 0 : index
    %202 = vector.load %arg6[%c5_88, %c0_89] : memref<9x512xf32, #tpu.memory_space<vmem>>, vector<1x128xf32>
    %c6_90 = arith.constant 6 : index
    %c0_91 = arith.constant 0 : index
    %203 = vector.load %arg6[%c6_90, %c0_91] : memref<9x512xf32, #tpu.memory_space<vmem>>, vector<1x512xf32>
    %c7_92 = arith.constant 7 : index
    %c0_93 = arith.constant 0 : index
    %204 = vector.load %arg6[%c7_92, %c0_93] : memref<9x512xf32, #tpu.memory_space<vmem>>, vector<1x128xf32>
    %cst_94 = arith.constant dense<0.000000e+00> : vector<16xf32>
    %205 = vector.multi_reduction <add>, %196, %cst_94 [1] : vector<16x128xf32> to vector<16xf32>
    %206 = vector.shape_cast %205 : vector<16xf32> to vector<16x1xf32>
    %cst_95 = arith.constant 1.280000e+02 : f32
    %207 = vector.broadcast %cst_95 : f32 to vector<16x1xf32>
    %208 = arith.divf %206, %207 : vector<16x1xf32>
    %209 = vector.broadcast %208 : vector<16x1xf32> to vector<16x128xf32>
    %210 = arith.subf %196, %209 : vector<16x128xf32>
    %211 = arith.mulf %210, %210 : vector<16x128xf32>
    %cst_96 = arith.constant dense<0.000000e+00> : vector<16xf32>
    %212 = vector.multi_reduction <add>, %211, %cst_96 [1] : vector<16x128xf32> to vector<16xf32>
    %213 = vector.shape_cast %212 : vector<16xf32> to vector<16x1xf32>
    %cst_97 = arith.constant 1.280000e+02 : f32
    %214 = vector.broadcast %cst_97 : f32 to vector<16x1xf32>
    %215 = arith.divf %213, %214 : vector<16x1xf32>
    %216 = vector.broadcast %208 : vector<16x1xf32> to vector<16x128xf32>
    %217 = arith.subf %196, %216 : vector<16x128xf32>
    %cst_98 = arith.constant 9.99999974E-6 : f32
    %218 = vector.broadcast %cst_98 : f32 to vector<16x1xf32>
    %219 = arith.addf %215, %218 : vector<16x1xf32>
    %220 = math.rsqrt %219 : vector<16x1xf32>
    %221 = vector.broadcast %220 : vector<16x1xf32> to vector<16x128xf32>
    %222 = arith.mulf %217, %221 : vector<16x128xf32>
    %223 = vector.broadcast %197 : vector<1x128xf32> to vector<16x128xf32>
    %224 = arith.mulf %222, %223 : vector<16x128xf32>
    %225 = vector.broadcast %198 : vector<1x128xf32> to vector<16x128xf32>
    %226 = arith.addf %224, %225 : vector<16x128xf32>
    %227 = arith.truncf %226 : vector<16x128xf32> to vector<16x128xbf16>
    %c1_99 = arith.constant 1 : index
    %c0_100 = arith.constant 0 : index
    %c0_101 = arith.constant 0 : index
    %228 = vector.load %arg7[%c1_99, %c0_100, %c0_101] : memref<2x128x384xbf16, #tpu.memory_space<vmem>>, vector<1x128x384xbf16>
    %229 = vector.shape_cast %228 : vector<1x128x384xbf16> to vector<128x384xbf16>
    %cst_102 = arith.constant dense<0.000000e+00> : vector<16x384xf32>
    %230 = tpu.matmul %227, %229, %cst_102 {dimension_numbers = #tpu.dot_dimension_numbers<[1], [0], [0], [1], [0, 0, 1, 1], [], []>} : vector<16x128xbf16>, vector<128x384xbf16>, vector<16x384xf32> -> vector<16x384xf32>
    %231 = vector.broadcast %201 : vector<1x384xf32> to vector<16x384xf32>
    %232 = arith.addf %230, %231 : vector<16x384xf32>
    %233 = arith.truncf %232 : vector<16x384xf32> to vector<16x384xbf16>
    %cst_103 = arith.constant 0.000000e+00 : f32
    %234 = vector.broadcast %cst_103 : f32 to vector<16x128xf32>
    %235 = vector.extract_strided_slice %233 {offsets = [0, 0], sizes = [16, 32], strides = [1, 1]} : vector<16x384xbf16> to vector<16x32xbf16>
    %236 = vector.extract_strided_slice %233 {offsets = [0, 128], sizes = [16, 32], strides = [1, 1]} : vector<16x384xbf16> to vector<16x32xbf16>
    %237 = vector.extract_strided_slice %233 {offsets = [0, 256], sizes = [16, 32], strides = [1, 1]} : vector<16x384xbf16> to vector<16x32xbf16>
    %cst_104 = arith.constant dense<0.000000e+00> : vector<16x16xf32>
    %238 = tpu.matmul %235, %236, %cst_104 {dimension_numbers = #tpu.dot_dimension_numbers<[1], [1], [0], [0], [0, 0, 1, 0], [], []>} : vector<16x32xbf16>, vector<16x32xbf16>, vector<16x16xf32> -> vector<16x16xf32>
    %cst_105 = arith.constant 0.176776692 : f32
    %239 = vector.broadcast %cst_105 : f32 to vector<16x16xf32>
    %240 = arith.mulf %238, %239 : vector<16x16xf32>
    %241 = arith.addf %240, %2 : vector<16x16xf32>
    %cst_106 = arith.constant dense<0xFF800000> : vector<16xf32>
    %242 = vector.multi_reduction <maximumf>, %241, %cst_106 [1] : vector<16x16xf32> to vector<16xf32>
    %243 = vector.shape_cast %242 : vector<16xf32> to vector<16x1xf32>
    %244 = vector.broadcast %243 : vector<16x1xf32> to vector<16x16xf32>
    %245 = arith.subf %241, %244 : vector<16x16xf32>
    %246 = math.exp %245 : vector<16x16xf32>
    %cst_107 = arith.constant dense<0.000000e+00> : vector<16xf32>
    %247 = vector.multi_reduction <add>, %246, %cst_107 [1] : vector<16x16xf32> to vector<16xf32>
    %248 = vector.shape_cast %247 : vector<16xf32> to vector<16x1xf32>
    %249 = tpu.reciprocal %248 {approx = true} : vector<16x1xf32> -> vector<16x1xf32>
    %250 = vector.broadcast %249 : vector<16x1xf32> to vector<16x16xf32>
    %251 = arith.mulf %246, %250 : vector<16x16xf32>
    %252 = arith.truncf %251 : vector<16x16xf32> to vector<16x16xbf16>
    %cst_108 = arith.constant dense<0.000000e+00> : vector<16x32xf32>
    %253 = tpu.matmul %252, %237, %cst_108 {dimension_numbers = #tpu.dot_dimension_numbers<[1], [0], [0], [1], [0, 0, 1, 1], [], []>} : vector<16x16xbf16>, vector<16x32xbf16>, vector<16x32xf32> -> vector<16x32xf32>
    %254 = arith.truncf %253 : vector<16x32xf32> to vector<16x32xbf16>
    %c1_109 = arith.constant 1 : index
    %c0_110 = arith.constant 0 : index
    %c0_111 = arith.constant 0 : index
    %255 = vector.load %arg8[%c1_109, %c0_110, %c0_111] : memref<2x128x128xbf16, #tpu.memory_space<vmem>>, vector<1x32x128xbf16>
    %256 = vector.shape_cast %255 : vector<1x32x128xbf16> to vector<32x128xbf16>
    %cst_112 = arith.constant dense<0.000000e+00> : vector<16x128xf32>
    %257 = tpu.matmul %254, %256, %cst_112 {dimension_numbers = #tpu.dot_dimension_numbers<[1], [0], [0], [1], [0, 0, 1, 1], [], []>} : vector<16x32xbf16>, vector<32x128xbf16>, vector<16x128xf32> -> vector<16x128xf32>
    %258 = arith.addf %234, %257 : vector<16x128xf32>
    %259 = vector.extract_strided_slice %233 {offsets = [0, 32], sizes = [16, 32], strides = [1, 1]} : vector<16x384xbf16> to vector<16x32xbf16>
    %260 = vector.extract_strided_slice %233 {offsets = [0, 160], sizes = [16, 32], strides = [1, 1]} : vector<16x384xbf16> to vector<16x32xbf16>
    %261 = vector.extract_strided_slice %233 {offsets = [0, 288], sizes = [16, 32], strides = [1, 1]} : vector<16x384xbf16> to vector<16x32xbf16>
    %cst_113 = arith.constant dense<0.000000e+00> : vector<16x16xf32>
    %262 = tpu.matmul %259, %260, %cst_113 {dimension_numbers = #tpu.dot_dimension_numbers<[1], [1], [0], [0], [0, 0, 1, 0], [], []>} : vector<16x32xbf16>, vector<16x32xbf16>, vector<16x16xf32> -> vector<16x16xf32>
    %cst_114 = arith.constant 0.176776692 : f32
    %263 = vector.broadcast %cst_114 : f32 to vector<16x16xf32>
    %264 = arith.mulf %262, %263 : vector<16x16xf32>
    %265 = arith.addf %264, %2 : vector<16x16xf32>
    %cst_115 = arith.constant dense<0xFF800000> : vector<16xf32>
    %266 = vector.multi_reduction <maximumf>, %265, %cst_115 [1] : vector<16x16xf32> to vector<16xf32>
    %267 = vector.shape_cast %266 : vector<16xf32> to vector<16x1xf32>
    %268 = vector.broadcast %267 : vector<16x1xf32> to vector<16x16xf32>
    %269 = arith.subf %265, %268 : vector<16x16xf32>
    %270 = math.exp %269 : vector<16x16xf32>
    %cst_116 = arith.constant dense<0.000000e+00> : vector<16xf32>
    %271 = vector.multi_reduction <add>, %270, %cst_116 [1] : vector<16x16xf32> to vector<16xf32>
    %272 = vector.shape_cast %271 : vector<16xf32> to vector<16x1xf32>
    %273 = tpu.reciprocal %272 {approx = true} : vector<16x1xf32> -> vector<16x1xf32>
    %274 = vector.broadcast %273 : vector<16x1xf32> to vector<16x16xf32>
    %275 = arith.mulf %270, %274 : vector<16x16xf32>
    %276 = arith.truncf %275 : vector<16x16xf32> to vector<16x16xbf16>
    %cst_117 = arith.constant dense<0.000000e+00> : vector<16x32xf32>
    %277 = tpu.matmul %276, %261, %cst_117 {dimension_numbers = #tpu.dot_dimension_numbers<[1], [0], [0], [1], [0, 0, 1, 1], [], []>} : vector<16x16xbf16>, vector<16x32xbf16>, vector<16x32xf32> -> vector<16x32xf32>
    %278 = arith.truncf %277 : vector<16x32xf32> to vector<16x32xbf16>
    %c1_118 = arith.constant 1 : index
    %c32_119 = arith.constant 32 : index
    %c0_120 = arith.constant 0 : index
    %279 = vector.load %arg8[%c1_118, %c32_119, %c0_120] : memref<2x128x128xbf16, #tpu.memory_space<vmem>>, vector<1x32x128xbf16>
    %280 = vector.shape_cast %279 : vector<1x32x128xbf16> to vector<32x128xbf16>
    %cst_121 = arith.constant dense<0.000000e+00> : vector<16x128xf32>
    %281 = tpu.matmul %278, %280, %cst_121 {dimension_numbers = #tpu.dot_dimension_numbers<[1], [0], [0], [1], [0, 0, 1, 1], [], []>} : vector<16x32xbf16>, vector<32x128xbf16>, vector<16x128xf32> -> vector<16x128xf32>
    %282 = arith.addf %258, %281 : vector<16x128xf32>
    %283 = vector.extract_strided_slice %233 {offsets = [0, 64], sizes = [16, 32], strides = [1, 1]} : vector<16x384xbf16> to vector<16x32xbf16>
    %284 = vector.extract_strided_slice %233 {offsets = [0, 192], sizes = [16, 32], strides = [1, 1]} : vector<16x384xbf16> to vector<16x32xbf16>
    %285 = vector.extract_strided_slice %233 {offsets = [0, 320], sizes = [16, 32], strides = [1, 1]} : vector<16x384xbf16> to vector<16x32xbf16>
    %cst_122 = arith.constant dense<0.000000e+00> : vector<16x16xf32>
    %286 = tpu.matmul %283, %284, %cst_122 {dimension_numbers = #tpu.dot_dimension_numbers<[1], [1], [0], [0], [0, 0, 1, 0], [], []>} : vector<16x32xbf16>, vector<16x32xbf16>, vector<16x16xf32> -> vector<16x16xf32>
    %cst_123 = arith.constant 0.176776692 : f32
    %287 = vector.broadcast %cst_123 : f32 to vector<16x16xf32>
    %288 = arith.mulf %286, %287 : vector<16x16xf32>
    %289 = arith.addf %288, %2 : vector<16x16xf32>
    %cst_124 = arith.constant dense<0xFF800000> : vector<16xf32>
    %290 = vector.multi_reduction <maximumf>, %289, %cst_124 [1] : vector<16x16xf32> to vector<16xf32>
    %291 = vector.shape_cast %290 : vector<16xf32> to vector<16x1xf32>
    %292 = vector.broadcast %291 : vector<16x1xf32> to vector<16x16xf32>
    %293 = arith.subf %289, %292 : vector<16x16xf32>
    %294 = math.exp %293 : vector<16x16xf32>
    %cst_125 = arith.constant dense<0.000000e+00> : vector<16xf32>
    %295 = vector.multi_reduction <add>, %294, %cst_125 [1] : vector<16x16xf32> to vector<16xf32>
    %296 = vector.shape_cast %295 : vector<16xf32> to vector<16x1xf32>
    %297 = tpu.reciprocal %296 {approx = true} : vector<16x1xf32> -> vector<16x1xf32>
    %298 = vector.broadcast %297 : vector<16x1xf32> to vector<16x16xf32>
    %299 = arith.mulf %294, %298 : vector<16x16xf32>
    %300 = arith.truncf %299 : vector<16x16xf32> to vector<16x16xbf16>
    %cst_126 = arith.constant dense<0.000000e+00> : vector<16x32xf32>
    %301 = tpu.matmul %300, %285, %cst_126 {dimension_numbers = #tpu.dot_dimension_numbers<[1], [0], [0], [1], [0, 0, 1, 1], [], []>} : vector<16x16xbf16>, vector<16x32xbf16>, vector<16x32xf32> -> vector<16x32xf32>
    %302 = arith.truncf %301 : vector<16x32xf32> to vector<16x32xbf16>
    %c1_127 = arith.constant 1 : index
    %c64_128 = arith.constant 64 : index
    %c0_129 = arith.constant 0 : index
    %303 = vector.load %arg8[%c1_127, %c64_128, %c0_129] : memref<2x128x128xbf16, #tpu.memory_space<vmem>>, vector<1x32x128xbf16>
    %304 = vector.shape_cast %303 : vector<1x32x128xbf16> to vector<32x128xbf16>
    %cst_130 = arith.constant dense<0.000000e+00> : vector<16x128xf32>
    %305 = tpu.matmul %302, %304, %cst_130 {dimension_numbers = #tpu.dot_dimension_numbers<[1], [0], [0], [1], [0, 0, 1, 1], [], []>} : vector<16x32xbf16>, vector<32x128xbf16>, vector<16x128xf32> -> vector<16x128xf32>
    %306 = arith.addf %282, %305 : vector<16x128xf32>
    %307 = vector.extract_strided_slice %233 {offsets = [0, 96], sizes = [16, 32], strides = [1, 1]} : vector<16x384xbf16> to vector<16x32xbf16>
    %308 = vector.extract_strided_slice %233 {offsets = [0, 224], sizes = [16, 32], strides = [1, 1]} : vector<16x384xbf16> to vector<16x32xbf16>
    %309 = vector.extract_strided_slice %233 {offsets = [0, 352], sizes = [16, 32], strides = [1, 1]} : vector<16x384xbf16> to vector<16x32xbf16>
    %cst_131 = arith.constant dense<0.000000e+00> : vector<16x16xf32>
    %310 = tpu.matmul %307, %308, %cst_131 {dimension_numbers = #tpu.dot_dimension_numbers<[1], [1], [0], [0], [0, 0, 1, 0], [], []>} : vector<16x32xbf16>, vector<16x32xbf16>, vector<16x16xf32> -> vector<16x16xf32>
    %cst_132 = arith.constant 0.176776692 : f32
    %311 = vector.broadcast %cst_132 : f32 to vector<16x16xf32>
    %312 = arith.mulf %310, %311 : vector<16x16xf32>
    %313 = arith.addf %312, %2 : vector<16x16xf32>
    %cst_133 = arith.constant dense<0xFF800000> : vector<16xf32>
    %314 = vector.multi_reduction <maximumf>, %313, %cst_133 [1] : vector<16x16xf32> to vector<16xf32>
    %315 = vector.shape_cast %314 : vector<16xf32> to vector<16x1xf32>
    %316 = vector.broadcast %315 : vector<16x1xf32> to vector<16x16xf32>
    %317 = arith.subf %313, %316 : vector<16x16xf32>
    %318 = math.exp %317 : vector<16x16xf32>
    %cst_134 = arith.constant dense<0.000000e+00> : vector<16xf32>
    %319 = vector.multi_reduction <add>, %318, %cst_134 [1] : vector<16x16xf32> to vector<16xf32>
    %320 = vector.shape_cast %319 : vector<16xf32> to vector<16x1xf32>
    %321 = tpu.reciprocal %320 {approx = true} : vector<16x1xf32> -> vector<16x1xf32>
    %322 = vector.broadcast %321 : vector<16x1xf32> to vector<16x16xf32>
    %323 = arith.mulf %318, %322 : vector<16x16xf32>
    %324 = arith.truncf %323 : vector<16x16xf32> to vector<16x16xbf16>
    %cst_135 = arith.constant dense<0.000000e+00> : vector<16x32xf32>
    %325 = tpu.matmul %324, %309, %cst_135 {dimension_numbers = #tpu.dot_dimension_numbers<[1], [0], [0], [1], [0, 0, 1, 1], [], []>} : vector<16x16xbf16>, vector<16x32xbf16>, vector<16x32xf32> -> vector<16x32xf32>
    %326 = arith.truncf %325 : vector<16x32xf32> to vector<16x32xbf16>
    %c1_136 = arith.constant 1 : index
    %c96_137 = arith.constant 96 : index
    %c0_138 = arith.constant 0 : index
    %327 = vector.load %arg8[%c1_136, %c96_137, %c0_138] : memref<2x128x128xbf16, #tpu.memory_space<vmem>>, vector<1x32x128xbf16>
    %328 = vector.shape_cast %327 : vector<1x32x128xbf16> to vector<32x128xbf16>
    %cst_139 = arith.constant dense<0.000000e+00> : vector<16x128xf32>
    %329 = tpu.matmul %326, %328, %cst_139 {dimension_numbers = #tpu.dot_dimension_numbers<[1], [0], [0], [1], [0, 0, 1, 1], [], []>} : vector<16x32xbf16>, vector<32x128xbf16>, vector<16x128xf32> -> vector<16x128xf32>
    %330 = arith.addf %306, %329 : vector<16x128xf32>
    %331 = arith.addf %196, %330 : vector<16x128xf32>
    %332 = vector.broadcast %202 : vector<1x128xf32> to vector<16x128xf32>
    %333 = arith.addf %331, %332 : vector<16x128xf32>
    %cst_140 = arith.constant dense<0.000000e+00> : vector<16xf32>
    %334 = vector.multi_reduction <add>, %333, %cst_140 [1] : vector<16x128xf32> to vector<16xf32>
    %335 = vector.shape_cast %334 : vector<16xf32> to vector<16x1xf32>
    %cst_141 = arith.constant 1.280000e+02 : f32
    %336 = vector.broadcast %cst_141 : f32 to vector<16x1xf32>
    %337 = arith.divf %335, %336 : vector<16x1xf32>
    %338 = vector.broadcast %337 : vector<16x1xf32> to vector<16x128xf32>
    %339 = arith.subf %333, %338 : vector<16x128xf32>
    %340 = arith.mulf %339, %339 : vector<16x128xf32>
    %cst_142 = arith.constant dense<0.000000e+00> : vector<16xf32>
    %341 = vector.multi_reduction <add>, %340, %cst_142 [1] : vector<16x128xf32> to vector<16xf32>
    %342 = vector.shape_cast %341 : vector<16xf32> to vector<16x1xf32>
    %cst_143 = arith.constant 1.280000e+02 : f32
    %343 = vector.broadcast %cst_143 : f32 to vector<16x1xf32>
    %344 = arith.divf %342, %343 : vector<16x1xf32>
    %345 = vector.broadcast %337 : vector<16x1xf32> to vector<16x128xf32>
    %346 = arith.subf %333, %345 : vector<16x128xf32>
    %cst_144 = arith.constant 9.99999974E-6 : f32
    %347 = vector.broadcast %cst_144 : f32 to vector<16x1xf32>
    %348 = arith.addf %344, %347 : vector<16x1xf32>
    %349 = math.rsqrt %348 : vector<16x1xf32>
    %350 = vector.broadcast %349 : vector<16x1xf32> to vector<16x128xf32>
    %351 = arith.mulf %346, %350 : vector<16x128xf32>
    %352 = vector.broadcast %199 : vector<1x128xf32> to vector<16x128xf32>
    %353 = arith.mulf %351, %352 : vector<16x128xf32>
    %354 = vector.broadcast %200 : vector<1x128xf32> to vector<16x128xf32>
    %355 = arith.addf %353, %354 : vector<16x128xf32>
    %356 = arith.truncf %355 : vector<16x128xf32> to vector<16x128xbf16>
    %c1_145 = arith.constant 1 : index
    %c0_146 = arith.constant 0 : index
    %c0_147 = arith.constant 0 : index
    %357 = vector.load %arg9[%c1_145, %c0_146, %c0_147] : memref<2x128x512xbf16, #tpu.memory_space<vmem>>, vector<1x128x512xbf16>
    %358 = vector.shape_cast %357 : vector<1x128x512xbf16> to vector<128x512xbf16>
    %cst_148 = arith.constant dense<0.000000e+00> : vector<16x512xf32>
    %359 = tpu.matmul %356, %358, %cst_148 {dimension_numbers = #tpu.dot_dimension_numbers<[1], [0], [0], [1], [0, 0, 1, 1], [], []>} : vector<16x128xbf16>, vector<128x512xbf16>, vector<16x512xf32> -> vector<16x512xf32>
    %360 = vector.broadcast %203 : vector<1x512xf32> to vector<16x512xf32>
    %361 = arith.addf %359, %360 : vector<16x512xf32>
    %cst_149 = arith.constant 5.000000e-01 : f32
    %362 = vector.broadcast %cst_149 : f32 to vector<16x512xf32>
    %363 = arith.mulf %362, %361 : vector<16x512xf32>
    %cst_150 = arith.constant 4.471500e-02 : f32
    %364 = vector.broadcast %cst_150 : f32 to vector<16x512xf32>
    %365 = arith.mulf %364, %361 : vector<16x512xf32>
    %366 = arith.mulf %365, %361 : vector<16x512xf32>
    %367 = arith.mulf %366, %361 : vector<16x512xf32>
    %368 = arith.addf %361, %367 : vector<16x512xf32>
    %cst_151 = arith.constant 0.797884583 : f32
    %369 = vector.broadcast %cst_151 : f32 to vector<16x512xf32>
    %370 = arith.mulf %369, %368 : vector<16x512xf32>
    %371 = math.tanh %370 : vector<16x512xf32>
    %cst_152 = arith.constant 1.000000e+00 : f32
    %372 = vector.broadcast %cst_152 : f32 to vector<16x512xf32>
    %373 = arith.addf %372, %371 : vector<16x512xf32>
    %374 = arith.mulf %363, %373 : vector<16x512xf32>
    %375 = arith.truncf %374 : vector<16x512xf32> to vector<16x512xbf16>
    %c1_153 = arith.constant 1 : index
    %c0_154 = arith.constant 0 : index
    %c0_155 = arith.constant 0 : index
    %376 = vector.load %arg10[%c1_153, %c0_154, %c0_155] : memref<2x512x128xbf16, #tpu.memory_space<vmem>>, vector<1x512x128xbf16>
    %377 = vector.shape_cast %376 : vector<1x512x128xbf16> to vector<512x128xbf16>
    %cst_156 = arith.constant dense<0.000000e+00> : vector<16x128xf32>
    %378 = tpu.matmul %375, %377, %cst_156 {dimension_numbers = #tpu.dot_dimension_numbers<[1], [0], [0], [1], [0, 0, 1, 1], [], []>} : vector<16x512xbf16>, vector<512x128xbf16>, vector<16x128xf32> -> vector<16x128xf32>
    %379 = arith.addf %333, %378 : vector<16x128xf32>
    %380 = vector.broadcast %204 : vector<1x128xf32> to vector<16x128xf32>
    %381 = arith.addf %379, %380 : vector<16x128xf32>
    %c8 = arith.constant 8 : index
    %c0_157 = arith.constant 0 : index
    %382 = vector.load %arg5[%c8, %c0_157] : memref<10x128xf32, #tpu.memory_space<vmem>>, vector<1x128xf32>
    %c9 = arith.constant 9 : index
    %c0_158 = arith.constant 0 : index
    %383 = vector.load %arg5[%c9, %c0_158] : memref<10x128xf32, #tpu.memory_space<vmem>>, vector<1x128xf32>
    %c8_159 = arith.constant 8 : index
    %c0_160 = arith.constant 0 : index
    %384 = vector.load %arg6[%c8_159, %c0_160] : memref<9x512xf32, #tpu.memory_space<vmem>>, vector<1x128xf32>
    %cst_161 = arith.constant dense<0.000000e+00> : vector<16xf32>
    %385 = vector.multi_reduction <add>, %381, %cst_161 [1] : vector<16x128xf32> to vector<16xf32>
    %386 = vector.shape_cast %385 : vector<16xf32> to vector<16x1xf32>
    %cst_162 = arith.constant 1.280000e+02 : f32
    %387 = vector.broadcast %cst_162 : f32 to vector<16x1xf32>
    %388 = arith.divf %386, %387 : vector<16x1xf32>
    %389 = vector.broadcast %388 : vector<16x1xf32> to vector<16x128xf32>
    %390 = arith.subf %381, %389 : vector<16x128xf32>
    %391 = arith.mulf %390, %390 : vector<16x128xf32>
    %cst_163 = arith.constant dense<0.000000e+00> : vector<16xf32>
    %392 = vector.multi_reduction <add>, %391, %cst_163 [1] : vector<16x128xf32> to vector<16xf32>
    %393 = vector.shape_cast %392 : vector<16xf32> to vector<16x1xf32>
    %cst_164 = arith.constant 1.280000e+02 : f32
    %394 = vector.broadcast %cst_164 : f32 to vector<16x1xf32>
    %395 = arith.divf %393, %394 : vector<16x1xf32>
    %396 = vector.broadcast %388 : vector<16x1xf32> to vector<16x128xf32>
    %397 = arith.subf %381, %396 : vector<16x128xf32>
    %cst_165 = arith.constant 9.99999974E-6 : f32
    %398 = vector.broadcast %cst_165 : f32 to vector<16x1xf32>
    %399 = arith.addf %395, %398 : vector<16x1xf32>
    %400 = math.rsqrt %399 : vector<16x1xf32>
    %401 = vector.broadcast %400 : vector<16x1xf32> to vector<16x128xf32>
    %402 = arith.mulf %397, %401 : vector<16x128xf32>
    %403 = vector.broadcast %382 : vector<1x128xf32> to vector<16x128xf32>
    %404 = arith.mulf %402, %403 : vector<16x128xf32>
    %405 = vector.broadcast %383 : vector<1x128xf32> to vector<16x128xf32>
    %406 = arith.addf %404, %405 : vector<16x128xf32>
    %407 = arith.truncf %406 : vector<16x128xf32> to vector<16x128xbf16>
    %c0_166 = arith.constant 0 : index
    %c0_167 = arith.constant 0 : index
    %408 = vector.load %arg11[%c0_166, %c0_167] : memref<128x128xbf16, #tpu.memory_space<vmem>>, vector<128x128xbf16>
    %cst_168 = arith.constant dense<0.000000e+00> : vector<16x128xf32>
    %409 = tpu.matmul %407, %408, %cst_168 {dimension_numbers = #tpu.dot_dimension_numbers<[1], [0], [0], [1], [0, 0, 1, 1], [], []>} : vector<16x128xbf16>, vector<128x128xbf16>, vector<16x128xf32> -> vector<16x128xf32>
    %410 = vector.broadcast %384 : vector<1x128xf32> to vector<16x128xf32>
    %411 = arith.addf %409, %410 : vector<16x128xf32>
    %c0_169 = arith.constant 0 : index
    %c0_170 = arith.constant 0 : index
    %412 = vector.load %arg12[%c0_169, %c0_170] : memref<16x128xf32, #tpu.memory_space<vmem>>, vector<16x128xf32>
    tpu.vector_store %arg12[%c0_169, %c0_170], %411 {strides = array<i32>} : memref<16x128xf32, #tpu.memory_space<vmem>>, vector<16x128xf32>,
    %413 = tpu.iota {dimensions = array<i32: 1>} : vector<16x128xi32>
    %c5_i32 = arith.constant 5 : i32
    %414 = vector.broadcast %c5_i32 : i32 to vector<16x128xi32>
    %415 = arith.cmpi slt, %413, %414 : vector<16x128xi32>
    %cst_171 = arith.constant -1.000000e+09 : f32
    %416 = vector.broadcast %cst_171 : f32 to vector<16x128xf32>
    %417 = arith.select %415, %411, %416 : vector<16x128xi1>, vector<16x128xf32>
    %cst_172 = arith.constant dense<0xFF800000> : vector<16xf32>
    %418 = vector.multi_reduction <maximumf>, %417, %cst_172 [1] : vector<16x128xf32> to vector<16xf32>
    %419 = vector.shape_cast %418 : vector<16xf32> to vector<16x1xf32>
    %420 = vector.broadcast %419 : vector<16x1xf32> to vector<16x128xf32>
    %421 = arith.subf %417, %420 : vector<16x128xf32>
    %422 = math.exp %421 : vector<16x128xf32>
    %cst_173 = arith.constant dense<0.000000e+00> : vector<16xf32>
    %423 = vector.multi_reduction <add>, %422, %cst_173 [1] : vector<16x128xf32> to vector<16xf32>
    %424 = vector.shape_cast %423 : vector<16xf32> to vector<16x1xf32>
    %425 = math.log %424 : vector<16x1xf32>
    %426 = arith.addf %425, %419 : vector<16x1xf32>
    %427 = vector.broadcast %1 : vector<16x1xi32> to vector<16x128xi32>
    %428 = arith.cmpi eq, %413, %427 : vector<16x128xi32>
    %cst_174 = arith.constant 0.000000e+00 : f32
    %429 = vector.broadcast %cst_174 : f32 to vector<16x128xf32>
    %430 = arith.select %428, %411, %429 : vector<16x128xi1>, vector<16x128xf32>
    %cst_175 = arith.constant dense<0.000000e+00> : vector<16xf32>
    %431 = vector.multi_reduction <add>, %430, %cst_175 [1] : vector<16x128xf32> to vector<16xf32>
    %432 = vector.shape_cast %431 : vector<16xf32> to vector<16x1xf32>
    %c-100_i32 = arith.constant -100 : i32
    %433 = vector.broadcast %c-100_i32 : i32 to vector<16x1xi32>
    %434 = arith.cmpi ne, %1, %433 : vector<16x1xi32>
    %435 = arith.extui %434 : vector<16x1xi1> to vector<16x1xi32>
    %436 = arith.sitofp %435 : vector<16x1xi32> to vector<16x1xf32>
    %437 = arith.subf %426, %432 : vector<16x1xf32>
    %438 = arith.mulf %437, %436 : vector<16x1xf32>
    %cst_176 = arith.constant dense<0.000000e+00> : vector<1xf32>
    %439 = vector.multi_reduction <add>, %438, %cst_176 [0] : vector<16x1xf32> to vector<1xf32>
    %440 = vector.shape_cast %439 : vector<1xf32> to vector<1x1xf32>
    %cst_177 = arith.constant dense<0.000000e+00> : vector<1xf32>
    %441 = vector.multi_reduction <add>, %436, %cst_177 [0] : vector<16x1xf32> to vector<1xf32>
    %442 = vector.shape_cast %441 : vector<1xf32> to vector<1x1xf32>
    %cst_178 = arith.constant 1.000000e+00 : f32
    %443 = vector.broadcast %cst_178 : f32 to vector<1x1xf32>
    %444 = arith.maximumf %442, %443 : vector<1x1xf32>
    %445 = arith.divf %440, %444 : vector<1x1xf32>
    %446 = vector.shape_cast %445 : vector<1x1xf32> to vector<1x1xf32>
    %447 = vector.broadcast %446 : vector<1x1xf32> to vector<1x128xf32>
    %c0_179 = arith.constant 0 : index
    %c0_180 = arith.constant 0 : index
    %448 = vector.load %arg13[%c0_179, %c0_180] : memref<1x128xf32, #tpu.memory_space<vmem>>, vector<1x128xf32>
    tpu.vector_store %arg13[%c0_179, %c0_180], %447 {strides = array<i32>} : memref<1x128xf32, #tpu.memory_space<vmem>>, vector<1x128xf32>,
    return
  }
  func.func @transform_0(%arg0: i32) -> (i32, i32) {
    %c0_i32 = arith.constant 0 : i32
    %c0_i32_0 = arith.constant 0 : i32
    %c0_i32_1 = arith.constant 0 : i32
    return %c0_i32, %c0_i32_0 : i32, i32
  }
  func.func @transform_1(%arg0: i32) -> (i32, i32) {
    %c0_i32 = arith.constant 0 : i32
    %c0_i32_0 = arith.constant 0 : i32
    %c0_i32_1 = arith.constant 0 : i32
    return %c0_i32, %c0_i32_0 : i32, i32
  }
  func.func @transform_2(%arg0: i32) -> (i32, i32) {
    %c0_i32 = arith.constant 0 : i32
    %c0_i32_0 = arith.constant 0 : i32
    %c0_i32_1 = arith.constant 0 : i32
    return %c0_i32, %c0_i32_0 : i32, i32
  }
  func.func @transform_3(%arg0: i32) -> (i32, i32) {
    %c0_i32 = arith.constant 0 : i32
    %c0_i32_0 = arith.constant 0 : i32
    %c0_i32_1 = arith.constant 0 : i32
    return %c0_i32, %c0_i32_0 : i32, i32
  }
  func.func @transform_4(%arg0: i32) -> (i32, i32) {
    %c0_i32 = arith.constant 0 : i32
    %c0_i32_0 = arith.constant 0 : i32
    %c0_i32_1 = arith.constant 0 : i32
    return %c0_i32, %c0_i32_0 : i32, i32
  }
  func.func @transform_5(%arg0: i32) -> (i32, i32) {
    %c0_i32 = arith.constant 0 : i32
    %c0_i32_0 = arith.constant 0 : i32
    %c0_i32_1 = arith.constant 0 : i32
    return %c0_i32, %c0_i32_0 : i32, i32
  }
  func.func @transform_6(%arg0: i32) -> (i32, i32, i32) {
    %c0_i32 = arith.constant 0 : i32
    %c0_i32_0 = arith.constant 0 : i32
    %c0_i32_1 = arith.constant 0 : i32
    %c0_i32_2 = arith.constant 0 : i32
    return %c0_i32, %c0_i32_0, %c0_i32_1 : i32, i32, i32
  }
  func.func @transform_7(%arg0: i32) -> (i32, i32, i32) {
    %c0_i32 = arith.constant 0 : i32
    %c0_i32_0 = arith.constant 0 : i32
    %c0_i32_1 = arith.constant 0 : i32
    %c0_i32_2 = arith.constant 0 : i32
    return %c0_i32, %c0_i32_0, %c0_i32_1 : i32, i32, i32
  }
  func.func @transform_8(%arg0: i32) -> (i32, i32, i32) {
    %c0_i32 = arith.constant 0 : i32
    %c0_i32_0 = arith.constant 0 : i32
    %c0_i32_1 = arith.constant 0 : i32
    %c0_i32_2 = arith.constant 0 : i32
    return %c0_i32, %c0_i32_0, %c0_i32_1 : i32, i32, i32
  }
  func.func @transform_9(%arg0: i32) -> (i32, i32, i32) {
    %c0_i32 = arith.constant 0 : i32
    %c0_i32_0 = arith.constant 0 : i32
    %c0_i32_1 = arith.constant 0 : i32
    %c0_i32_2 = arith.constant 0 : i32
    return %c0_i32, %c0_i32_0, %c0_i32_1 : i32, i32, i32
  }
  func.func @transform_10(%arg0: i32) -> (i32, i32) {
    %c0_i32 = arith.constant 0 : i32
    %c0_i32_0 = arith.constant 0 : i32
    %c0_i32_1 = arith.constant 0 : i32
    return %c0_i32, %c0_i32_0 : i32, i32
  }
  func.func @transform_11(%arg0: i32) -> (i32, i32) {
    %c0_i32 = arith.constant 0 : i32
    %c0_i32_0 = arith.constant 0 : i32
    %c0_i32_1 = arith.constant 0 : i32
    return %c0_i32, %c0_i32_0 : i32, i32
  }
  func.func @transform_12(%arg0: i32) -> (i32, i32) {
    %c0_i32 = arith.constant 0 : i32
    %c0_i32_0 = arith.constant 0 : i32
    %c0_i32_1 = arith.constant 0 : i32
    return %c0_i32, %c0_i32_0 : i32, i32
  }
}

</mosaic_0001>

<bundles_post_ra>
// kernel: le.8
= control target key start
LH: loop header
LB: loop body
LE: loop exit
PB: predicated region body
PF: predicated region fallthrough
CT: control target
= control target key end

     0   :  { %vm7_vm0 = vcmask 64512   ;;  %vm13_vm1 = vcmask 130112   ;;  %s39_s0 = inlined_call_operand.vmem [shape: s32[2,8], index: 0, kind: input, shape index: {}]   ;;  %s40_s1 = inlined_call_operand.vmem [shape: s32[16], index: 1, kind: output, shape index: {}]  }
   0x1   :  { %v4_v0 = vld [vmem:[%s39_s0] sm:$0x3]  ;;  %s22_s0 = smov 8  }
   0x2   :  { %5 = vst [vmem:[#allocation1] sm:$0x3] %v4_v0 }
   0x9   :  { %v10_v1 = vld [vmem:[#allocation1 + $0x1] sm:$0x1]   ;;  %v6_v2 = vld [vmem:[#allocation1] sm:$0x1]  }
   0xa   :  { %11 = vrot.lane.b32.xlu0 %v10_v1, %s22_s0  ;;  %8 = vst.msk [vmem:[#allocation0] sm:$0x1] %vm7_vm0, %v6_v2  }
  0x7c   :  { %v12_v3 = vpop.permute.xlu0 %11  }
  0x7d   :  { %14 = vst.msk [vmem:[#allocation0] sm:$0x1] %vm13_vm1, %v12_v3  }
  0x84   :  { %v18_v4 = vld [vmem:[#allocation0] sm:$0x1] }
  0x85   :  { %20 = vst [vmem:[%s40_s1] sm:$0x1] %v18_v4 }

// kernel: gpt_token_classification_forward.1
= control target key start
LH: loop header
LB: loop body
LE: loop exit
PB: predicated region body
PF: predicated region fallthrough
CT: control target
= control target key end

     0   :  { %18 = vsyncpa [#allocation3], 0  ;;  %s6160_s0 = inlined_call_operand.vmem [shape: s32[16,2], index: 0, kind: input, shape index: {}]   ;;  %s6161_s1 = inlined_call_operand.vmem [shape: f32[16,16], index: 1, kind: input, shape index: {}]   ;;  %s6162_s2 = inlined_call_operand.hbm [shape: f32[64,128], index: 2, kind: input, shape index: {}]   ;;  %s6163_s3 = inlined_call_operand.vmem [shape: f32[16,128], index: 3, kind: input, shape index: {}]   ;;  %s6164_s4 = inlined_call_operand.hbm [shape: f32[10,128], index: 4, kind: input, shape index: {}]   ;;  %s6165_s5 = inlined_call_operand.hbm [shape: f32[9,512], index: 5, kind: input, shape index: {}]   ;;  %s6166_s6 = inlined_call_operand.hbm [shape: bf16[2,128,384], index: 6, kind: input, shape index: {}]   ;;  %s6167_s7 = inlined_call_operand.vmem [shape: bf16[2,128,128], index: 7, kind: input, shape index: {}]   ;;  %s6168_s8 = inlined_call_operand.hbm [shape: bf16[2,128,512], index: 8, kind: input, shape index: {}]   ;;  %s6169_s9 = inlined_call_operand.hbm [shape: bf16[2,512,128], index: 9, kind: input, shape index: {}]   ;;  %s6170_s10 = inlined_call_operand.hbm [shape: bf16[128,128], index: 10, kind: input, shape index: {}]   ;;  %s6171_s11 = inlined_call_operand.vmem [shape: f32[16,128], index: 11, kind: output, shape index: {0}]   ;;  %s6172_s12 = inlined_call_operand.hbm [shape: f32[1,128], index: 12, kind: output, shape index: {1}]  }
   0x1   :  { %19 = vsyncpa [#allocation6], 0 }
   0x2   :  { %20 = vsyncpa [#allocation9], 0 }
   0x3   :  { %21 = vsyncpa [#allocation12], 0 }
   0x4   :  { %22 = vsyncpa [#allocation4], 0  ;;  %s5393_s21 = smov [#allocation5]   ;;  %s5394_s23 = smov [#allocation8]  }
   0x5   :  { %s46_s22 = sshll.u32 %s5393_s21, 4  ;;  %s70_s24 = sshll.u32 %s5394_s23, 4  ;;  %s47_s22 = int_to_ptr.vmem [resolvable:$true] %s46_s22  ;;  %s5481_s24 = int_to_ptr.vmem [resolvable:$true] %s70_s24 }
   0x6   :  { %s5207_s27 = scalar_lea.hbm %s6164_s4, 256 }
   0x7   :  { %p5208_p0 = scmp.ne.s32.totalorder %s6164_s4, %s5207_s27  ;;  %p5211_p1 = scmp.lt.u32.totalorder %s5207_s27, %s6164_s4 }
   0x9   :  { %p5213_p2 = pnand %p5211_p1, %p5208_p0 }
   0xb   :  { %5216 = shalt.err (!%p5213_p2)
}
   0xc   :  { %s5217_s14 = scalar_lea.vmem %s47_s22, 256  ;;  %p5222_p4 = scmp.lt.s32.totalorder %s47_s22, %s47_s22 }
   0xd   :  { %p5218_p3 = scmp.ne.s32.totalorder %s47_s22, %s5217_s14  ;;  %p5223_p5 = scmp.lt.s32.totalorder %s5217_s14, %s5217_s14 }
   0xf   :  { %p5224_p6 = por %p5223_p5, %p5222_p4 }
  0x11   :  { %p5225_p7 = pnand %p5224_p6, %p5218_p3 }
  0x13   :  { %5228 = shalt.err (!%p5225_p7)
}
  0x14   :  { %s5395_s15 = smov 128   ;;  %s5396_s16 = smov 8  }
  0x15   :  { %52 = dma.hbm_to_vmem [thread:$0]  %s6164_s4, 256, %s47_s22, [#allocation6], %s5395_s15, %s5395_s15, %s5396_s16  }
  0x16   :  { %s5229_s21 = scalar_lea.hbm %s6166_s6, 6144 }
  0x17   :  { %p5230_p8 = scmp.ne.s32.totalorder %s6166_s6, %s5229_s21  ;;  %p5233_p9 = scmp.lt.u32.totalorder %s5229_s21, %s6166_s6 }
  0x19   :  { %p5235_p10 = pnand %p5233_p9, %p5230_p8 }
  0x1b   :  { %5238 = shalt.err (!%p5235_p10)
}
  0x1c   :  { %s5239_s28 = scalar_lea.vmem %s5481_s24, 6144  ;;  %p5244_p12 = scmp.lt.s32.totalorder %s5481_s24, %s5481_s24 }
  0x1d   :  { %p5240_p11 = scmp.ne.s32.totalorder %s5481_s24, %s5239_s28  ;;  %p5245_p13 = scmp.lt.s32.totalorder %s5239_s28, %s5239_s28 }
  0x1f   :  { %p5246_p0 = por %p5245_p13, %p5244_p12 }
  0x21   :  { %p5247_p1 = pnand %p5246_p0, %p5240_p11 }
  0x23   :  { %5250 = shalt.err (!%p5247_p1)
}
  0x24   :  { %s5397_s4 = smov 192   ;;  %s5398_s22 = smov 12  }
  0x25   :  { %76 = dma.hbm_to_vmem [thread:$0]  %s6166_s6, 6144, %s5481_s24, [#allocation9], %s5397_s4, %s5397_s4, %s5398_s22  }
  0x26   :  { %s5399_s13 = smov [#allocation11]   ;;  %s5251_s19 = scalar_lea.hbm %s6169_s9, 8192 }
  0x27   :  { %s96_s14 = sshll.u32 %s5399_s13, 4  ;;  %p5252_p2 = scmp.ne.s32.totalorder %s6169_s9, %s5251_s19  ;;  %s97_s14 = int_to_ptr.vmem [resolvable:$true] %s96_s14 }
  0x28   :  { %p5255_p3 = scmp.lt.u32.totalorder %s5251_s19, %s6169_s9 }
  0x2a   :  { %p5257_p4 = pnand %p5255_p3, %p5252_p2 }
  0x2c   :  { %5260 = shalt.err (!%p5257_p4)
}
  0x2d   :  { %s5261_s26 = scalar_lea.vmem %s97_s14, 8192  ;;  %p5266_p6 = scmp.lt.s32.totalorder %s97_s14, %s97_s14 }
  0x2e   :  { %p5262_p5 = scmp.ne.s32.totalorder %s97_s14, %s5261_s26  ;;  %p5267_p7 = scmp.lt.s32.totalorder %s5261_s26, %s5261_s26 }
  0x30   :  { %p5268_p8 = por %p5267_p7, %p5266_p6 }
  0x32   :  { %p5269_p9 = pnand %p5268_p8, %p5262_p5 }
  0x34   :  { %5272 = shalt.err (!%p5269_p9)
}
  0x35   :  { %s5400_s6 = smov 64   ;;  %s5401_s24 = smov 4  }
  0x36   :  { %102 = dma.hbm_to_vmem [thread:$0]  %s6169_s9, 8192, %s97_s14, [#allocation12], %s5400_s6, %s5400_s6, %s5401_s24  }
  0x37   :  { %s5402_s4 = smov [#allocation2]   ;;  %s5403_s29 = smov [#allocation7]  }
  0x38   :  { %s32_s22 = sshll.u32 %s5402_s4, 4  ;;  %s58_s30 = sshll.u32 %s5403_s29, 4  ;;  %s33_s22 = int_to_ptr.vmem [resolvable:$true] %s32_s22  ;;  %s59_s30 = int_to_ptr.vmem [resolvable:$true] %s58_s30 }
  0x39   :  { %s5273_s18 = scalar_lea.hbm %s6162_s2, 1024 }
  0x3a   :  { %p5274_p10 = scmp.ne.s32.totalorder %s6162_s2, %s5273_s18  ;;  %p5277_p11 = scmp.lt.u32.totalorder %s5273_s18, %s6162_s2 }
  0x3c   :  { %p5279_p12 = pnand %p5277_p11, %p5274_p10 }
  0x3e   :  { %5282 = shalt.err (!%p5279_p12)
}
  0x3f   :  { %s5283_s9 = scalar_lea.vmem %s33_s22, 1024  ;;  %p5288_p0 = scmp.lt.s32.totalorder %s33_s22, %s33_s22 }
  0x40   :  { %p5284_p13 = scmp.ne.s32.totalorder %s33_s22, %s5283_s9  ;;  %p5289_p1 = scmp.lt.s32.totalorder %s5283_s9, %s5283_s9 }
  0x42   :  { %p5290_p2 = por %p5289_p1, %p5288_p0 }
  0x44   :  { %p5291_p3 = pnand %p5290_p2, %p5284_p13 }
  0x46   :  { %5294 = shalt.err (!%p5291_p3)
}
  0x47   :  { %38 = dma.hbm_to_vmem [thread:$0]  %s6162_s2, 1024, %s33_s22, [#allocation3], %s5395_s15, %s5395_s15, %s5396_s16  }
  0x48   :  { %s5295_s28 = scalar_lea.hbm %s6165_s5, 1024 }
  0x49   :  { %p5296_p4 = scmp.ne.s32.totalorder %s6165_s5, %s5295_s28  ;;  %p5299_p5 = scmp.lt.u32.totalorder %s5295_s28, %s6165_s5 }
  0x4b   :  { %p5301_p6 = pnand %p5299_p5, %p5296_p4 }
  0x4d   :  { %5304 = shalt.err (!%p5301_p6)
}
  0x4e   :  { %s5305_s18 = scalar_lea.vmem %s59_s30, 1024  ;;  %p5310_p8 = scmp.lt.s32.totalorder %s59_s30, %s59_s30 }
  0x4f   :  { %p5306_p7 = scmp.ne.s32.totalorder %s59_s30, %s5305_s18  ;;  %p5311_p9 = scmp.lt.s32.totalorder %s5305_s18, %s5305_s18 }
  0x51   :  { %p5312_p10 = por %p5311_p9, %p5310_p8 }
  0x53   :  { %p5313_p11 = pnand %p5312_p10, %p5306_p7 }
  0x55   :  { %5316 = shalt.err (!%p5313_p11)
}
  0x56   :  { %s5404_s2 = smov 512   ;;  %s5405_s15 = smov 32  }
  0x57   :  { %64 = dma.hbm_to_vmem [thread:$0]  %s6165_s5, 1024, %s59_s30, [#allocation6], %s5404_s2, %s5404_s2, %s5405_s15  }
  0x58   :  { %s5406_s19 = smov [#allocation10]   ;;  %s5317_s9 = scalar_lea.hbm %s6168_s8, 8192 }
  0x59   :  { %s84_s20 = sshll.u32 %s5406_s19, 4  ;;  %p5318_p12 = scmp.ne.s32.totalorder %s6168_s8, %s5317_s9  ;;  %s85_s20 = int_to_ptr.vmem [resolvable:$true] %s84_s20 }
  0x5a   :  { %p5321_p13 = scmp.lt.u32.totalorder %s5317_s9, %s6168_s8 }
  0x5c   :  { %p5323_p0 = pnand %p5321_p13, %p5318_p12 }
  0x5e   :  { %5326 = shalt.err (!%p5323_p0)
}
  0x5f   :  { %s5327_s28 = scalar_lea.vmem %s85_s20, 8192  ;;  %p5332_p2 = scmp.lt.s32.totalorder %s85_s20, %s85_s20 }
  0x60   :  { %p5328_p1 = scmp.ne.s32.totalorder %s85_s20, %s5327_s28  ;;  %p5333_p3 = scmp.lt.s32.totalorder %s5327_s28, %s5327_s28 }
  0x62   :  { %p5334_p4 = por %p5333_p3, %p5332_p2 }
  0x64   :  { %p5335_p5 = pnand %p5334_p4, %p5328_p1 }
  0x66   :  { %5338 = shalt.err (!%p5335_p5)
}
  0x67   :  { %s5407_s5 = smov 256   ;;  %s5408_s30 = smov 16  }
  0x68   :  { %90 = dma.hbm_to_vmem [thread:$0]  %s6168_s8, 8192, %s85_s20, [#allocation9], %s5407_s5, %s5407_s5, %s5408_s30  }
  0x69   :  { %s5409_s13 = smov [#allocation13]   ;;  %s5339_s16 = scalar_lea.hbm %s6170_s10, 1024 }
  0x6a   :  { %s108_s17 = sshll.u32 %s5409_s13, 4  ;;  %p5340_p6 = scmp.ne.s32.totalorder %s6170_s10, %s5339_s16  ;;  %s109_s17 = int_to_ptr.vmem [resolvable:$true] %s108_s17 }
  0x6b   :  { %p5343_p7 = scmp.lt.u32.totalorder %s5339_s16, %s6170_s10 }
  0x6d   :  { %p5345_p8 = pnand %p5343_p7, %p5340_p6 }
  0x6f   :  { %5348 = shalt.err (!%p5345_p8)
}
  0x70   :  { %s5349_s9 = scalar_lea.vmem %s109_s17, 1024  ;;  %p5354_p10 = scmp.lt.s32.totalorder %s109_s17, %s109_s17 }
  0x71   :  { %p5350_p9 = scmp.ne.s32.totalorder %s109_s17, %s5349_s9  ;;  %p5355_p11 = scmp.lt.s32.totalorder %s5349_s9, %s5349_s9 }
  0x73   :  { %p5356_p12 = por %p5355_p11, %p5354_p10 }
  0x75   :  { %p5357_p13 = pnand %p5356_p12, %p5350_p9 }
  0x77   :  { %5360 = shalt.err (!%p5357_p13)
}
  0x78   :  { %114 = dma.hbm_to_vmem [thread:$0]  %s6170_s10, 1024, %s109_s17, [#allocation12], %s5400_s6, %s5400_s6, %s5401_s24  }
  0x79   :  { %5383 = dma.done.wait [#allocation3], 1024  }
  0x7a   :  { %5384 = vsyncadd [#allocation3], 4294966272 }
  0x7b   :  { %5385 = dma.done.wait [#allocation6], 1280  }
  0x7c   :  { %5386 = vsyncadd [#allocation6], 4294966016 }
  0x7d   :  { %5387 = dma.done.wait [#allocation9], 14336  }
  0x7e   :  { %5388 = vsyncadd [#allocation9], 4294952960 }
  0x7f   :  { %5389 = dma.done.wait [#allocation12], 9216  }
  0x80   :  { %5390 = vsyncadd [#allocation12], 4294958080  ;;  %v5410_v0 = vmov 0   ;;  %v137_v1 = vld [vmem:[%s6160_s0] sm:$0xff]  ;;  %v156_v3 = vld [vmem:[#allocation2 + $0x8] sm:$0xff]  ;;  %v5411_v10 = vmov 0.0   ;;  %v141_v16 = vlaneseq }
  0x81   :  { %4826 = vset.pattern.permute.xlu0 %v5410_v0  ;;  %v155_v2 = vld [vmem:[#allocation2] sm:$0xff]  ;;  %v157_v4 = vld [vmem:[#allocation2 + $0x10] sm:$0xff]  ;;  %v158_v5 = vld [vmem:[#allocation2 + $0x18] sm:$0xff]  ;;  %4567 = vmatprep.subr.bf16.mxu0 %v5411_v10  ;;  %vm165_vm0 = vcmask 523264   ;;  %vm5412_vm3 = vmmov 0   ;;  %vm555_vm4 = vcmask 261120  }
  0x82   :  { %144 = vperm.xlu0 %4826, %v137_v1   ;;  %v138_v6 = vld [vmem:[%s6160_s0 + $0x8] sm:$0xff]  ;;  %v4787_v7 = vpack.c.bf16 %v156_v3, %v155_v2  ;;  %v4791_v8 = vpack.c.bf16 %v158_v5, %v157_v4  ;;  %v159_v9 = vld [vmem:[#allocation2 + $0x20] sm:$0xff]  ;;  %v161_v12 = vld [vmem:[#allocation2 + $0x30] sm:$0xff]  ;;  %v5594_v17 = vand.u32 127, %v141_v16  ;;  %4583 = vmatprep.mubr.msk.bf16.mxu0 %vm5412_vm3, %v5411_v10  ;;  %vm607_vm5 = vcmask 130048  }
  0x83   :  { %v160_v11 = vld [vmem:[#allocation2 + $0x28] sm:$0xff]  ;;  %v162_v14 = vld [vmem:[#allocation2 + $0x38] sm:$0xff]  ;;  %v163_v22 = vld [vmem:[%s6163_s3] sm:$0xff]  ;;  %vm4061_vm11 = vcmask 15368  }
  0x84   :  { %4788 = vmatprep.subr.bf16.mxu1 %v4787_v7  ;;  %v4795_v13 = vpack.c.bf16 %v160_v11, %v159_v9  ;;  %v4799_v15 = vpack.c.bf16 %v162_v14, %v161_v12  ;;  %v164_v26 = vld [vmem:[%s6163_s3 + $0x8] sm:$0xff]  ;;  %v4829_v28 = vld [vmem:[#allocation8] ss:$12 sps:$4 sm:$0xff]   ;;  %v4831_v29 = vld [vmem:[#allocation8 + $0x4] ss:$12 sps:$4 sm:$0xff]   ;;  %s5413_s3 = smov 96  }
  0x85   :  { %4790 = vmatpush3.bf16.msra.mxu1 %v4787_v7  ;;  %v4832_v30 = vld [vmem:[#allocation8 + $0x8] ss:$12 sps:$4 sm:$0xff]   ;;  %v4833_v32 = vld [vmem:[#allocation8 + $0x18] ss:$12 sps:$4 sm:$0xff]   ;;  %v4836_v41 = vld [vmem:[#allocation8 + $0x20] ss:$12 sps:$4 sm:$0xff]  }
  0x86   :  { %147 = vperm.xlu0 %4826, %v138_v6   ;;  %4792 = vmatprep.subr.bf16.mxu1 %v4791_v8  ;;  %v4835_v31 = vld [vmem:[#allocation8 + $0x1c] ss:$12 sps:$4 sm:$0xff]   ;;  %v4839_v42 = vld [vmem:[#allocation8 + $0x34] ss:$12 sps:$4 sm:$0xff]   ;;  %v4840_v44 = vld [vmem:[#allocation8 + $0x38] ss:$12 sps:$4 sm:$0xff]  }
  0x87   :  { %4568 = vmatpush3.bf16.msra.mxu0 %v4832_v30  ;;  %v4837_v43 = vld [vmem:[#allocation8 + $0x30] ss:$12 sps:$4 sm:$0xff]   ;;  %v4843_v45 = vld [vmem:[#allocation8 + $0x4c] ss:$12 sps:$4 sm:$0xff]   ;;  %v4841_v46 = vld [vmem:[#allocation8 + $0x48] ss:$12 sps:$4 sm:$0xff]  }
  0x88   :  { %4569 = vmatprep.subr.bf16.mxu0 %v5411_v10  ;;  %v4844_v47 = vld [vmem:[#allocation8 + $0x50] ss:$12 sps:$4 sm:$0xff]   ;;  %v4845_v49 = vld [vmem:[#allocation8 + $0x60] ss:$12 sps:$4 sm:$0xff]   ;;  %v4848_v50 = vld [vmem:[#allocation8 + $0x68] ss:$12 sps:$4 sm:$0xff]  }
  0x89   :  { %4794 = vmatpush3.bf16.msra.mxu1 %v4791_v8  ;;  %v4847_v48 = vld [vmem:[#allocation8 + $0x64] ss:$12 sps:$4 sm:$0xff]   ;;  %v4851_v51 = vld [vmem:[#allocation8 + $0x7c] ss:$12 sps:$4 sm:$0xff]   ;;  %v4852_v53 = vld [vmem:[#allocation8 + $0x80] ss:$12 sps:$4 sm:$0xff]  }
  0x8a   :  { %4796 = vmatprep.subr.bf16.mxu1 %v4795_v13  ;;  %v4849_v52 = vld [vmem:[#allocation8 + $0x78] ss:$12 sps:$4 sm:$0xff]   ;;  %v4855_v54 = vld [vmem:[#allocation8 + $0x94] ss:$12 sps:$4 sm:$0xff]   ;;  %v4853_v55 = vld [vmem:[#allocation8 + $0x90] ss:$12 sps:$4 sm:$0xff]  }
  0x8b   :  { %4570 = vmatpush3.bf16.msra.mxu0 %v4836_v41  ;;  %v4856_v56 = vld [vmem:[#allocation8 + $0x98] ss:$12 sps:$4 sm:$0xff]   ;;  %v4857_v58 = vld [vmem:[#allocation8 + $0xa8] ss:$12 sps:$4 sm:$0xff]   ;;  %v4860_v59 = vld [vmem:[#allocation8 + $0xb0] ss:$12 sps:$4 sm:$0xff]  }
  0x8c   :  { %4571 = vmatprep.subr.bf16.mxu0 %v5411_v10  ;;  %v4859_v57 = vld [vmem:[#allocation8 + $0xac] ss:$12 sps:$4 sm:$0xff]   ;;  %v4115_v5 = vld [vmem:[#allocation5] ss:$0 sm:$0xff]  ;;  %v4116_v9 = vld [vmem:[#allocation5 + $0x1] ss:$0 sm:$0xff] }
  0x8d   :  { %4798 = vmatpush3.bf16.msra.mxu1 %v4795_v13  ;;  %vm4014_vm6 = vcmp.lt.s32.totalorder %v5594_v17, 5 }
  0x8e   :  { %4800 = vmatprep.subr.bf16.mxu1 %v4799_v15 }
  0x8f   :  { %4572 = vmatpush3.bf16.msra.mxu0 %v4840_v44 }
  0x90   :  { %4573 = vmatprep.subr.bf16.mxu0 %v5411_v10 }
  0x91   :  { %4802 = vmatpush3.bf16.msra.mxu1 %v4799_v15  ;;  %v5641_v15 = vshrl.u32 %v141_v16, 7 }
  0x92   :  { %468 = vmatprep.subr.bf16.mxu1 %v4831_v29 }
  0x93   :  { %4574 = vmatpush3.bf16.msra.mxu0 %v4844_v47 }
  0x94   :  { %4575 = vmatprep.subr.bf16.mxu0 %v5411_v10 }
  0x97   :  { %4576 = vmatpush3.bf16.msra.mxu0 %v4848_v50 }
  0x98   :  { %4577 = vmatprep.subr.bf16.mxu0 %v5411_v10 }
  0x9b   :  { %4578 = vmatpush3.bf16.msra.mxu0 %v4852_v53 }
  0x9c   :  { %4579 = vmatprep.subr.bf16.mxu0 %v5411_v10 }
  0x9f   :  { %4580 = vmatpush3.bf16.msra.mxu0 %v4856_v56 }
  0xa0   :  { %4581 = vmatprep.subr.bf16.mxu0 %v5411_v10 }
  0xa3   :  { %4582 = vmatpush3.bf16.msra.mxu0 %v4860_v59 }
  0xa4   :  { %4599 = vmatprep.subr.bf16.mxu0 %v5411_v10 }
 0x101   :  { %v145_v18 = vpop.permute.xlu0 %144 }
 0x102   :  { %vm149_vm1 = vcmp.eq.s32.totalorder %v5594_v17, %v145_v18  ;;  %v5644_v18 = vsub.s32 0, %v5641_v15 }
 0x103   :  { %v4111_v19 = vsel %vm149_vm1, 1.0, %v5411_v10 }
 0x104   :  { %4564 = vmatprep.mubr.msk.f32.mxu1 %vm165_vm0, %v4111_v19  ;;  %v5647_v19 = vsub.s32 2, %v5641_v15 }
 0x105   :  { %v148_v20 = vpop.permute.xlu0 %147 }
 0x106   :  { %vm150_vm2 = vcmp.eq.s32.totalorder %v5594_v17, %v148_v20  ;;  %v251_v20 = vld [vmem:[#allocation7] ss:$8 sm:$0x7] }
 0x107   :  { %v4112_v21 = vsel %vm150_vm2, 1.0, %v5411_v10 }
 0x108   :  { %4565 = vmatmul.mubr.msk.f32.vlgmr.msra.gmra.mrb[0].mxu1 %vm165_vm0, %v4112_v21  ;;  %v5650_v21 = vsub.s32 1, %v5641_v15 }
 0x109   :  { %500 = vmatprep.mubr.bf16.mxu1 %v5410_v0  ;;  %469 = vmatpush1.bf16.msra.mxu1 %v4829_v28 }
 0x10a   :  { %470 = vmatprep.subr.bf16.mxu1 %v4835_v31  ;;  %v332_v28 = vrot.slane %v251_v20, %v5650_v21 }
 0x10d   :  { %471 = vmatpush1.bf16.msra.mxu1 %v4833_v32 }
 0x10e   :  { %472 = vmatprep.subr.bf16.mxu1 %v4839_v42 }
 0x111   :  { %473 = vmatpush1.bf16.msra.mxu1 %v4837_v43 }
 0x112   :  { %474 = vmatprep.subr.bf16.mxu1 %v4843_v45 }
 0x115   :  { %475 = vmatpush1.bf16.msra.mxu1 %v4841_v46 }
 0x116   :  { %476 = vmatprep.subr.bf16.mxu1 %v4847_v48  ;;  %v5682_v48 = vld [vmem:[%s6161_s1] sm:$0xff] }
 0x119   :  { %477 = vmatpush1.bf16.msra.mxu1 %v4845_v49 }
 0x11a   :  { %478 = vmatprep.subr.bf16.mxu1 %v4851_v51 }
 0x11d   :  { %479 = vmatpush1.bf16.msra.mxu1 %v4849_v52  ;;  %v5687_v52 = vld [vmem:[%s6161_s1 + $0x8] sm:$0xff] }
 0x11e   :  { %480 = vmatprep.subr.bf16.mxu1 %v4855_v54 }
 0x121   :  { %481 = vmatpush1.bf16.msra.mxu1 %v4853_v55 }
 0x122   :  { %482 = vmatprep.subr.bf16.mxu1 %v4859_v57 }
 0x125   :  { %483 = vmatpush1.bf16.msra.mxu1 %v4857_v58 }
 0x126   :  { %4587 = vmatprep.subr.bf16.mxu1 %v5411_v10 }
 0x1db   :  { %v4566_v23 = vpop.f32.mrb[0].mxu1 }
 0x1dc   :  { %v238_v24 = vpop.f32.mrb[1].mxu1  ;;  %v5610_v27 = vadd.f32 %v4566_v23, %v164_v26  ;;  %v336_v23 = vrot.slane %v251_v20, %v5647_v19 }
 0x1dd   :  { %v5604_v25 = vadd.f32 %v238_v24, %v163_v22  ;;  %v328_v22 = vrot.slane %v251_v20, %v5644_v18 }
 0x1df   :  { %256 = vadd.xlane.f32.xlu1 %v5604_v25 }
 0x1e3   :  { %258 = vadd.xlane.f32.xlu1 %v5610_v27 }
 0x26c   :  { %v257_v33 = vpop.xlane.xlu1 %256 }
 0x26d   :  { %v261_v34 = vmul.f32 0.0078125, %v257_v33 }
 0x26f   :  { %v5615_v35 = vsub.f32 %v5604_v25, %v261_v34 }
 0x270   :  { %v259_v36 = vpop.xlane.xlu1 %258 }
 0x271   :  { %v262_v37 = vmul.f32 0.0078125, %v259_v36  ;;  %v265_v38 = vmul.f32 %v5615_v35, %v5615_v35 }
 0x273   :  { %v5620_v39 = vsub.f32 %v5610_v27, %v262_v37  ;;  %267 = vadd.xlane.f32.xlu0 %v265_v38 }
 0x275   :  { %v266_v40 = vmul.f32 %v5620_v39, %v5620_v39 }
 0x277   :  { %269 = vadd.xlane.f32.xlu1 %v266_v40 }
 0x300   :  { %v268_v60 = vpop.xlane.xlu0 %267 }
 0x301   :  { %v271_v61 = vmul.f32 0.0078125, %v268_v60 }
 0x303   :  { %v273_v62 = vadd.f32 1e-05, %v271_v61 }
 0x304   :  { %v270_v63 = vpop.xlane.xlu1 %269 }
 0x305   :  { %5077 = vrsqrt.f32 %v273_v62  ;;  %v272_v1 = vmul.f32 0.0078125, %v270_v63 }
 0x307   :  { %v274_v2 = vadd.f32 1e-05, %v272_v1 }
 0x309   :  { %5079 = vrsqrt.f32 %v274_v2 }
 0x30f   :  { %v5078_v3 = vpop.eup %5077 }
 0x310   :  { %v277_v4 = vmul.f32 %v5078_v3, %v5615_v35 }
 0x312   :  { %v283_v8 = vmul.f32 %v4115_v5, %v277_v4 }
 0x313   :  { %v5080_v6 = vpop.eup %5079 }
 0x314   :  { %v278_v7 = vmul.f32 %v5080_v6, %v5620_v39  ;;  %v289_v12 = vadd.f32 %v4116_v9, %v283_v8 }
 0x316   :  { %v284_v11 = vmul.f32 %v4115_v5, %v278_v7 }
 0x318   :  { %v290_v13 = vadd.f32 %v4116_v9, %v284_v11 }
 0x31a   :  { %v291_v14 = vpack.c.bf16 %v290_v13, %v289_v12 }
 0x31c   :  { %501 = vmatmul.mubr.bf16.vlgmr.msra.gmra.mrb[4].mxu1 %v291_v14  ;;  %4584 = vmatmul.mubr.bf16.vlgmr.msra.gmra.mrb[0].mxu0 %v291_v14 }
 0x31d   :  { %4589 = vmatprep.mubr.msk.bf16.mxu1 %vm5412_vm3, %v5411_v10  ;;  %4601 = vmatprep.mubr.msk.bf16.mxu0 %vm5412_vm3, %v5411_v10 }
 0x3ef   :  { %v502_v24 = vpop.f32.mrb[4].mxu1  ;;  %v545_v26 = vpop.f32.mrb[0].mxu0 }
 0x3f0   :  { %v504_v16 = vpop.f32.mrb[5].mxu1  ;;  %v4585_v29 = vpop.f32.mrb[1].mxu0  ;;  %v503_v32 = vadd.f32 %v502_v24, %v328_v22  ;;  %v546_v33 = vadd.f32 %v545_v26, %v336_v23 }
 0x3f1   :  { %v506_v30 = vpop.f32.mrb[6].mxu1  ;;  %v548_v31 = vpop.f32.mrb[2].mxu0  ;;  %v505_v38 = vadd.f32 %v504_v16, %v332_v28 }
 0x3f2   :  { %v507_v34 = vadd.f32 %v506_v30, %v328_v22  ;;  %v549_v35 = vadd.f32 %v548_v31, %v336_v23  ;;  %v508_v36 = vpop.f32.mrb[7].mxu1  ;;  %v4586_v37 = vpop.f32.mrb[3].mxu0 }
 0x3f3   :  { %v509_v39 = vadd.f32 %v508_v36, %v332_v28 }
 0x3f4   :  { %v5655_v40 = vpack.c.bf16 %v507_v34, %v503_v32  ;;  %v5657_v41 = vpack.c.bf16 %v549_v35, %v546_v33 }
 0x3f5   :  { %v5659_v42 = vpack.c.bf16 %v509_v39, %v505_v38 }
 0x3f7   :  { %684 = vrot.lane.b32.xlu1 %v5659_v42, %s5413_s3  ;;  %v560_v43 = vsel %vm555_vm4, %v5659_v42, 0 }
 0x3f8   :  { %4588 = vmatpush3.bf16.xpose.msra.mxu1 %v560_v43 }
 0x3f9   :  { %4593 = vmatprep.subr.bf16.mxu1 %v5411_v10 }
 0x3fb   :  { %681 = vrot.lane.b32.xlu1 %v5655_v40, %s5413_s3 }
 0x3ff   :  { %4590 = vmatmul.mubr.msk.bf16.vlgmr.msra.gmra.mrb[8].mxu1 %vm555_vm4, %v5655_v40 }
 0x400   :  { %4594 = vmatpush3.bf16.msra.mxu1 %v5657_v41  ;;  %4595 = vmatprep.mubr.msk.bf16.mxu1 %vm5412_vm3, %v5411_v10 }
 0x401   :  { %4605 = vmatprep.subr.bf16.mxu1 %v5411_v10 }
 0x469   :  { %v685_v44 = vpop.permute.xlu1 %684 }
 0x46a   :  { %v690_v45 = vsel %vm555_vm4, %v685_v44, 0  ;;  %v4863_v44 = vld [vmem:[%s6167_s7 + $0x10] sm:$0xff]  }
 0x46b   :  { %4600 = vmatpush3.bf16.xpose.msra.mxu0 %v690_v45  ;;  %v4864_v45 = vld [vmem:[%s6167_s7 + $0x18] sm:$0xff]  }
 0x46c   :  { %4611 = vmatprep.subr.bf16.mxu0 %v5411_v10 }
 0x46d   :  { %v682_v46 = vpop.permute.xlu1 %681 }
 0x472   :  { %4602 = vmatmul.mubr.msk.bf16.vlgmr.msra.gmra.mrb[4].mxu0 %vm555_vm4, %v682_v46 }
 0x473   :  { %4615 = vmatprep.mubr.msk.bf16.mxu0 %vm5412_vm3, %v5411_v10  ;;  %4612 = vmatpush3.bf16.msra.mxu0 %v4863_v44 }
 0x474   :  { %4613 = vmatprep.subr.bf16.mxu0 %v5411_v10 }
 0x477   :  { %4614 = vmatpush3.bf16.msra.mxu0 %v4864_v45 }
 0x478   :  { %4627 = vmatprep.subr.bf16.mxu0 %v5411_v10 }
 0x4d2   :  { %v596_v47 = vpop.f32.mrb[8].mxu1 }
 0x4d3   :  { %v603_v49 = vmul.f32 0.17677669, %v596_v47  ;;  %v4591_v50 = vpop.f32.mrb[9].mxu1 }
 0x4d4   :  { %v599_v51 = vpop.f32.mrb[10].mxu1 }
 0x4d5   :  { %v604_v53 = vmul.f32 0.17677669, %v599_v51  ;;  %v4592_v54 = vpop.f32.mrb[11].mxu1  ;;  %v605_v55 = vadd.f32 %v603_v49, %v5682_v48 }
 0x4d7   :  { %v608_v56 = vsel %vm607_vm5, %v605_v55, -inf  ;;  %v606_v57 = vadd.f32 %v604_v53, %v5687_v52 }
 0x4d8   :  { %609 = vmax.xlane.f32.xlu1 %v608_v56 }
 0x4d9   :  { %v611_v58 = vsel %vm607_vm5, %v606_v57, -inf }
 0x4da   :  { %612 = vmax.xlane.f32.xlu0 %v611_v58 }
 0x4e9   :  { %927 = vrot.lane.b32.xlu1 %v5659_v42, %s5400_s6 }
 0x4ed   :  { %925 = vrot.lane.b32.xlu1 %v5655_v40, %s5400_s6 }
 0x545   :  { %v726_v59 = vpop.f32.mrb[4].mxu0 }
 0x546   :  { %v733_v60 = vmul.f32 0.17677669, %v726_v59  ;;  %v4603_v61 = vpop.f32.mrb[5].mxu0 }
 0x547   :  { %v729_v62 = vpop.f32.mrb[6].mxu0 }
 0x548   :  { %v734_v63 = vmul.f32 0.17677669, %v729_v62  ;;  %v4604_v1 = vpop.f32.mrb[7].mxu0  ;;  %v735_v2 = vadd.f32 %v733_v60, %v5682_v48 }
 0x54a   :  { %v737_v3 = vsel %vm607_vm5, %v735_v2, -inf  ;;  %v736_v4 = vadd.f32 %v734_v63, %v5687_v52 }
 0x54b   :  { %738 = vmax.xlane.f32.xlu0 %v737_v3 }
 0x54c   :  { %v740_v5 = vsel %vm607_vm5, %v736_v4, -inf }
 0x54f   :  { %741 = vmax.xlane.f32.xlu0 %v740_v5 }
 0x565   :  { %v610_v6 = vpop.xlane.xlu1 %609 }
 0x566   :  { %v614_v7 = vsub.f32 %v605_v55, %v610_v6  ;;  %v4861_v55 = vld [vmem:[%s6167_s7] sm:$0xff]  }
 0x567   :  { %v613_v8 = vpop.xlane.xlu0 %612 }
 0x568   :  { %v616_v9 = vmul.f32 1.442695, %v614_v7  ;;  %v615_v11 = vsub.f32 %v606_v57, %v613_v8  ;;  %v4862_v57 = vld [vmem:[%s6167_s7 + $0x8] sm:$0xff]  }
 0x56a   :  { %5081 = vpow2.f32 %v616_v9  ;;  %v618_v12 = vmul.f32 1.442695, %v615_v11 }
 0x56c   :  { %5083 = vpow2.f32 %v618_v12 }
 0x574   :  { %v5082_v13 = vpop.eup %5081 }
 0x575   :  { %v620_v14 = vsel %vm607_vm5, %v5082_v13, 0.0 }
 0x576   :  { %v5084_v20 = vpop.eup %5083  ;;  %621 = vadd.xlane.f32.xlu0 %v620_v14 }
 0x577   :  { %v623_v22 = vsel %vm607_vm5, %v5084_v20, 0.0 }
 0x57a   :  { %624 = vadd.xlane.f32.xlu0 %v623_v22 }
 0x5d8   :  { %v739_v23 = vpop.xlane.xlu0 %738 }
 0x5d9   :  { %v743_v24 = vsub.f32 %v735_v2, %v739_v23  ;;  %v928_v2 = vpop.permute.xlu1 %927 }
 0x5da   :  { %v933_v6 = vsel %vm555_vm4, %v928_v2, 0 }
 0x5db   :  { %v745_v26 = vmul.f32 1.442695, %v743_v24 }
 0x5dc   :  { %v742_v28 = vpop.xlane.xlu0 %741 }
 0x5dd   :  { %5085 = vpow2.f32 %v745_v26  ;;  %v744_v16 = vsub.f32 %v736_v4, %v742_v28  ;;  %v926_v7 = vpop.permute.xlu1 %925 }
 0x5df   :  { %v747_v29 = vmul.f32 1.442695, %v744_v16 }
 0x5e1   :  { %5087 = vpow2.f32 %v747_v29 }
 0x5e7   :  { %v5086_v30 = vpop.eup %5085 }
 0x5e8   :  { %v749_v31 = vsel %vm607_vm5, %v5086_v30, 0.0 }
 0x5e9   :  { %750 = vadd.xlane.f32.xlu0 %v749_v31 }
 0x5eb   :  { %v5088_v32 = vpop.eup %5087 }
 0x5ec   :  { %v752_v33 = vsel %vm607_vm5, %v5088_v32, 0.0 }
 0x5ed   :  { %753 = vadd.xlane.f32.xlu0 %v752_v33 }
 0x603   :  { %761 = vrot.lane.b32.xlu0 %v5657_v41, %s5413_s3  ;;  %v622_v34 = vpop.xlane.xlu0 %621 }
 0x604   :  { %5089 = vrcp.f32 %v622_v34 }
 0x607   :  { %v625_v35 = vpop.xlane.xlu0 %624 }
 0x608   :  { %5091 = vrcp.f32 %v625_v35 }
 0x60e   :  { %v5090_v36 = vpop.eup %5089 }
 0x60f   :  { %v628_v38 = vmul.f32 %v5090_v36, %v5082_v13 }
 0x612   :  { %v5092_v37 = vpop.eup %5091 }
 0x613   :  { %v629_v39 = vmul.f32 %v5092_v37, %v5084_v20 }
 0x615   :  { %v630_v43 = vpack.c.bf16 %v629_v39, %v628_v38 }
 0x617   :  { %4596 = vmatmul.mubr.msk.bf16.vlgmr.msra.gmra.mrb[12].mxu1 %vm607_vm5, %v630_v43 }
 0x618   :  { %4607 = vmatprep.mubr.msk.bf16.mxu1 %vm5412_vm3, %v5411_v10 }
 0x676   :  { %v751_v46 = vpop.xlane.xlu0 %750 }
 0x677   :  { %5093 = vrcp.f32 %v751_v46 }
 0x67a   :  { %v754_v47 = vpop.xlane.xlu0 %753 }
 0x67b   :  { %5095 = vrcp.f32 %v754_v47 }
 0x67e   :  { %v762_v49 = vpop.permute.xlu0 %761 }
 0x67f   :  { %4606 = vmatpush3.bf16.msra.mxu1 %v762_v49 }
 0x680   :  { %4619 = vmatprep.subr.bf16.mxu1 %v5411_v10 }
 0x681   :  { %v5094_v50 = vpop.eup %5093 }
 0x682   :  { %v757_v53 = vmul.f32 %v5094_v50, %v5086_v30 }
 0x685   :  { %v5096_v51 = vpop.eup %5095 }
 0x686   :  { %v758_v54 = vmul.f32 %v5096_v51, %v5088_v32 }
 0x688   :  { %v759_v56 = vpack.c.bf16 %v758_v54, %v757_v53 }
 0x68a   :  { %4608 = vmatmul.mubr.msk.bf16.vlgmr.msra.gmra.mrb[16].mxu1 %vm607_vm5, %v759_v56 }
 0x68b   :  { %4620 = vmatpush3.bf16.msra.mxu1 %v4861_v55  ;;  %4623 = vmatprep.mubr.msk.bf16.mxu1 %vm5412_vm3, %v5411_v10 }
 0x68c   :  { %4621 = vmatprep.subr.bf16.mxu1 %v5411_v10 }
 0x68f   :  { %4622 = vmatpush3.bf16.msra.mxu1 %v4862_v57 }
 0x690   :  { %4633 = vmatprep.subr.bf16.mxu1 %v5411_v10 }
 0x6ea   :  { %v668_v58 = vpop.f32.mrb[12].mxu1 }
 0x6eb   :  { %v4597_v59 = vpop.f32.mrb[13].mxu1 }
 0x6ec   :  { %v671_v60 = vpop.f32.mrb[14].mxu1 }
 0x6ed   :  { %v675_v61 = vpack.c.bf16 %v671_v60, %v668_v58  ;;  %v4598_v62 = vpop.f32.mrb[15].mxu1 }
 0x6ef   :  { %4624 = vmatmul.mubr.msk.bf16.vlgmr.msra.gmra.mrb[20].mxu1 %vm555_vm4, %v675_v61  ;;  %v4866_v61 = vld [vmem:[%s6167_s7 + $0x28] sm:$0xff]  }
 0x6f0   :  { %4635 = vmatprep.mubr.msk.bf16.mxu1 %vm5412_vm3, %v5411_v10 }
 0x75d   :  { %v801_v63 = vpop.f32.mrb[16].mxu1 }
 0x75e   :  { %v4609_v1 = vpop.f32.mrb[17].mxu1 }
 0x75f   :  { %v804_v3 = vpop.f32.mrb[18].mxu1 }
 0x760   :  { %v808_v4 = vpack.c.bf16 %v804_v3, %v801_v63  ;;  %v4610_v5 = vpop.f32.mrb[19].mxu1 }
 0x762   :  { %4616 = vmatmul.mubr.msk.bf16.vlgmr.msra.gmra.mrb[8].mxu0 %vm555_vm4, %v808_v4 }
 0x763   :  { %4628 = vmatpush3.bf16.xpose.msra.mxu0 %v933_v6  ;;  %4629 = vmatprep.mubr.msk.bf16.mxu0 %vm5412_vm3, %v5411_v10 }
 0x764   :  { %4639 = vmatprep.subr.bf16.mxu0 %v5411_v10 }
 0x76a   :  { %4630 = vmatmul.mubr.msk.bf16.vlgmr.msra.gmra.mrb[12].mxu0 %vm555_vm4, %v926_v7 }
 0x76b   :  { %4643 = vmatprep.mubr.msk.bf16.mxu0 %vm5412_vm3, %v5411_v10 }
 0x7c2   :  { %v918_v8 = vpop.f32.mrb[20].mxu1 }
 0x7c3   :  { %v4625_v9 = vpop.f32.mrb[21].mxu1 }
 0x7c4   :  { %v921_v11 = vpop.f32.mrb[22].mxu1 }
 0x7c5   :  { %v4626_v12 = vpop.f32.mrb[23].mxu1 }
 0x835   :  { %v862_v13 = vpop.f32.mrb[8].mxu0 }
 0x836   :  { %v5741_v14 = vadd.f32 %v918_v8, %v862_v13  ;;  %v4617_v20 = vpop.f32.mrb[9].mxu0 }
 0x837   :  { %v865_v22 = vpop.f32.mrb[10].mxu0 }
 0x838   :  { %v5743_v23 = vadd.f32 %v921_v11, %v865_v22  ;;  %v4618_v24 = vpop.f32.mrb[11].mxu0 }
 0x83d   :  { %v969_v26 = vpop.f32.mrb[12].mxu0 }
 0x83e   :  { %v976_v28 = vmul.f32 0.17677669, %v969_v26  ;;  %v4631_v16 = vpop.f32.mrb[13].mxu0 }
 0x83f   :  { %v972_v29 = vpop.f32.mrb[14].mxu0 }
 0x840   :  { %v977_v30 = vmul.f32 0.17677669, %v972_v29  ;;  %v4632_v31 = vpop.f32.mrb[15].mxu0  ;;  %v978_v32 = vadd.f32 %v976_v28, %v5682_v48 }
 0x842   :  { %v980_v33 = vsel %vm607_vm5, %v978_v32, -inf  ;;  %v979_v34 = vadd.f32 %v977_v30, %v5687_v52 }
 0x843   :  { %981 = vmax.xlane.f32.xlu0 %v980_v33 }
 0x844   :  { %v983_v35 = vsel %vm607_vm5, %v979_v34, -inf }
 0x845   :  { %984 = vmax.xlane.f32.xlu1 %v983_v35 }
 0x856   :  { %1003 = vrot.lane.b32.xlu1 %v5657_v41, %s5400_s6 }
 0x85a   :  { %1113 = vrot.lane.b32.xlu1 %v5655_v40, %s5405_s15  ;;  %v4865_v40 = vld [vmem:[%s6167_s7 + $0x20] sm:$0xff]  }
 0x85b   :  { %4640 = vmatpush3.bf16.msra.mxu0 %v4865_v40 }
 0x85c   :  { %4641 = vmatprep.subr.bf16.mxu0 %v5411_v10 }
 0x85f   :  { %4642 = vmatpush3.bf16.msra.mxu0 %v4866_v61 }
 0x860   :  { %4653 = vmatprep.subr.bf16.mxu0 %v5411_v10 }
 0x8d0   :  { %v982_v36 = vpop.xlane.xlu0 %981 }
 0x8d1   :  { %v986_v37 = vsub.f32 %v978_v32, %v982_v36 }
 0x8d2   :  { %v985_v38 = vpop.xlane.xlu1 %984 }
 0x8d3   :  { %v988_v39 = vmul.f32 1.442695, %v986_v37  ;;  %v987_v43 = vsub.f32 %v979_v34, %v985_v38 }
 0x8d5   :  { %5097 = vpow2.f32 %v988_v39  ;;  %v990_v44 = vmul.f32 1.442695, %v987_v43 }
 0x8d6   :  { %v1004_v45 = vpop.permute.xlu1 %1003 }
 0x8d7   :  { %5099 = vpow2.f32 %v990_v44  ;;  %4634 = vmatpush3.bf16.msra.mxu1 %v1004_v45 }
 0x8d8   :  { %4647 = vmatprep.subr.bf16.mxu1 %v5411_v10 }
 0x8df   :  { %v5098_v46 = vpop.eup %5097 }
 0x8e0   :  { %v992_v47 = vsel %vm607_vm5, %v5098_v46, 0.0 }
 0x8e1   :  { %v5100_v49 = vpop.eup %5099  ;;  %993 = vadd.xlane.f32.xlu0 %v992_v47 }
 0x8e2   :  { %v995_v50 = vsel %vm607_vm5, %v5100_v49, 0.0 }
 0x8e5   :  { %996 = vadd.xlane.f32.xlu0 %v995_v50 }
 0x8fb   :  { %1115 = vrot.lane.b32.xlu0 %v5659_v42, %s5405_s15  ;;  %v1114_v42 = vpop.permute.xlu1 %1113 }
 0x96e   :  { %v994_v51 = vpop.xlane.xlu0 %993 }
 0x96f   :  { %5101 = vrcp.f32 %v994_v51 }
 0x972   :  { %v997_v53 = vpop.xlane.xlu0 %996 }
 0x973   :  { %5103 = vrcp.f32 %v997_v53 }
 0x976   :  { %v1116_v58 = vpop.permute.xlu0 %1115 }
 0x977   :  { %v1121_v60 = vsel %vm555_vm4, %v1116_v58, 0  ;;  %v252_v58 = vld [vmem:[#allocation7 + $0x1] ss:$0 sm:$0xff] }
 0x979   :  { %v5102_v54 = vpop.eup %5101 }
 0x97a   :  { %v1000_v56 = vmul.f32 %v5102_v54, %v5098_v46 }
 0x97d   :  { %v5104_v55 = vpop.eup %5103 }
 0x97e   :  { %v1001_v57 = vmul.f32 %v5104_v55, %v5100_v49 }
 0x980   :  { %v1002_v59 = vpack.c.bf16 %v1001_v57, %v1000_v56 }
 0x982   :  { %4636 = vmatmul.mubr.msk.bf16.vlgmr.msra.gmra.mrb[24].mxu1 %vm607_vm5, %v1002_v59 }
 0x983   :  { %4648 = vmatpush3.bf16.xpose.msra.mxu1 %v1121_v60  ;;  %4649 = vmatprep.mubr.msk.bf16.mxu1 %vm5412_vm3, %v5411_v10 }
 0x984   :  { %4659 = vmatprep.subr.bf16.mxu1 %v5411_v10 }
 0x98a   :  { %4650 = vmatmul.mubr.msk.bf16.vlgmr.msra.gmra.mrb[28].mxu1 %vm555_vm4, %v1114_v42 }
 0x98b   :  { %4663 = vmatprep.mubr.msk.bf16.mxu1 %vm5412_vm3, %v5411_v10 }
 0xa55   :  { %v1043_v62 = vpop.f32.mrb[24].mxu1 }
 0xa56   :  { %v4637_v63 = vpop.f32.mrb[25].mxu1 }
 0xa57   :  { %v1046_v1 = vpop.f32.mrb[26].mxu1 }
 0xa58   :  { %v1050_v2 = vpack.c.bf16 %v1046_v1, %v1043_v62  ;;  %v4638_v3 = vpop.f32.mrb[27].mxu1  ;;  %v4869_v1 = vld [vmem:[#allocation10] ss:$16 sps:$4 sm:$0xff]  }
 0xa59   :  { %v4872_v3 = vld [vmem:[#allocation10 + $0x8] ss:$16 sps:$4 sm:$0xff]  }
 0xa5a   :  { %4644 = vmatmul.mubr.msk.bf16.vlgmr.msra.gmra.mrb[16].mxu0 %vm555_vm4, %v1050_v2  ;;  %v4871_v2 = vld [vmem:[#allocation10 + $0x4] ss:$16 sps:$4 sm:$0xff]  }
 0xa5b   :  { %4655 = vmatprep.mubr.msk.bf16.mxu0 %vm5412_vm3, %v5411_v10 }
 0xa5d   :  { %v1157_v4 = vpop.f32.mrb[28].mxu1 }
 0xa5e   :  { %v1164_v5 = vmul.f32 0.17677669, %v1157_v4  ;;  %v4651_v6 = vpop.f32.mrb[29].mxu1  ;;  %v4874_v4 = vld [vmem:[#allocation10 + $0xc] ss:$16 sps:$4 sm:$0xff]  }
 0xa5f   :  { %v1160_v7 = vpop.f32.mrb[30].mxu1  ;;  %v4880_v6 = vld [vmem:[#allocation10 + $0x2c] ss:$16 sps:$4 sm:$0xff]  }
 0xa60   :  { %v1165_v8 = vmul.f32 0.17677669, %v1160_v7  ;;  %v4652_v9 = vpop.f32.mrb[31].mxu1  ;;  %v1166_v11 = vadd.f32 %v1164_v5, %v5682_v48  ;;  %v4877_v5 = vld [vmem:[#allocation10 + $0x24] ss:$16 sps:$4 sm:$0xff]  }
 0xa62   :  { %v1168_v12 = vsel %vm607_vm5, %v1166_v11, -inf  ;;  %v1167_v13 = vadd.f32 %v1165_v8, %v5687_v52  ;;  %v4867_v52 = vld [vmem:[%s6167_s7 + $0x30] sm:$0xff]  }
 0xa63   :  { %1169 = vmax.xlane.f32.xlu1 %v1168_v12  ;;  %4660 = vmatpush3.bf16.msra.mxu1 %v4867_v52  ;;  %v4898_v52 = vld [vmem:[#allocation10 + $0x8c] ss:$16 sps:$4 sm:$0xff]  }
 0xa64   :  { %v1171_v20 = vsel %vm607_vm5, %v1167_v13, -inf  ;;  %4661 = vmatprep.subr.bf16.mxu1 %v5411_v10 }
 0xa65   :  { %1172 = vmax.xlane.f32.xlu0 %v1171_v20 }
 0xaf0   :  { %v1170_v22 = vpop.xlane.xlu1 %1169 }
 0xaf1   :  { %v1174_v24 = vsub.f32 %v1166_v11, %v1170_v22 }
 0xaf2   :  { %v1173_v26 = vpop.xlane.xlu0 %1172 }
 0xaf3   :  { %v1176_v28 = vmul.f32 1.442695, %v1174_v24  ;;  %v1175_v16 = vsub.f32 %v1167_v13, %v1173_v26  ;;  %v4883_v24 = vld [vmem:[#allocation10 + $0x44] ss:$16 sps:$4 sm:$0xff]   ;;  %v4886_v26 = vld [vmem:[#allocation10 + $0x4c] ss:$16 sps:$4 sm:$0xff]  }
 0xaf5   :  { %5105 = vpow2.f32 %v1176_v28  ;;  %v1178_v29 = vmul.f32 1.442695, %v1175_v16  ;;  %v4881_v28 = vld [vmem:[#allocation10 + $0x40] ss:$16 sps:$4 sm:$0xff]   ;;  %v4884_v16 = vld [vmem:[#allocation10 + $0x48] ss:$16 sps:$4 sm:$0xff]  }
 0xaf7   :  { %5107 = vpow2.f32 %v1178_v29  ;;  %v4889_v29 = vld [vmem:[#allocation10 + $0x64] ss:$16 sps:$4 sm:$0xff]  }
 0xaff   :  { %v5106_v30 = vpop.eup %5105 }
 0xb00   :  { %v1180_v31 = vsel %vm607_vm5, %v5106_v30, 0.0 }
 0xb01   :  { %v5108_v48 = vpop.eup %5107  ;;  %1181 = vadd.xlane.f32.xlu0 %v1180_v31  ;;  %v4887_v31 = vld [vmem:[#allocation10 + $0x60] ss:$16 sps:$4 sm:$0xff]  }
 0xb02   :  { %v1183_v32 = vsel %vm607_vm5, %v5108_v48, 0.0 }
 0xb03   :  { %1184 = vadd.xlane.f32.xlu1 %v1183_v32  ;;  %v4895_v32 = vld [vmem:[#allocation10 + $0x84] ss:$16 sps:$4 sm:$0xff]  }
 0xb17   :  { %1191 = vrot.lane.b32.xlu0 %v5657_v41, %s5405_s15 }
 0xb2d   :  { %v1104_v33 = vpop.f32.mrb[16].mxu0 }
 0xb2e   :  { %v1111_v34 = vadd.f32 %v1104_v33, %v5741_v14  ;;  %v4645_v35 = vpop.f32.mrb[17].mxu0  ;;  %v4868_v14 = vld [vmem:[%s6167_s7 + $0x38] sm:$0xff]   ;;  %v4893_v33 = vld [vmem:[#allocation10 + $0x80] ss:$16 sps:$4 sm:$0xff]  }
 0xb2f   :  { %v1107_v36 = vpop.f32.mrb[18].mxu0  ;;  %4662 = vmatpush3.bf16.msra.mxu1 %v4868_v14  ;;  %v4901_v35 = vld [vmem:[#allocation10 + $0xa4] ss:$16 sps:$4 sm:$0xff]  }
 0xb30   :  { %v1112_v37 = vadd.f32 %v1107_v36, %v5743_v23  ;;  %v4646_v38 = vpop.f32.mrb[19].mxu0  ;;  %1596 = vmatprep.subr.bf16.mxu1 %v4874_v4  ;;  %v4904_v36 = vld [vmem:[#allocation10 + $0xac] ss:$16 sps:$4 sm:$0xff]   ;;  %v4918_v4 = vld [vmem:[#allocation11 + $0xc0] sm:$0xff]  }
 0xb31   :  { %v4902_v38 = vld [vmem:[#allocation10 + $0xa8] ss:$16 sps:$4 sm:$0xff]  }
 0xb8e   :  { %v1182_v39 = vpop.xlane.xlu0 %1181 }
 0xb8f   :  { %5109 = vrcp.f32 %v1182_v39  ;;  %v4907_v39 = vld [vmem:[#allocation10 + $0xc4] ss:$16 sps:$4 sm:$0xff]  }
 0xb90   :  { %v1185_v43 = vpop.xlane.xlu1 %1184 }
 0xb91   :  { %5111 = vrcp.f32 %v1185_v43  ;;  %v4910_v43 = vld [vmem:[#allocation10 + $0xcc] ss:$16 sps:$4 sm:$0xff]  }
 0xb92   :  { %v1192_v41 = vpop.permute.xlu0 %1191 }
 0xb93   :  { %4654 = vmatpush3.bf16.msra.mxu0 %v1192_v41  ;;  %v4905_v41 = vld [vmem:[#allocation10 + $0xc0] ss:$16 sps:$4 sm:$0xff]  }
 0xb94   :  { %1553 = vmatprep.subr.bf16.mxu0 %v4871_v2 }
 0xb99   :  { %v5110_v44 = vpop.eup %5109 }
 0xb9a   :  { %v1188_v46 = vmul.f32 %v5110_v44, %v5106_v30  ;;  %v4892_v30 = vld [vmem:[#allocation10 + $0x6c] ss:$16 sps:$4 sm:$0xff]   ;;  %v4908_v44 = vld [vmem:[#allocation10 + $0xc8] ss:$16 sps:$4 sm:$0xff]  }
 0xb9b   :  { %v5112_v45 = vpop.eup %5111 }
 0xb9c   :  { %v1189_v47 = vmul.f32 %v5112_v45, %v5108_v48  ;;  %v4890_v48 = vld [vmem:[#allocation10 + $0x68] ss:$16 sps:$4 sm:$0xff]   ;;  %v4913_v45 = vld [vmem:[#allocation10 + $0xe4] ss:$16 sps:$4 sm:$0xff]  }
 0xb9e   :  { %v1190_v49 = vpack.c.bf16 %v1189_v47, %v1188_v46  ;;  %v4916_v46 = vld [vmem:[#allocation10 + $0xec] ss:$16 sps:$4 sm:$0xff]   ;;  %v4911_v47 = vld [vmem:[#allocation10 + $0xe0] ss:$16 sps:$4 sm:$0xff]  }
 0xba0   :  { %4656 = vmatmul.mubr.msk.bf16.vlgmr.msra.gmra.mrb[20].mxu0 %vm607_vm5, %v1190_v49  ;;  %v4914_v49 = vld [vmem:[#allocation10 + $0xe8] ss:$16 sps:$4 sm:$0xff]  }
 0xba1   :  { %1585 = vmatprep.mubr.bf16.mxu0 %v5410_v0  ;;  %1554 = vmatpush1.bf16.msra.mxu0 %v4869_v1 }
 0xba2   :  { %1555 = vmatprep.subr.bf16.mxu0 %v4877_v5  ;;  %v4919_v5 = vld [vmem:[#allocation11] sm:$0xff]  }
 0xc73   :  { %v1231_v23 = vpop.f32.mrb[20].mxu0 }
 0xc74   :  { %v4657_v50 = vpop.f32.mrb[21].mxu0 }
 0xc75   :  { %v1234_v40 = vpop.f32.mrb[22].mxu0 }
 0xc76   :  { %v1238_v51 = vpack.c.bf16 %v1234_v40, %v1231_v23  ;;  %v4658_v53 = vpop.f32.mrb[23].mxu0 }
 0xc78   :  { %4664 = vmatmul.mubr.msk.bf16.vlgmr.msra.gmra.mrb[32].mxu1 %vm555_vm4, %v1238_v51 }
 0xc79   :  { %1628 = vmatprep.mubr.bf16.mxu1 %v5410_v0  ;;  %1597 = vmatpush1.bf16.msra.mxu1 %v4872_v3  ;;  %v4917_v3 = vld [vmem:[#allocation11 + $0x40] sm:$0xff]  }
 0xc7a   :  { %1598 = vmatprep.subr.bf16.mxu1 %v4880_v6  ;;  %v4920_v6 = vld [vmem:[#allocation11 + $0x80] sm:$0xff]  }
 0xd4b   :  { %v1292_v54 = vpop.f32.mrb[32].mxu1 }
 0xd4c   :  { %v1299_v55 = vadd.f32 %v1292_v54, %v1111_v34  ;;  %v4665_v56 = vpop.f32.mrb[33].mxu1  ;;  %v4896_v34 = vld [vmem:[#allocation10 + $0x88] ss:$16 sps:$4 sm:$0xff]  }
 0xd4d   :  { %v1295_v57 = vpop.f32.mrb[34].mxu1  ;;  %v4161_v56 = vld [vmem:[#allocation5 + $0x2] ss:$0 sm:$0xff] }
 0xd4e   :  { %v1301_v59 = vadd.f32 %v1299_v55, %v5604_v25  ;;  %v1300_v60 = vadd.f32 %v1295_v57, %v1112_v37  ;;  %v4666_v42 = vpop.f32.mrb[35].mxu1  ;;  %v4875_v25 = vld [vmem:[#allocation10 + $0x20] ss:$16 sps:$4 sm:$0xff]  }
 0xd4f   :  { %1556 = vmatpush1.bf16.msra.mxu0 %v4875_v25  ;;  %v4899_v37 = vld [vmem:[#allocation10 + $0xa0] ss:$16 sps:$4 sm:$0xff]   ;;  %v4921_v25 = vld [vmem:[#allocation11 + $0x48] sm:$0xff]  }
 0xd50   :  { %v1302_v61 = vadd.f32 %v1300_v60, %v5610_v27  ;;  %v5800_v62 = vadd.f32 %v1301_v59, %v252_v58  ;;  %v4878_v27 = vld [vmem:[#allocation10 + $0x28] ss:$16 sps:$4 sm:$0xff]   ;;  %1557 = vmatprep.subr.bf16.mxu0 %v4883_v24  ;;  %v4162_v60 = vld [vmem:[#allocation5 + $0x3] ss:$0 sm:$0xff] }
 0xd51   :  { %1599 = vmatpush1.bf16.msra.mxu1 %v4878_v27  ;;  %v4922_v27 = vld [vmem:[#allocation11 + $0xc8] sm:$0xff]   ;;  %v4931_v24 = vld [vmem:[#allocation11 + $0x18] sm:$0xff]  }
 0xd52   :  { %1305 = vadd.xlane.f32.xlu1 %v5800_v62  ;;  %v5803_v63 = vadd.f32 %v1302_v61, %v252_v58  ;;  %1600 = vmatprep.subr.bf16.mxu1 %v4886_v26  ;;  %v4932_v26 = vld [vmem:[#allocation11 + $0x98] sm:$0xff]  }
 0xd53   :  { %1558 = vmatpush1.bf16.msra.mxu0 %v4881_v28  ;;  %v4933_v28 = vld [vmem:[#allocation11 + $0x60] sm:$0xff]  }
 0xd54   :  { %1559 = vmatprep.subr.bf16.mxu0 %v4889_v29  ;;  %v4935_v29 = vld [vmem:[#allocation11 + $0x20] sm:$0xff]  }
 0xd55   :  { %1601 = vmatpush1.bf16.msra.mxu1 %v4884_v16  ;;  %v4934_v16 = vld [vmem:[#allocation11 + $0xe0] sm:$0xff]  }
 0xd56   :  { %1307 = vadd.xlane.f32.xlu1 %v5803_v63  ;;  %1602 = vmatprep.subr.bf16.mxu1 %v4892_v30  ;;  %v4936_v30 = vld [vmem:[#allocation11 + $0xa0] sm:$0xff]  }
 0xd57   :  { %1560 = vmatpush1.bf16.msra.mxu0 %v4887_v31  ;;  %v4937_v31 = vld [vmem:[#allocation11 + $0x68] sm:$0xff]  }
 0xd58   :  { %1561 = vmatprep.subr.bf16.mxu0 %v4895_v32  ;;  %v4939_v32 = vld [vmem:[#allocation11 + $0x28] sm:$0xff]  }
 0xd59   :  { %1603 = vmatpush1.bf16.msra.mxu1 %v4890_v48  ;;  %v4938_v48 = vld [vmem:[#allocation11 + $0xe8] sm:$0xff]  }
 0xd5a   :  { %1604 = vmatprep.subr.bf16.mxu1 %v4898_v52  ;;  %v4940_v52 = vld [vmem:[#allocation11 + $0xa8] sm:$0xff]  }
 0xd5b   :  { %1562 = vmatpush1.bf16.msra.mxu0 %v4893_v33  ;;  %v4941_v33 = vld [vmem:[#allocation11 + $0x70] sm:$0xff]  }
 0xd5c   :  { %1563 = vmatprep.subr.bf16.mxu0 %v4901_v35  ;;  %v4943_v35 = vld [vmem:[#allocation11 + $0x30] sm:$0xff]  }
 0xd5d   :  { %1605 = vmatpush1.bf16.msra.mxu1 %v4896_v34  ;;  %v4942_v34 = vld [vmem:[#allocation11 + $0xf0] sm:$0xff]  }
 0xd5e   :  { %1606 = vmatprep.subr.bf16.mxu1 %v4904_v36  ;;  %v4944_v36 = vld [vmem:[#allocation11 + $0xb0] sm:$0xff]  }
 0xd5f   :  { %1564 = vmatpush1.bf16.msra.mxu0 %v4899_v37  ;;  %v4945_v37 = vld [vmem:[#allocation11 + $0x78] sm:$0xff]  }
 0xd60   :  { %1565 = vmatprep.subr.bf16.mxu0 %v4907_v39  ;;  %v4947_v39 = vld [vmem:[#allocation11 + $0x38] sm:$0xff]  }
 0xd61   :  { %1607 = vmatpush1.bf16.msra.mxu1 %v4902_v38  ;;  %v4946_v38 = vld [vmem:[#allocation11 + $0xf8] sm:$0xff]  }
 0xd62   :  { %1608 = vmatprep.subr.bf16.mxu1 %v4910_v43  ;;  %v4948_v43 = vld [vmem:[#allocation11 + $0xb8] sm:$0xff]  }
 0xd63   :  { %1566 = vmatpush1.bf16.msra.mxu0 %v4905_v41  ;;  %v254_v41 = vld [vmem:[#allocation7 + $0x2] ss:$8 sm:$0xf] }
 0xd64   :  { %1567 = vmatprep.subr.bf16.mxu0 %v4913_v45  ;;  %v1376_v45 = vrot.slane %v254_v41, %v5644_v18 }
 0xd65   :  { %1609 = vmatpush1.bf16.msra.mxu1 %v4908_v44  ;;  %v1387_v44 = vsub.s32 3, %v5641_v15 }
 0xd66   :  { %1610 = vmatprep.subr.bf16.mxu1 %v4916_v46  ;;  %v1384_v46 = vrot.slane %v254_v41, %v5647_v19 }
 0xd67   :  { %1568 = vmatpush1.bf16.msra.mxu0 %v4911_v47  ;;  %v1380_v47 = vrot.slane %v254_v41, %v5650_v21 }
 0xd68   :  { %4414 = vmatprep.subr.bf16.mxu0 %v4917_v3 }
 0xd69   :  { %1611 = vmatpush1.bf16.msra.mxu1 %v4914_v49  ;;  %v1388_v49 = vrot.slane %v254_v41, %v1387_v44 }
 0xd6a   :  { %4436 = vmatprep.subr.bf16.mxu1 %v4918_v4 }
 0xddf   :  { %v1306_v7 = vpop.xlane.xlu1 %1305 }
 0xde0   :  { %v1309_v8 = vmul.f32 0.0078125, %v1306_v7  ;;  %v4923_v7 = vld [vmem:[#allocation11 + $0x8] sm:$0xff]  }
 0xde2   :  { %v5807_v9 = vsub.f32 %v5800_v62, %v1309_v8  ;;  %v4924_v8 = vld [vmem:[#allocation11 + $0x88] sm:$0xff]  }
 0xde3   :  { %v1308_v11 = vpop.xlane.xlu1 %1307 }
 0xde4   :  { %v1310_v12 = vmul.f32 0.0078125, %v1308_v11  ;;  %v1313_v13 = vmul.f32 %v5807_v9, %v5807_v9  ;;  %v4926_v11 = vld [vmem:[#allocation11 + $0xd0] sm:$0xff]  }
 0xde6   :  { %v5812_v20 = vsub.f32 %v5803_v63, %v1310_v12  ;;  %1315 = vadd.xlane.f32.xlu1 %v1313_v13  ;;  %v4927_v12 = vld [vmem:[#allocation11 + $0x10] sm:$0xff]  }
 0xde7   :  { %v4928_v13 = vld [vmem:[#allocation11 + $0x90] sm:$0xff]  }
 0xde8   :  { %v1314_v22 = vmul.f32 %v5812_v20, %v5812_v20 }
 0xdea   :  { %1317 = vadd.xlane.f32.xlu1 %v1314_v22  ;;  %v4930_v22 = vld [vmem:[#allocation11 + $0xd8] sm:$0xff]  }
 0xe73   :  { %v1316_v14 = vpop.xlane.xlu1 %1315 }
 0xe74   :  { %v1319_v23 = vmul.f32 0.0078125, %v1316_v14 }
 0xe76   :  { %v1321_v50 = vadd.f32 1e-05, %v1319_v23 }
 0xe77   :  { %v1318_v40 = vpop.xlane.xlu1 %1317 }
 0xe78   :  { %5113 = vrsqrt.f32 %v1321_v50  ;;  %v1320_v51 = vmul.f32 0.0078125, %v1318_v40 }
 0xe7a   :  { %v1322_v53 = vadd.f32 1e-05, %v1320_v51 }
 0xe7c   :  { %5115 = vrsqrt.f32 %v1322_v53 }
 0xe82   :  { %v5114_v54 = vpop.eup %5113 }
 0xe83   :  { %v1325_v55 = vmul.f32 %v5114_v54, %v5807_v9  ;;  %v4925_v9 = vld [vmem:[#allocation11 + $0x50] sm:$0xff]  }
 0xe85   :  { %v1331_v59 = vmul.f32 %v4161_v56, %v1325_v55 }
 0xe86   :  { %v5116_v57 = vpop.eup %5115 }
 0xe87   :  { %v1326_v58 = vmul.f32 %v5116_v57, %v5812_v20  ;;  %v1337_v61 = vadd.f32 %v4162_v60, %v1331_v59  ;;  %v4929_v20 = vld [vmem:[#allocation11 + $0x58] sm:$0xff]  }
 0xe89   :  { %v1332_v42 = vmul.f32 %v4161_v56, %v1326_v58 }
 0xe8b   :  { %v1338_v1 = vadd.f32 %v4162_v60, %v1332_v42 }
 0xe8d   :  { %v1339_v2 = vpack.c.bf16 %v1338_v1, %v1337_v61 }
 0xe8f   :  { %1586 = vmatmul.mubr.bf16.vlgmr.msra.gmra.mrb[24].mxu0 %v1339_v2  ;;  %1629 = vmatmul.mubr.bf16.vlgmr.msra.gmra.mrb[36].mxu1 %v1339_v2 }
 0xe90   :  { %4415 = vmatpush3.bf16.msra.mxu0 %v4919_v5  ;;  %4437 = vmatpush3.bf16.msra.mxu1 %v4920_v6 }
 0xe91   :  { %4416 = vmatprep.subr.bf16.mxu0 %v4921_v25  ;;  %4438 = vmatprep.subr.bf16.mxu1 %v4922_v27 }
 0xe94   :  { %4417 = vmatpush3.bf16.msra.mxu0 %v4923_v7  ;;  %4439 = vmatpush3.bf16.msra.mxu1 %v4924_v8 }
 0xe95   :  { %4418 = vmatprep.subr.bf16.mxu0 %v4925_v9  ;;  %4440 = vmatprep.subr.bf16.mxu1 %v4926_v11 }
 0xe98   :  { %4419 = vmatpush3.bf16.msra.mxu0 %v4927_v12  ;;  %4441 = vmatpush3.bf16.msra.mxu1 %v4928_v13 }
 0xe99   :  { %4420 = vmatprep.subr.bf16.mxu0 %v4929_v20  ;;  %4442 = vmatprep.subr.bf16.mxu1 %v4930_v22 }
 0xe9c   :  { %4421 = vmatpush3.bf16.msra.mxu0 %v4931_v24  ;;  %4443 = vmatpush3.bf16.msra.mxu1 %v4932_v26 }
 0xe9d   :  { %4422 = vmatprep.subr.bf16.mxu0 %v4933_v28  ;;  %4444 = vmatprep.subr.bf16.mxu1 %v4934_v16 }
 0xea0   :  { %4423 = vmatpush3.bf16.msra.mxu0 %v4935_v29  ;;  %4445 = vmatpush3.bf16.msra.mxu1 %v4936_v30 }
 0xea1   :  { %4424 = vmatprep.subr.bf16.mxu0 %v4937_v31  ;;  %4446 = vmatprep.subr.bf16.mxu1 %v4938_v48 }
 0xea4   :  { %4425 = vmatpush3.bf16.msra.mxu0 %v4939_v32  ;;  %4447 = vmatpush3.bf16.msra.mxu1 %v4940_v52 }
 0xea5   :  { %4426 = vmatprep.subr.bf16.mxu0 %v4941_v33  ;;  %4448 = vmatprep.subr.bf16.mxu1 %v4942_v34 }
 0xea8   :  { %4427 = vmatpush3.bf16.msra.mxu0 %v4943_v35  ;;  %4449 = vmatpush3.bf16.msra.mxu1 %v4944_v36 }
 0xea9   :  { %4428 = vmatprep.subr.bf16.mxu0 %v4945_v37  ;;  %4450 = vmatprep.subr.bf16.mxu1 %v4946_v38 }
 0xeac   :  { %4429 = vmatpush3.bf16.msra.mxu0 %v4947_v39  ;;  %4451 = vmatpush3.bf16.msra.mxu1 %v4948_v43 }
 0xead   :  { %4667 = vmatprep.subr.bf16.mxu1 %v5411_v10 }
 0xf62   :  { %v1587_v14 = vpop.f32.mrb[24].mxu0  ;;  %v1630_v23 = vpop.f32.mrb[36].mxu1 }
 0xf63   :  { %v5825_v50 = vadd.f32 %v1587_v14, %v1376_v45  ;;  %v5827_v40 = vadd.f32 %v1630_v23, %v1384_v46  ;;  %v1589_v51 = vpop.f32.mrb[25].mxu0  ;;  %v1632_v53 = vpop.f32.mrb[37].mxu1 }
 0xf64   :  { %v5829_v54 = vadd.f32 %v1589_v51, %v1380_v47  ;;  %v5831_v55 = vadd.f32 %v1632_v53, %v1388_v49  ;;  %v1591_v56 = vpop.f32.mrb[26].mxu0  ;;  %v1634_v57 = vpop.f32.mrb[38].mxu1 }
 0xf65   :  { %v1647_v58 = vmul.f32 0.044715, %v5825_v50  ;;  %v1649_v59 = vmul.f32 0.044715, %v5827_v40  ;;  %v1592_v60 = vadd.f32 %v1591_v56, %v1376_v45  ;;  %v1635_v42 = vadd.f32 %v1634_v57, %v1384_v46  ;;  %v1593_v61 = vpop.f32.mrb[27].mxu0  ;;  %v1636_v1 = vpop.f32.mrb[39].mxu1 }
 0xf66   :  { %v1648_v2 = vmul.f32 0.044715, %v5829_v54  ;;  %v1650_v3 = vmul.f32 0.044715, %v5831_v55  ;;  %v5837_v4 = vadd.f32 %v1593_v61, %v1380_v47  ;;  %v5839_v5 = vadd.f32 %v1636_v1, %v1388_v49 }
 0xf67   :  { %v1655_v6 = vmul.f32 %v1647_v58, %v5825_v50  ;;  %v1657_v25 = vmul.f32 %v1649_v59, %v5827_v40  ;;  %v1651_v27 = vmul.f32 0.044715, %v1592_v60  ;;  %v1653_v7 = vmul.f32 0.044715, %v1635_v42 }
 0xf68   :  { %v1656_v8 = vmul.f32 %v1648_v2, %v5829_v54  ;;  %v1658_v9 = vmul.f32 %v1650_v3, %v5831_v55  ;;  %v1652_v11 = vmul.f32 0.044715, %v5837_v4  ;;  %v1654_v12 = vmul.f32 0.044715, %v5839_v5 }
 0xf69   :  { %v1663_v13 = vmul.f32 %v1655_v6, %v5825_v50  ;;  %v1665_v20 = vmul.f32 %v1657_v25, %v5827_v40  ;;  %v1659_v22 = vmul.f32 %v1651_v27, %v1592_v60  ;;  %v1661_v24 = vmul.f32 %v1653_v7, %v1635_v42 }
 0xf6a   :  { %v1664_v26 = vmul.f32 %v1656_v8, %v5829_v54  ;;  %v1666_v28 = vmul.f32 %v1658_v9, %v5831_v55  ;;  %v1660_v16 = vmul.f32 %v1652_v11, %v5837_v4  ;;  %v1662_v29 = vmul.f32 %v1654_v12, %v5839_v5 }
 0xf6b   :  { %v1671_v30 = vadd.f32 %v1663_v13, %v5825_v50  ;;  %v1673_v31 = vadd.f32 %v1665_v20, %v5827_v40  ;;  %v1667_v48 = vmul.f32 %v1659_v22, %v1592_v60  ;;  %v1669_v32 = vmul.f32 %v1661_v24, %v1635_v42 }
 0xf6c   :  { %v1668_v52 = vmul.f32 %v1660_v16, %v5837_v4  ;;  %v1670_v33 = vmul.f32 %v1662_v29, %v5839_v5  ;;  %v1672_v38 = vadd.f32 %v1664_v26, %v5829_v54  ;;  %v1674_v45 = vadd.f32 %v1666_v28, %v5831_v55 }
 0xf6d   :  { %v1679_v34 = vmul.f32 0.7978846, %v1671_v30  ;;  %v1681_v35 = vmul.f32 0.7978846, %v1673_v31  ;;  %v1675_v36 = vadd.f32 %v1667_v48, %v1592_v60  ;;  %v1677_v37 = vadd.f32 %v1669_v32, %v1635_v42 }
 0xf6e   :  { %v1676_v39 = vadd.f32 %v1668_v52, %v5837_v4  ;;  %v1680_v46 = vmul.f32 0.7978846, %v1672_v38  ;;  %v1678_v49 = vadd.f32 %v1670_v33, %v5839_v5  ;;  %v1682_v14 = vmul.f32 0.7978846, %v1674_v45 }
 0xf6f   :  { %5117 = vtanh.f32 %v1679_v34  ;;  %v1683_v43 = vmul.f32 0.7978846, %v1675_v36  ;;  %v1685_v41 = vmul.f32 0.7978846, %v1677_v37  ;;  %v1639_v61 = vmul.f32 0.5, %v5825_v50 }
 0xf70   :  { %5119 = vtanh.f32 %v1681_v35  ;;  %v1684_v47 = vmul.f32 0.7978846, %v1676_v39  ;;  %v1686_v23 = vmul.f32 0.7978846, %v1678_v49  ;;  %v1643_v1 = vmul.f32 0.5, %v1592_v60 }
 0xf71   :  { %5121 = vtanh.f32 %v1683_v43  ;;  %v1641_v6 = vmul.f32 0.5, %v5827_v40  ;;  %v1645_v25 = vmul.f32 0.5, %v1635_v42  ;;  %v1640_v8 = vmul.f32 0.5, %v5829_v54 }
 0xf72   :  { %5123 = vtanh.f32 %v1685_v41  ;;  %v1644_v20 = vmul.f32 0.5, %v5837_v4  ;;  %v1642_v60 = vmul.f32 0.5, %v5831_v55  ;;  %v1646_v28 = vmul.f32 0.5, %v5839_v5 }
 0xf73   :  { %5125 = vtanh.f32 %v1680_v46  ;;  %v255_v46 = vld [vmem:[#allocation7 + $0x3] ss:$0 sm:$0xff] }
 0xf74   :  { %5127 = vtanh.f32 %v1684_v47 }
 0xf75   :  { %5129 = vtanh.f32 %v1682_v14 }
 0xf76   :  { %5131 = vtanh.f32 %v1686_v23 }
 0xf79   :  { %v5118_v51 = vpop.eup %5117 }
 0xf7a   :  { %v5120_v53 = vpop.eup %5119  ;;  %v1695_v56 = vadd.f32 1.0, %v5118_v51 }
 0xf7b   :  { %v5122_v57 = vpop.eup %5121  ;;  %v1697_v58 = vadd.f32 1.0, %v5120_v53  ;;  %v4949_v53 = vld [vmem:[#allocation8 + $0xc0] ss:$12 sps:$4 sm:$0xff]  }
 0xf7c   :  { %v5124_v59 = vpop.eup %5123  ;;  %v1699_v2 = vadd.f32 1.0, %v5122_v57  ;;  %v1703_v11 = vmul.f32 %v1695_v56, %v1639_v61  ;;  %v4951_v56 = vld [vmem:[#allocation8 + $0xc4] ss:$12 sps:$4 sm:$0xff]   ;;  %v4952_v57 = vld [vmem:[#allocation8 + $0xc8] ss:$12 sps:$4 sm:$0xff]  }
 0xf7d   :  { %v5126_v3 = vpop.eup %5125  ;;  %v1701_v27 = vadd.f32 1.0, %v5124_v59  ;;  %v1705_v24 = vmul.f32 %v1697_v58, %v1641_v6  ;;  %v4955_v58 = vld [vmem:[#allocation8 + $0xdc] ss:$12 sps:$4 sm:$0xff]   ;;  %2279 = vmatprep.subr.bf16.mxu0 %v4951_v56  ;;  %v4953_v59 = vld [vmem:[#allocation8 + $0xd8] ss:$12 sps:$4 sm:$0xff]  }
 0xf7e   :  { %v5128_v7 = vpop.eup %5127  ;;  %v1696_v9 = vadd.f32 1.0, %v5126_v3  ;;  %v1707_v12 = vmul.f32 %v1699_v2, %v1643_v1 }
 0xf7f   :  { %v5130_v13 = vpop.eup %5129  ;;  %v1700_v22 = vadd.f32 1.0, %v5128_v7  ;;  %v1709_v26 = vmul.f32 %v1701_v27, %v1645_v25  ;;  %v4956_v27 = vld [vmem:[#allocation8 + $0xe0] ss:$12 sps:$4 sm:$0xff]  }
 0xf80   :  { %v5132_v50 = vpop.eup %5131  ;;  %v1698_v40 = vadd.f32 1.0, %v5130_v13  ;;  %v1711_v42 = vpack.c.bf16 %v1707_v12, %v1703_v11  ;;  %v1704_v16 = vmul.f32 %v1696_v9, %v1640_v8  ;;  %v4959_v7 = vld [vmem:[#allocation8 + $0xf4] ss:$12 sps:$4 sm:$0xff]   ;;  %v4957_v8 = vld [vmem:[#allocation8 + $0xf0] ss:$12 sps:$4 sm:$0xff]  }
 0xf81   :  { %v1708_v29 = vmul.f32 %v1700_v22, %v1644_v20  ;;  %v1702_v30 = vadd.f32 1.0, %v5132_v50  ;;  %v1713_v54 = vpack.c.bf16 %v1709_v26, %v1705_v24  ;;  %v4960_v9 = vld [vmem:[#allocation8 + $0xf8] ss:$12 sps:$4 sm:$0xff]   ;;  %v4961_v12 = vld [vmem:[#allocation8 + $0x108] ss:$12 sps:$4 sm:$0xff]  }
 0xf82   :  { %v1706_v48 = vmul.f32 %v1698_v40, %v1642_v60  ;;  %v4963_v11 = vld [vmem:[#allocation8 + $0x10c] ss:$12 sps:$4 sm:$0xff]   ;;  %v4964_v13 = vld [vmem:[#allocation8 + $0x110] ss:$12 sps:$4 sm:$0xff]   ;;  %v4968_v24 = vld [vmem:[#allocation8 + $0x128] ss:$12 sps:$4 sm:$0xff]  }
 0xf83   :  { %v1712_v31 = vpack.c.bf16 %v1708_v29, %v1704_v16  ;;  %v1710_v32 = vmul.f32 %v1702_v30, %v1646_v28  ;;  %v4967_v20 = vld [vmem:[#allocation8 + $0x124] ss:$12 sps:$4 sm:$0xff]   ;;  %v4965_v22 = vld [vmem:[#allocation8 + $0x120] ss:$12 sps:$4 sm:$0xff]   ;;  %v4971_v26 = vld [vmem:[#allocation8 + $0x13c] ss:$12 sps:$4 sm:$0xff]  }
 0xf84   :  { %v4969_v50 = vld [vmem:[#allocation8 + $0x138] ss:$12 sps:$4 sm:$0xff]   ;;  %v4972_v60 = vld [vmem:[#allocation8 + $0x140] ss:$12 sps:$4 sm:$0xff]   ;;  %v4973_v40 = vld [vmem:[#allocation8 + $0x150] ss:$12 sps:$4 sm:$0xff]  }
 0xf85   :  { %2003 = vmatprep.mubr.bf16.mxu0 %v1712_v31  ;;  %v1714_v52 = vpack.c.bf16 %v1710_v32, %v1706_v48  ;;  %v4975_v28 = vld [vmem:[#allocation8 + $0x154] ss:$12 sps:$4 sm:$0xff]   ;;  %v4979_v16 = vld [vmem:[#allocation8 + $0x16c] ss:$12 sps:$4 sm:$0xff]   ;;  %v4980_v30 = vld [vmem:[#allocation8 + $0x170] ss:$12 sps:$4 sm:$0xff]  }
 0xf86   :  { %2004 = vmatmul.mubr.bf16.vlgmr.msra.gmra.mrb[28].mxu0 %v1711_v42  ;;  %v4976_v42 = vld [vmem:[#allocation8 + $0x158] ss:$12 sps:$4 sm:$0xff]   ;;  %v4977_v29 = vld [vmem:[#allocation8 + $0x168] ss:$12 sps:$4 sm:$0xff]  }
 0xf87   :  { %2044 = vmatprep.mubr.bf16.mxu1 %v1714_v52  ;;  %2311 = vmatprep.mubr.bf16.mxu0 %v5410_v0 }
 0xf88   :  { %2045 = vmatmul.mubr.bf16.vlgmr.msra.gmra.mrb[40].mxu1 %v1713_v54  ;;  %2280 = vmatpush1.bf16.msra.mxu0 %v4949_v53 }
 0xf89   :  { %4683 = vmatprep.mubr.msk.bf16.mxu1 %vm5412_vm3, %v5411_v10  ;;  %4668 = vmatpush3.bf16.msra.mxu1 %v4952_v57 }
 0xf8a   :  { %4669 = vmatprep.subr.bf16.mxu1 %v5411_v10  ;;  %2281 = vmatprep.subr.bf16.mxu0 %v4955_v58 }
 0xf8c   :  { %2282 = vmatpush1.bf16.msra.mxu0 %v4953_v59 }
 0xf8d   :  { %4670 = vmatpush3.bf16.msra.mxu1 %v4956_v27  ;;  %2283 = vmatprep.subr.bf16.mxu0 %v4959_v7 }
 0xf8e   :  { %4671 = vmatprep.subr.bf16.mxu1 %v5411_v10 }
 0xf90   :  { %2284 = vmatpush1.bf16.msra.mxu0 %v4957_v8 }
 0xf91   :  { %4672 = vmatpush3.bf16.msra.mxu1 %v4960_v9  ;;  %2285 = vmatprep.subr.bf16.mxu0 %v4963_v11 }
 0xf92   :  { %4673 = vmatprep.subr.bf16.mxu1 %v5411_v10 }
 0xf94   :  { %2286 = vmatpush1.bf16.msra.mxu0 %v4961_v12 }
 0xf95   :  { %4674 = vmatpush3.bf16.msra.mxu1 %v4964_v13  ;;  %2287 = vmatprep.subr.bf16.mxu0 %v4967_v20 }
 0xf96   :  { %4675 = vmatprep.subr.bf16.mxu1 %v5411_v10 }
 0xf98   :  { %2288 = vmatpush1.bf16.msra.mxu0 %v4965_v22 }
 0xf99   :  { %4676 = vmatpush3.bf16.msra.mxu1 %v4968_v24  ;;  %2289 = vmatprep.subr.bf16.mxu0 %v4971_v26 }
 0xf9a   :  { %4677 = vmatprep.subr.bf16.mxu1 %v5411_v10 }
 0xf9c   :  { %2290 = vmatpush1.bf16.msra.mxu0 %v4969_v50 }
 0xf9d   :  { %4678 = vmatpush3.bf16.msra.mxu1 %v4972_v60  ;;  %2291 = vmatprep.subr.bf16.mxu0 %v4975_v28  ;;  %v5928_v28 = vld [vmem:[%s6161_s1] sm:$0xff] }
 0xf9e   :  { %4679 = vmatprep.subr.bf16.mxu1 %v5411_v10 }
 0xfa0   :  { %2292 = vmatpush1.bf16.msra.mxu0 %v4973_v40 }
 0xfa1   :  { %4680 = vmatpush3.bf16.msra.mxu1 %v4976_v42  ;;  %2293 = vmatprep.subr.bf16.mxu0 %v4979_v16  ;;  %v5935_v16 = vld [vmem:[%s6161_s1 + $0x8] sm:$0xff] }
 0xfa2   :  { %4681 = vmatprep.subr.bf16.mxu1 %v5411_v10 }
 0xfa4   :  { %2294 = vmatpush1.bf16.msra.mxu0 %v4977_v29 }
 0xfa5   :  { %4682 = vmatpush3.bf16.msra.mxu1 %v4980_v30  ;;  %4687 = vmatprep.subr.bf16.mxu0 %v5411_v10 }
 0xfa6   :  { %4693 = vmatprep.subr.bf16.mxu1 %v5411_v10 }
0x1059   :  { %v4430_v55 = vpop.f32.mrb[28].mxu0 }
0x105a   :  { %v4431_v4 = vpop.f32.mrb[29].mxu0 }
0x105b   :  { %v4452_v5 = vpop.f32.mrb[40].mxu1  ;;  %v4432_v33 = vadd.f32 %v4431_v4, %v4430_v55  ;;  %v4433_v34 = vpop.f32.mrb[30].mxu0 }
0x105c   :  { %v4453_v35 = vpop.f32.mrb[41].mxu1  ;;  %v4434_v36 = vpop.f32.mrb[31].mxu0 }
0x105d   :  { %v4454_v37 = vadd.f32 %v4453_v35, %v4452_v5  ;;  %v4455_v38 = vpop.f32.mrb[42].mxu1  ;;  %v4435_v39 = vadd.f32 %v4434_v36, %v4433_v34 }
0x105e   :  { %v4456_v43 = vpop.f32.mrb[43].mxu1 }
0x105f   :  { %v2047_v41 = vadd.f32 %v4454_v37, %v4432_v33  ;;  %v4457_v45 = vadd.f32 %v4456_v43, %v4455_v38  ;;  %v4227_v33 = vld [vmem:[#allocation5 + $0x4] ss:$0 sm:$0xff]  ;;  %v4228_v37 = vld [vmem:[#allocation5 + $0x5] ss:$0 sm:$0xff] }
0x1061   :  { %v2053_v47 = vadd.f32 %v2047_v41, %v5800_v62  ;;  %v2050_v49 = vadd.f32 %v4457_v45, %v4435_v39  ;;  %v2062_v45 = vld [vmem:[#allocation7 + $0x4] ss:$8 sm:$0x7] }
0x1062   :  { %v2143_v53 = vrot.slane %v2062_v45, %v5650_v21 }
0x1063   :  { %v2054_v14 = vadd.f32 %v2050_v49, %v5803_v63  ;;  %v5872_v23 = vadd.f32 %v2053_v47, %v255_v46  ;;  %v2147_v47 = vrot.slane %v2062_v45, %v5647_v19 }
0x1065   :  { %2067 = vadd.xlane.f32.xlu1 %v5872_v23  ;;  %v5875_v51 = vadd.f32 %v2054_v14, %v255_v46  ;;  %v2139_v46 = vrot.slane %v2062_v45, %v5644_v18 }
0x1067   :  { %2069 = vadd.xlane.f32.xlu0 %v5875_v51 }
0x10f2   :  { %v2068_v62 = vpop.xlane.xlu1 %2067 }
0x10f3   :  { %v2071_v63 = vmul.f32 0.0078125, %v2068_v62 }
0x10f4   :  { %v2070_v61 = vpop.xlane.xlu0 %2069 }
0x10f5   :  { %v2073_v1 = vsub.f32 %v5872_v23, %v2071_v63  ;;  %v2072_v2 = vmul.f32 0.0078125, %v2070_v61 }
0x10f7   :  { %v5881_v3 = vsub.f32 %v5875_v51, %v2072_v2  ;;  %v2075_v6 = vmul.f32 %v2073_v1, %v2073_v1 }
0x10f9   :  { %2077 = vadd.xlane.f32.xlu1 %v2075_v6  ;;  %v2076_v25 = vmul.f32 %v5881_v3, %v5881_v3 }
0x10fd   :  { %2079 = vadd.xlane.f32.xlu1 %v2076_v25 }
0x1186   :  { %v2078_v54 = vpop.xlane.xlu1 %2077 }
0x1187   :  { %v2081_v31 = vmul.f32 0.0078125, %v2078_v54 }
0x1189   :  { %v2083_v48 = vadd.f32 1e-05, %v2081_v31 }
0x118a   :  { %v2080_v32 = vpop.xlane.xlu1 %2079 }
0x118b   :  { %5133 = vrsqrt.f32 %v2083_v48  ;;  %v2082_v52 = vmul.f32 0.0078125, %v2080_v32 }
0x118d   :  { %v2084_v55 = vadd.f32 1e-05, %v2082_v52 }
0x118f   :  { %5135 = vrsqrt.f32 %v2084_v55 }
0x1195   :  { %v5134_v4 = vpop.eup %5133 }
0x1196   :  { %v2087_v5 = vmul.f32 %v5134_v4, %v2073_v1 }
0x1198   :  { %v2093_v36 = vmul.f32 %v4227_v33, %v2087_v5 }
0x1199   :  { %v5136_v34 = vpop.eup %5135 }
0x119a   :  { %v2088_v35 = vmul.f32 %v5136_v34, %v5881_v3  ;;  %v2099_v39 = vadd.f32 %v4228_v37, %v2093_v36 }
0x119c   :  { %v2094_v38 = vmul.f32 %v4227_v33, %v2088_v35 }
0x119e   :  { %v2100_v43 = vadd.f32 %v4228_v37, %v2094_v38 }
0x11a0   :  { %v2101_v41 = vpack.c.bf16 %v2100_v43, %v2099_v39 }
0x11a2   :  { %2312 = vmatmul.mubr.bf16.vlgmr.msra.gmra.mrb[32].mxu0 %v2101_v41  ;;  %4684 = vmatmul.mubr.bf16.vlgmr.msra.gmra.mrb[44].mxu1 %v2101_v41 }
0x11a3   :  { %4689 = vmatprep.mubr.msk.bf16.mxu0 %vm5412_vm3, %v5411_v10  ;;  %4695 = vmatprep.mubr.msk.bf16.mxu1 %vm5412_vm3, %v5411_v10 }
0x1275   :  { %v2313_v49 = vpop.f32.mrb[32].mxu0  ;;  %v2356_v14 = vpop.f32.mrb[44].mxu1 }
0x1276   :  { %v2315_v56 = vpop.f32.mrb[33].mxu0  ;;  %v4685_v57 = vpop.f32.mrb[45].mxu1  ;;  %v2314_v62 = vadd.f32 %v2313_v49, %v2139_v46  ;;  %v2357_v63 = vadd.f32 %v2356_v14, %v2147_v47 }
0x1277   :  { %v2317_v58 = vpop.f32.mrb[34].mxu0  ;;  %v2359_v59 = vpop.f32.mrb[46].mxu1  ;;  %v2316_v6 = vadd.f32 %v2315_v56, %v2143_v53 }
0x1278   :  { %v2318_v61 = vadd.f32 %v2317_v58, %v2139_v46  ;;  %v2360_v1 = vadd.f32 %v2359_v59, %v2147_v47  ;;  %v2319_v2 = vpop.f32.mrb[35].mxu0  ;;  %v4686_v3 = vpop.f32.mrb[47].mxu1 }
0x1279   :  { %v2320_v25 = vadd.f32 %v2319_v2, %v2143_v53 }
0x127a   :  { %v5901_v27 = vpack.c.bf16 %v2318_v61, %v2314_v62  ;;  %v5903_v7 = vpack.c.bf16 %v2360_v1, %v2357_v63 }
0x127b   :  { %v5905_v8 = vpack.c.bf16 %v2320_v25, %v2316_v6 }
0x127c   :  { %4694 = vmatpush3.bf16.msra.mxu1 %v5903_v7 }
0x127d   :  { %2494 = vrot.lane.b32.xlu1 %v5905_v8, %s5413_s3  ;;  %v2370_v9 = vsel %vm555_vm4, %v5905_v8, 0  ;;  %4705 = vmatprep.subr.bf16.mxu1 %v5411_v10 }
0x127e   :  { %4688 = vmatpush3.bf16.xpose.msra.mxu0 %v2370_v9 }
0x127f   :  { %4699 = vmatprep.subr.bf16.mxu0 %v5411_v10 }
0x1281   :  { %2491 = vrot.lane.b32.xlu1 %v5901_v27, %s5413_s3 }
0x1285   :  { %4690 = vmatmul.mubr.msk.bf16.vlgmr.msra.gmra.mrb[36].mxu0 %vm555_vm4, %v5901_v27 }
0x1286   :  { %4701 = vmatprep.mubr.msk.bf16.mxu0 %vm5412_vm3, %v5411_v10 }
0x12ef   :  { %v2495_v11 = vpop.permute.xlu1 %2494 }
0x12f0   :  { %v2500_v12 = vsel %vm555_vm4, %v2495_v11, 0 }
0x12f1   :  { %4700 = vmatpush3.bf16.xpose.msra.mxu0 %v2500_v12  ;;  %v4983_v12 = vld [vmem:[%s6167_s7 + $0x50] sm:$0xff]  }
0x12f2   :  { %4711 = vmatprep.subr.bf16.mxu0 %v5411_v10 }
0x12f3   :  { %v2492_v13 = vpop.permute.xlu1 %2491 }
0x12f8   :  { %4702 = vmatmul.mubr.msk.bf16.vlgmr.msra.gmra.mrb[40].mxu0 %vm555_vm4, %v2492_v13  ;;  %v4984_v13 = vld [vmem:[%s6167_s7 + $0x58] sm:$0xff]  }
0x12f9   :  { %4715 = vmatprep.mubr.msk.bf16.mxu0 %vm5412_vm3, %v5411_v10  ;;  %4712 = vmatpush3.bf16.msra.mxu0 %v4983_v12 }
0x12fa   :  { %4713 = vmatprep.subr.bf16.mxu0 %v5411_v10 }
0x12fd   :  { %4714 = vmatpush3.bf16.msra.mxu0 %v4984_v13 }
0x12fe   :  { %4727 = vmatprep.subr.bf16.mxu0 %v5411_v10 }
0x1358   :  { %v2406_v20 = vpop.f32.mrb[36].mxu0 }
0x1359   :  { %v2413_v22 = vmul.f32 0.17677669, %v2406_v20  ;;  %v4691_v24 = vpop.f32.mrb[37].mxu0 }
0x135a   :  { %v2409_v26 = vpop.f32.mrb[38].mxu0 }
0x135b   :  { %v2414_v50 = vmul.f32 0.17677669, %v2409_v26  ;;  %v4692_v60 = vpop.f32.mrb[39].mxu0  ;;  %v2415_v40 = vadd.f32 %v5928_v28, %v2413_v22 }
0x135d   :  { %v2417_v42 = vsel %vm607_vm5, %v2415_v40, -inf  ;;  %v2416_v29 = vadd.f32 %v5935_v16, %v2414_v50 }
0x135e   :  { %2418 = vmax.xlane.f32.xlu1 %v2417_v42  ;;  %v4981_v42 = vld [vmem:[%s6167_s7 + $0x40] sm:$0xff]  }
0x135f   :  { %v2420_v30 = vsel %vm607_vm5, %v2416_v29, -inf }
0x1360   :  { %2421 = vmax.xlane.f32.xlu0 %v2420_v30  ;;  %v4982_v30 = vld [vmem:[%s6167_s7 + $0x48] sm:$0xff]  }
0x136f   :  { %2737 = vrot.lane.b32.xlu1 %v5905_v8, %s5400_s6 }
0x13cb   :  { %v2536_v54 = vpop.f32.mrb[40].mxu0 }
0x13cc   :  { %v2543_v31 = vmul.f32 0.17677669, %v2536_v54  ;;  %v4703_v48 = vpop.f32.mrb[41].mxu0 }
0x13cd   :  { %v2539_v32 = vpop.f32.mrb[42].mxu0 }
0x13ce   :  { %v2544_v52 = vmul.f32 0.17677669, %v2539_v32  ;;  %v4704_v55 = vpop.f32.mrb[43].mxu0  ;;  %v2545_v4 = vadd.f32 %v5928_v28, %v2543_v31 }
0x13d0   :  { %v2547_v5 = vsel %vm607_vm5, %v2545_v4, -inf  ;;  %v2546_v33 = vadd.f32 %v5935_v16, %v2544_v52 }
0x13d1   :  { %2548 = vmax.xlane.f32.xlu0 %v2547_v5 }
0x13d2   :  { %v2550_v34 = vsel %vm607_vm5, %v2546_v33, -inf }
0x13d5   :  { %2551 = vmax.xlane.f32.xlu0 %v2550_v34 }
0x13eb   :  { %v2419_v35 = vpop.xlane.xlu1 %2418 }
0x13ec   :  { %v2423_v36 = vsub.f32 %v2415_v40, %v2419_v35 }
0x13ed   :  { %v2422_v37 = vpop.xlane.xlu0 %2421 }
0x13ee   :  { %v2425_v38 = vmul.f32 1.442695, %v2423_v36  ;;  %v2424_v39 = vsub.f32 %v2416_v29, %v2422_v37 }
0x13ef   :  { %v2738_v5 = vpop.permute.xlu1 %2737 }
0x13f0   :  { %5137 = vpow2.f32 %v2425_v38  ;;  %v2427_v43 = vmul.f32 1.442695, %v2424_v39  ;;  %v2743_v36 = vsel %vm555_vm4, %v2738_v5, 0 }
0x13f2   :  { %5139 = vpow2.f32 %v2427_v43 }
0x13fa   :  { %v5138_v41 = vpop.eup %5137 }
0x13fb   :  { %v2429_v45 = vsel %vm607_vm5, %v5138_v41, 0.0 }
0x13fc   :  { %v5140_v46 = vpop.eup %5139  ;;  %2430 = vadd.xlane.f32.xlu0 %v2429_v45 }
0x13fd   :  { %v2432_v47 = vsel %vm607_vm5, %v5140_v46, 0.0 }
0x1400   :  { %2433 = vadd.xlane.f32.xlu0 %v2432_v47 }
0x145e   :  { %v2549_v49 = vpop.xlane.xlu0 %2548 }
0x145f   :  { %v2553_v14 = vsub.f32 %v2545_v4, %v2549_v49 }
0x1461   :  { %v2555_v53 = vmul.f32 1.442695, %v2553_v14 }
0x1462   :  { %v2552_v56 = vpop.xlane.xlu0 %2551 }
0x1463   :  { %5141 = vpow2.f32 %v2555_v53  ;;  %v2554_v57 = vsub.f32 %v2546_v33, %v2552_v56 }
0x1465   :  { %v2557_v58 = vmul.f32 1.442695, %v2554_v57 }
0x1467   :  { %5143 = vpow2.f32 %v2557_v58 }
0x146d   :  { %v5142_v59 = vpop.eup %5141 }
0x146e   :  { %v2559_v62 = vsel %vm607_vm5, %v5142_v59, 0.0 }
0x146f   :  { %2560 = vadd.xlane.f32.xlu0 %v2559_v62 }
0x1471   :  { %v5144_v63 = vpop.eup %5143 }
0x1472   :  { %v2562_v61 = vsel %vm607_vm5, %v5144_v63, 0.0 }
0x1473   :  { %2563 = vadd.xlane.f32.xlu0 %v2562_v61 }
0x1489   :  { %2571 = vrot.lane.b32.xlu0 %v5903_v7, %s5413_s3  ;;  %v2431_v1 = vpop.xlane.xlu0 %2430 }
0x148a   :  { %5145 = vrcp.f32 %v2431_v1 }
0x148d   :  { %2735 = vrot.lane.b32.xlu0 %v5901_v27, %s5400_s6  ;;  %v2434_v2 = vpop.xlane.xlu0 %2433 }
0x148e   :  { %5147 = vrcp.f32 %v2434_v2 }
0x1494   :  { %v5146_v3 = vpop.eup %5145 }
0x1495   :  { %v2437_v25 = vmul.f32 %v5146_v3, %v5138_v41 }
0x1498   :  { %v5148_v6 = vpop.eup %5147 }
0x1499   :  { %v2438_v9 = vmul.f32 %v5148_v6, %v5140_v46 }
0x149b   :  { %v2439_v11 = vpack.c.bf16 %v2438_v9, %v2437_v25 }
0x149d   :  { %4696 = vmatmul.mubr.msk.bf16.vlgmr.msra.gmra.mrb[48].mxu1 %vm607_vm5, %v2439_v11 }
0x149e   :  { %4707 = vmatprep.mubr.msk.bf16.mxu1 %vm5412_vm3, %v5411_v10 }
0x14fc   :  { %v2561_v20 = vpop.xlane.xlu0 %2560 }
0x14fd   :  { %5149 = vrcp.f32 %v2561_v20 }
0x1500   :  { %v2564_v22 = vpop.xlane.xlu0 %2563 }
0x1501   :  { %5151 = vrcp.f32 %v2564_v22 }
0x1504   :  { %v2572_v24 = vpop.permute.xlu0 %2571 }
0x1505   :  { %4706 = vmatpush3.bf16.msra.mxu1 %v2572_v24 }
0x1506   :  { %4719 = vmatprep.subr.bf16.mxu1 %v5411_v10 }
0x1507   :  { %v5150_v26 = vpop.eup %5149 }
0x1508   :  { %v2567_v60 = vmul.f32 %v5150_v26, %v5142_v59  ;;  %v2736_v37 = vpop.permute.xlu0 %2735 }
0x150b   :  { %v5152_v50 = vpop.eup %5151 }
0x150c   :  { %v2568_v40 = vmul.f32 %v5152_v50, %v5144_v63  ;;  %v4985_v50 = vld [vmem:[%s6167_s7 + $0x60] sm:$0xff]  }
0x150e   :  { %v2569_v29 = vpack.c.bf16 %v2568_v40, %v2567_v60 }
0x1510   :  { %4708 = vmatmul.mubr.msk.bf16.vlgmr.msra.gmra.mrb[52].mxu1 %vm607_vm5, %v2569_v29 }
0x1511   :  { %4720 = vmatpush3.bf16.msra.mxu1 %v4981_v42  ;;  %4723 = vmatprep.mubr.msk.bf16.mxu1 %vm5412_vm3, %v5411_v10 }
0x1512   :  { %4721 = vmatprep.subr.bf16.mxu1 %v5411_v10 }
0x1515   :  { %4722 = vmatpush3.bf16.msra.mxu1 %v4982_v30 }
0x1516   :  { %4733 = vmatprep.subr.bf16.mxu1 %v5411_v10 }
0x1570   :  { %v2477_v54 = vpop.f32.mrb[48].mxu1 }
0x1571   :  { %v4697_v31 = vpop.f32.mrb[49].mxu1 }
0x1572   :  { %v2480_v48 = vpop.f32.mrb[50].mxu1 }
0x1573   :  { %v2484_v32 = vpack.c.bf16 %v2480_v48, %v2477_v54  ;;  %v4698_v52 = vpop.f32.mrb[51].mxu1 }
0x1574   :  { %v4986_v52 = vld [vmem:[%s6167_s7 + $0x68] sm:$0xff]  }
0x1575   :  { %4724 = vmatmul.mubr.msk.bf16.vlgmr.msra.gmra.mrb[56].mxu1 %vm555_vm4, %v2484_v32 }
0x1576   :  { %4735 = vmatprep.mubr.msk.bf16.mxu1 %vm5412_vm3, %v5411_v10 }
0x15e3   :  { %v2611_v55 = vpop.f32.mrb[52].mxu1 }
0x15e4   :  { %v4709_v4 = vpop.f32.mrb[53].mxu1 }
0x15e5   :  { %v2614_v33 = vpop.f32.mrb[54].mxu1 }
0x15e6   :  { %v2618_v34 = vpack.c.bf16 %v2614_v33, %v2611_v55  ;;  %v4710_v35 = vpop.f32.mrb[55].mxu1 }
0x15e8   :  { %4716 = vmatmul.mubr.msk.bf16.vlgmr.msra.gmra.mrb[44].mxu0 %vm555_vm4, %v2618_v34 }
0x15e9   :  { %4728 = vmatpush3.bf16.xpose.msra.mxu0 %v2743_v36  ;;  %4729 = vmatprep.mubr.msk.bf16.mxu0 %vm5412_vm3, %v5411_v10 }
0x15ea   :  { %4739 = vmatprep.subr.bf16.mxu0 %v5411_v10 }
0x15f0   :  { %4730 = vmatmul.mubr.msk.bf16.vlgmr.msra.gmra.mrb[48].mxu0 %vm555_vm4, %v2736_v37 }
0x15f1   :  { %4743 = vmatprep.mubr.msk.bf16.mxu0 %vm5412_vm3, %v5411_v10  ;;  %4740 = vmatpush3.bf16.msra.mxu0 %v4985_v50 }
0x15f2   :  { %4741 = vmatprep.subr.bf16.mxu0 %v5411_v10 }
0x15f5   :  { %4742 = vmatpush3.bf16.msra.mxu0 %v4986_v52 }
0x15f6   :  { %4753 = vmatprep.subr.bf16.mxu0 %v5411_v10 }
0x1648   :  { %v2728_v38 = vpop.f32.mrb[56].mxu1 }
0x1649   :  { %v4725_v39 = vpop.f32.mrb[57].mxu1 }
0x164a   :  { %v2731_v43 = vpop.f32.mrb[58].mxu1 }
0x164b   :  { %v4726_v41 = vpop.f32.mrb[59].mxu1 }
0x16bb   :  { %v2672_v45 = vpop.f32.mrb[44].mxu0 }
0x16bc   :  { %v5987_v46 = vadd.f32 %v2728_v38, %v2672_v45  ;;  %v4717_v47 = vpop.f32.mrb[45].mxu0 }
0x16bd   :  { %v2675_v49 = vpop.f32.mrb[46].mxu0 }
0x16be   :  { %v5989_v14 = vadd.f32 %v2731_v43, %v2675_v49  ;;  %v4718_v53 = vpop.f32.mrb[47].mxu0 }
0x16c3   :  { %v2779_v56 = vpop.f32.mrb[48].mxu0 }
0x16c4   :  { %v2786_v57 = vmul.f32 0.17677669, %v2779_v56  ;;  %v4731_v58 = vpop.f32.mrb[49].mxu0 }
0x16c5   :  { %v2782_v59 = vpop.f32.mrb[50].mxu0 }
0x16c6   :  { %v2787_v62 = vmul.f32 0.17677669, %v2782_v59  ;;  %v4732_v63 = vpop.f32.mrb[51].mxu0  ;;  %v2788_v61 = vadd.f32 %v5928_v28, %v2786_v57 }
0x16c8   :  { %v2790_v1 = vsel %vm607_vm5, %v2788_v61, -inf  ;;  %v2789_v2 = vadd.f32 %v5935_v16, %v2787_v62 }
0x16c9   :  { %2791 = vmax.xlane.f32.xlu1 %v2790_v1 }
0x16ca   :  { %v2793_v3 = vsel %vm607_vm5, %v2789_v2, -inf }
0x16cb   :  { %2794 = vmax.xlane.f32.xlu0 %v2793_v3 }
0x1756   :  { %v2792_v6 = vpop.xlane.xlu1 %2791 }
0x1757   :  { %v2796_v25 = vsub.f32 %v2788_v61, %v2792_v6 }
0x1758   :  { %v2795_v9 = vpop.xlane.xlu0 %2794 }
0x1759   :  { %v2798_v11 = vmul.f32 1.442695, %v2796_v25  ;;  %v2797_v12 = vsub.f32 %v2789_v2, %v2795_v9 }
0x175b   :  { %5153 = vpow2.f32 %v2798_v11  ;;  %v2800_v13 = vmul.f32 1.442695, %v2797_v12 }
0x175d   :  { %5155 = vpow2.f32 %v2800_v13 }
0x1765   :  { %v5154_v20 = vpop.eup %5153 }
0x1766   :  { %v2802_v22 = vsel %vm607_vm5, %v5154_v20, 0.0 }
0x1767   :  { %v5156_v24 = vpop.eup %5155  ;;  %2803 = vadd.xlane.f32.xlu0 %v2802_v22 }
0x1768   :  { %v2805_v26 = vsel %vm607_vm5, %v5156_v24, 0.0 }
0x1769   :  { %2806 = vadd.xlane.f32.xlu1 %v2805_v26 }
0x177a   :  { %2925 = vrot.lane.b32.xlu1 %v5905_v8, %s5405_s15 }
0x177d   :  { %2813 = vrot.lane.b32.xlu0 %v5903_v7, %s5400_s6 }
0x177e   :  { %2923 = vrot.lane.b32.xlu1 %v5901_v27, %s5405_s15 }
0x17f4   :  { %v2804_v60 = vpop.xlane.xlu0 %2803 }
0x17f5   :  { %5157 = vrcp.f32 %v2804_v60 }
0x17f6   :  { %v2807_v40 = vpop.xlane.xlu1 %2806 }
0x17f7   :  { %5159 = vrcp.f32 %v2807_v40 }
0x17f8   :  { %v2814_v42 = vpop.permute.xlu0 %2813 }
0x17f9   :  { %4734 = vmatpush3.bf16.msra.mxu1 %v2814_v42 }
0x17fa   :  { %4747 = vmatprep.subr.bf16.mxu1 %v5411_v10  ;;  %v2926_v27 = vpop.permute.xlu1 %2925 }
0x17fb   :  { %v2931_v48 = vsel %vm555_vm4, %v2926_v27, 0 }
0x17fe   :  { %v2924_v32 = vpop.permute.xlu1 %2923 }
0x17ff   :  { %v5158_v8 = vpop.eup %5157 }
0x1800   :  { %v2810_v30 = vmul.f32 %v5158_v8, %v5154_v20 }
0x1801   :  { %v5160_v29 = vpop.eup %5159 }
0x1802   :  { %v2811_v54 = vmul.f32 %v5160_v29, %v5156_v24 }
0x1804   :  { %v2812_v31 = vpack.c.bf16 %v2811_v54, %v2810_v30 }
0x1806   :  { %4736 = vmatmul.mubr.msk.bf16.vlgmr.msra.gmra.mrb[60].mxu1 %vm607_vm5, %v2812_v31  ;;  %v2063_v31 = vld [vmem:[#allocation7 + $0x5] ss:$0 sm:$0xff] }
0x1807   :  { %4748 = vmatpush3.bf16.xpose.msra.mxu1 %v2931_v48  ;;  %4749 = vmatprep.mubr.msk.bf16.mxu1 %vm5412_vm3, %v5411_v10 }
0x1808   :  { %4759 = vmatprep.subr.bf16.mxu1 %v5411_v10 }
0x180e   :  { %4750 = vmatmul.mubr.msk.bf16.vlgmr.msra.gmra.mrb[64].mxu1 %vm555_vm4, %v2924_v32 }
0x180f   :  { %4763 = vmatprep.mubr.msk.bf16.mxu1 %vm5412_vm3, %v5411_v10 }
0x18d9   :  { %v2853_v55 = vpop.f32.mrb[60].mxu1 }
0x18da   :  { %v4737_v4 = vpop.f32.mrb[61].mxu1 }
0x18db   :  { %v2856_v5 = vpop.f32.mrb[62].mxu1 }
0x18dc   :  { %v2860_v33 = vpack.c.bf16 %v2856_v5, %v2853_v55  ;;  %v4738_v34 = vpop.f32.mrb[63].mxu1 }
0x18dd   :  { %v4992_v34 = vld [vmem:[#allocation10 + $0x108] ss:$16 sps:$4 sm:$0xff]  }
0x18de   :  { %4744 = vmatmul.mubr.msk.bf16.vlgmr.msra.gmra.mrb[52].mxu0 %vm555_vm4, %v2860_v33  ;;  %v4991_v33 = vld [vmem:[#allocation10 + $0x104] ss:$16 sps:$4 sm:$0xff]  }
0x18df   :  { %4755 = vmatprep.mubr.msk.bf16.mxu0 %vm5412_vm3, %v5411_v10 }
0x18e1   :  { %v2967_v35 = vpop.f32.mrb[64].mxu1 }
0x18e2   :  { %v2974_v36 = vmul.f32 0.17677669, %v2967_v35  ;;  %v4751_v37 = vpop.f32.mrb[65].mxu1  ;;  %v4994_v35 = vld [vmem:[#allocation10 + $0x10c] ss:$16 sps:$4 sm:$0xff]  }
0x18e3   :  { %v2970_v38 = vpop.f32.mrb[66].mxu1  ;;  %v5000_v37 = vld [vmem:[#allocation10 + $0x12c] ss:$16 sps:$4 sm:$0xff]  }
0x18e4   :  { %v2975_v39 = vmul.f32 0.17677669, %v2970_v38  ;;  %v4752_v43 = vpop.f32.mrb[67].mxu1  ;;  %v2976_v41 = vadd.f32 %v5928_v28, %v2974_v36  ;;  %v4997_v36 = vld [vmem:[#allocation10 + $0x124] ss:$16 sps:$4 sm:$0xff]  }
0x18e6   :  { %v2978_v45 = vsel %vm607_vm5, %v2976_v41, -inf  ;;  %v2977_v47 = vadd.f32 %v5935_v16, %v2975_v39 }
0x18e7   :  { %2979 = vmax.xlane.f32.xlu0 %v2978_v45 }
0x18e8   :  { %v2981_v49 = vsel %vm607_vm5, %v2977_v47, -inf }
0x18e9   :  { %2982 = vmax.xlane.f32.xlu1 %v2981_v49 }
0x18fa   :  { %3001 = vrot.lane.b32.xlu1 %v5903_v7, %s5405_s15  ;;  %v4987_v7 = vld [vmem:[%s6167_s7 + $0x70] sm:$0xff]  }
0x18fb   :  { %4760 = vmatpush3.bf16.msra.mxu1 %v4987_v7  ;;  %v5013_v7 = vld [vmem:[#allocation10 + $0x180] ss:$16 sps:$4 sm:$0xff]  }
0x18fc   :  { %4761 = vmatprep.subr.bf16.mxu1 %v5411_v10 }
0x1974   :  { %v2980_v53 = vpop.xlane.xlu0 %2979 }
0x1975   :  { %v2984_v56 = vsub.f32 %v2976_v41, %v2980_v53 }
0x1976   :  { %v2983_v57 = vpop.xlane.xlu1 %2982 }
0x1977   :  { %v2986_v58 = vmul.f32 1.442695, %v2984_v56  ;;  %v2985_v59 = vsub.f32 %v2977_v47, %v2983_v57  ;;  %v5003_v56 = vld [vmem:[#allocation10 + $0x144] ss:$16 sps:$4 sm:$0xff]   ;;  %v5006_v57 = vld [vmem:[#allocation10 + $0x14c] ss:$16 sps:$4 sm:$0xff]  }
0x1979   :  { %5161 = vpow2.f32 %v2986_v58  ;;  %v2988_v62 = vmul.f32 1.442695, %v2985_v59  ;;  %v5001_v58 = vld [vmem:[#allocation10 + $0x140] ss:$16 sps:$4 sm:$0xff]   ;;  %v5004_v59 = vld [vmem:[#allocation10 + $0x148] ss:$16 sps:$4 sm:$0xff]  }
0x197a   :  { %v3002_v63 = vpop.permute.xlu1 %3001 }
0x197b   :  { %5163 = vpow2.f32 %v2988_v62  ;;  %4754 = vmatpush3.bf16.msra.mxu0 %v3002_v63  ;;  %v5009_v62 = vld [vmem:[#allocation10 + $0x164] ss:$16 sps:$4 sm:$0xff]   ;;  %v5012_v63 = vld [vmem:[#allocation10 + $0x16c] ss:$16 sps:$4 sm:$0xff]  }
0x197c   :  { %3364 = vmatprep.subr.bf16.mxu0 %v4991_v33 }
0x1983   :  { %v5162_v28 = vpop.eup %5161 }
0x1984   :  { %v2990_v16 = vsel %vm607_vm5, %v5162_v28, 0.0 }
0x1985   :  { %v5164_v61 = vpop.eup %5163  ;;  %2991 = vadd.xlane.f32.xlu0 %v2990_v16  ;;  %v5010_v16 = vld [vmem:[#allocation10 + $0x168] ss:$16 sps:$4 sm:$0xff]  }
0x1986   :  { %v2993_v1 = vsel %vm607_vm5, %v5164_v61, 0.0 }
0x1989   :  { %2994 = vadd.xlane.f32.xlu0 %v2993_v1  ;;  %v5018_v1 = vld [vmem:[#allocation10 + $0x18c] ss:$16 sps:$4 sm:$0xff]  }
0x19b1   :  { %v2914_v2 = vpop.f32.mrb[52].mxu0 }
0x19b2   :  { %v2921_v3 = vadd.f32 %v2914_v2, %v5987_v46  ;;  %v4745_v6 = vpop.f32.mrb[53].mxu0  ;;  %v4988_v46 = vld [vmem:[%s6167_s7 + $0x78] sm:$0xff]  }
0x19b3   :  { %v2917_v25 = vpop.f32.mrb[54].mxu0  ;;  %4762 = vmatpush3.bf16.msra.mxu1 %v4988_v46  ;;  %v5016_v2 = vld [vmem:[#allocation10 + $0x188] ss:$16 sps:$4 sm:$0xff]   ;;  %v5024_v6 = vld [vmem:[#allocation10 + $0x1ac] ss:$16 sps:$4 sm:$0xff]  }
0x19b4   :  { %v2922_v9 = vadd.f32 %v2917_v25, %v5989_v14  ;;  %v4746_v11 = vpop.f32.mrb[55].mxu0  ;;  %3407 = vmatprep.subr.bf16.mxu1 %v4994_v35  ;;  %v5019_v25 = vld [vmem:[#allocation10 + $0x1a0] ss:$16 sps:$4 sm:$0xff]  }
0x19b5   :  { %v5027_v11 = vld [vmem:[#allocation10 + $0x1c4] ss:$16 sps:$4 sm:$0xff]  }
0x19b6   :  { %v5038_v35 = vld [vmem:[#allocation11 + $0x1c0] sm:$0xff]  }
0x1a12   :  { %v2992_v12 = vpop.xlane.xlu0 %2991 }
0x1a13   :  { %5165 = vrcp.f32 %v2992_v12  ;;  %v5030_v12 = vld [vmem:[#allocation10 + $0x1cc] ss:$16 sps:$4 sm:$0xff]  }
0x1a16   :  { %v2995_v13 = vpop.xlane.xlu0 %2994 }
0x1a17   :  { %5167 = vrcp.f32 %v2995_v13  ;;  %v5025_v13 = vld [vmem:[#allocation10 + $0x1c0] ss:$16 sps:$4 sm:$0xff]  }
0x1a1d   :  { %v5166_v20 = vpop.eup %5165 }
0x1a1e   :  { %v2998_v24 = vmul.f32 %v5166_v20, %v5162_v28  ;;  %v5007_v28 = vld [vmem:[#allocation10 + $0x160] ss:$16 sps:$4 sm:$0xff]   ;;  %v5028_v20 = vld [vmem:[#allocation10 + $0x1c8] ss:$16 sps:$4 sm:$0xff]  }
0x1a21   :  { %v5168_v22 = vpop.eup %5167 }
0x1a22   :  { %v2999_v26 = vmul.f32 %v5168_v22, %v5164_v61  ;;  %v5015_v61 = vld [vmem:[#allocation10 + $0x184] ss:$16 sps:$4 sm:$0xff]  }
0x1a23   :  { %v5033_v22 = vld [vmem:[#allocation10 + $0x1e4] ss:$16 sps:$4 sm:$0xff]  }
0x1a24   :  { %v3000_v50 = vpack.c.bf16 %v2999_v26, %v2998_v24  ;;  %v5036_v24 = vld [vmem:[#allocation10 + $0x1ec] ss:$16 sps:$4 sm:$0xff]   ;;  %v5031_v26 = vld [vmem:[#allocation10 + $0x1e0] ss:$16 sps:$4 sm:$0xff]  }
0x1a26   :  { %4756 = vmatmul.mubr.msk.bf16.vlgmr.msra.gmra.mrb[56].mxu0 %vm607_vm5, %v3000_v50  ;;  %v5034_v50 = vld [vmem:[#allocation10 + $0x1e8] ss:$16 sps:$4 sm:$0xff]  }
0x1a27   :  { %3396 = vmatprep.mubr.bf16.mxu0 %v5410_v0 }
0x1af9   :  { %v3041_v14 = vpop.f32.mrb[56].mxu0 }
0x1afa   :  { %v4757_v60 = vpop.f32.mrb[57].mxu0 }
0x1afb   :  { %v3044_v40 = vpop.f32.mrb[58].mxu0 }
0x1afc   :  { %v3048_v42 = vpack.c.bf16 %v3044_v40, %v3041_v14  ;;  %v4758_v8 = vpop.f32.mrb[59].mxu0 }
0x1afe   :  { %4764 = vmatmul.mubr.msk.bf16.vlgmr.msra.gmra.mrb[68].mxu1 %vm555_vm4, %v3048_v42 }
0x1aff   :  { %3439 = vmatprep.mubr.bf16.mxu1 %v5410_v0  ;;  %v4989_v0 = vld [vmem:[#allocation10 + $0x100] ss:$16 sps:$4 sm:$0xff]   ;;  %3408 = vmatpush1.bf16.msra.mxu1 %v4992_v34 }
0x1b00   :  { %3365 = vmatpush1.bf16.msra.mxu0 %v4989_v0  ;;  %3409 = vmatprep.subr.bf16.mxu1 %v5000_v37  ;;  %v5037_v34 = vld [vmem:[#allocation11 + $0x140] sm:$0xff]  }
0x1b01   :  { %3366 = vmatprep.subr.bf16.mxu0 %v4997_v36  ;;  %v5039_v36 = vld [vmem:[#allocation11 + $0x100] sm:$0xff]  }
0x1b02   :  { %v5040_v37 = vld [vmem:[#allocation11 + $0x180] sm:$0xff]  }
0x1bd1   :  { %v3102_v29 = vpop.f32.mrb[68].mxu1 }
0x1bd2   :  { %v3109_v30 = vadd.f32 %v3102_v29, %v2921_v3  ;;  %v4765_v54 = vpop.f32.mrb[69].mxu1  ;;  %v5021_v3 = vld [vmem:[#allocation10 + $0x1a4] ss:$16 sps:$4 sm:$0xff]  }
0x1bd3   :  { %v3105_v27 = vpop.f32.mrb[70].mxu1  ;;  %v4289_v54 = vld [vmem:[#allocation5 + $0x6] ss:$0 sm:$0xff] }
0x1bd4   :  { %v3111_v48 = vadd.f32 %v3109_v30, %v5872_v23  ;;  %v3110_v32 = vadd.f32 %v3105_v27, %v2922_v9  ;;  %v4766_v52 = vpop.f32.mrb[71].mxu1  ;;  %v4995_v23 = vld [vmem:[#allocation10 + $0x120] ss:$16 sps:$4 sm:$0xff]   ;;  %v5022_v9 = vld [vmem:[#allocation10 + $0x1a8] ss:$16 sps:$4 sm:$0xff]  }
0x1bd5   :  { %3367 = vmatpush1.bf16.msra.mxu0 %v4995_v23  ;;  %v5041_v23 = vld [vmem:[#allocation11 + $0x148] sm:$0xff]  }
0x1bd6   :  { %v3112_v55 = vadd.f32 %v3110_v32, %v5875_v51  ;;  %v6046_v4 = vadd.f32 %v3111_v48, %v2063_v31  ;;  %v4998_v51 = vld [vmem:[#allocation10 + $0x128] ss:$16 sps:$4 sm:$0xff]   ;;  %3368 = vmatprep.subr.bf16.mxu0 %v5003_v56  ;;  %v4290_v32 = vld [vmem:[#allocation5 + $0x7] ss:$0 sm:$0xff] }
0x1bd7   :  { %3410 = vmatpush1.bf16.msra.mxu1 %v4998_v51  ;;  %v5042_v51 = vld [vmem:[#allocation11 + $0x1c8] sm:$0xff]   ;;  %v5051_v56 = vld [vmem:[#allocation11 + $0x118] sm:$0xff]  }
0x1bd8   :  { %3115 = vadd.xlane.f32.xlu0 %v6046_v4  ;;  %v6049_v5 = vadd.f32 %v3112_v55, %v2063_v31  ;;  %3411 = vmatprep.subr.bf16.mxu1 %v5006_v57  ;;  %v5052_v57 = vld [vmem:[#allocation11 + $0x198] sm:$0xff]  }
0x1bd9   :  { %3369 = vmatpush1.bf16.msra.mxu0 %v5001_v58  ;;  %v5053_v58 = vld [vmem:[#allocation11 + $0x160] sm:$0xff]  }
0x1bda   :  { %3370 = vmatprep.subr.bf16.mxu0 %v5009_v62  ;;  %v5055_v62 = vld [vmem:[#allocation11 + $0x120] sm:$0xff]  }
0x1bdb   :  { %3412 = vmatpush1.bf16.msra.mxu1 %v5004_v59  ;;  %v5054_v59 = vld [vmem:[#allocation11 + $0x1e0] sm:$0xff]  }
0x1bdc   :  { %3117 = vadd.xlane.f32.xlu0 %v6049_v5  ;;  %3413 = vmatprep.subr.bf16.mxu1 %v5012_v63  ;;  %v5056_v63 = vld [vmem:[#allocation11 + $0x1a0] sm:$0xff]  }
0x1bdd   :  { %3371 = vmatpush1.bf16.msra.mxu0 %v5007_v28  ;;  %v5057_v28 = vld [vmem:[#allocation11 + $0x168] sm:$0xff]  }
0x1bde   :  { %3372 = vmatprep.subr.bf16.mxu0 %v5015_v61  ;;  %v5059_v61 = vld [vmem:[#allocation11 + $0x128] sm:$0xff]  }
0x1bdf   :  { %3414 = vmatpush1.bf16.msra.mxu1 %v5010_v16  ;;  %v5058_v16 = vld [vmem:[#allocation11 + $0x1e8] sm:$0xff]  }
0x1be0   :  { %3415 = vmatprep.subr.bf16.mxu1 %v5018_v1  ;;  %v5060_v1 = vld [vmem:[#allocation11 + $0x1a8] sm:$0xff]  }
0x1be1   :  { %3373 = vmatpush1.bf16.msra.mxu0 %v5013_v7  ;;  %v5061_v7 = vld [vmem:[#allocation11 + $0x170] sm:$0xff]  }
0x1be2   :  { %3374 = vmatprep.subr.bf16.mxu0 %v5021_v3  ;;  %v5063_v3 = vld [vmem:[#allocation11 + $0x130] sm:$0xff]  }
0x1be3   :  { %3416 = vmatpush1.bf16.msra.mxu1 %v5016_v2  ;;  %v5062_v2 = vld [vmem:[#allocation11 + $0x1f0] sm:$0xff]  }
0x1be4   :  { %3417 = vmatprep.subr.bf16.mxu1 %v5024_v6  ;;  %v5064_v6 = vld [vmem:[#allocation11 + $0x1b0] sm:$0xff]  }
0x1be5   :  { %3375 = vmatpush1.bf16.msra.mxu0 %v5019_v25  ;;  %v5065_v25 = vld [vmem:[#allocation11 + $0x178] sm:$0xff]  }
0x1be6   :  { %3376 = vmatprep.subr.bf16.mxu0 %v5027_v11  ;;  %v5067_v11 = vld [vmem:[#allocation11 + $0x138] sm:$0xff]  }
0x1be7   :  { %3418 = vmatpush1.bf16.msra.mxu1 %v5022_v9  ;;  %v5066_v9 = vld [vmem:[#allocation11 + $0x1f8] sm:$0xff]  }
0x1be8   :  { %3419 = vmatprep.subr.bf16.mxu1 %v5030_v12  ;;  %v5068_v12 = vld [vmem:[#allocation11 + $0x1b8] sm:$0xff]  }
0x1be9   :  { %3377 = vmatpush1.bf16.msra.mxu0 %v5025_v13  ;;  %v2065_v13 = vld [vmem:[#allocation7 + $0x6] ss:$8 sm:$0xf] }
0x1bea   :  { %3378 = vmatprep.subr.bf16.mxu0 %v5033_v22  ;;  %v3195_v22 = vrot.slane %v2065_v13, %v5647_v19 }
0x1beb   :  { %3420 = vmatpush1.bf16.msra.mxu1 %v5028_v20  ;;  %v3187_v20 = vrot.slane %v2065_v13, %v5644_v18 }
0x1bec   :  { %3421 = vmatprep.subr.bf16.mxu1 %v5036_v24  ;;  %v3191_v24 = vrot.slane %v2065_v13, %v5650_v21 }
0x1bed   :  { %3379 = vmatpush1.bf16.msra.mxu0 %v5031_v26  ;;  %v3199_v26 = vrot.slane %v2065_v13, %v1387_v44 }
0x1bee   :  { %4495 = vmatprep.subr.bf16.mxu0 %v5037_v34 }
0x1bef   :  { %3422 = vmatpush1.bf16.msra.mxu1 %v5034_v50 }
0x1bf0   :  { %4517 = vmatprep.subr.bf16.mxu1 %v5038_v35 }
0x1c65   :  { %v3116_v38 = vpop.xlane.xlu0 %3115 }
0x1c66   :  { %v3119_v39 = vmul.f32 0.0078125, %v3116_v38  ;;  %v5043_v38 = vld [vmem:[#allocation11 + $0x108] sm:$0xff]  }
0x1c68   :  { %v6053_v43 = vsub.f32 %v6046_v4, %v3119_v39  ;;  %v5044_v39 = vld [vmem:[#allocation11 + $0x188] sm:$0xff]  }
0x1c69   :  { %v3118_v41 = vpop.xlane.xlu0 %3117 }
0x1c6a   :  { %v3120_v45 = vmul.f32 0.0078125, %v3118_v41  ;;  %v3123_v47 = vmul.f32 %v6053_v43, %v6053_v43  ;;  %v5046_v41 = vld [vmem:[#allocation11 + $0x1d0] sm:$0xff]  }
0x1c6c   :  { %v6058_v49 = vsub.f32 %v6049_v5, %v3120_v45  ;;  %3125 = vadd.xlane.f32.xlu0 %v3123_v47  ;;  %v5047_v45 = vld [vmem:[#allocation11 + $0x110] sm:$0xff]  }
0x1c6d   :  { %v5048_v47 = vld [vmem:[#allocation11 + $0x190] sm:$0xff]  }
0x1c6e   :  { %v3124_v53 = vmul.f32 %v6058_v49, %v6058_v49 }
0x1c70   :  { %3127 = vadd.xlane.f32.xlu0 %v3124_v53  ;;  %v5050_v53 = vld [vmem:[#allocation11 + $0x1d8] sm:$0xff]  }
0x1cf9   :  { %v3126_v46 = vpop.xlane.xlu0 %3125 }
0x1cfa   :  { %v3129_v14 = vmul.f32 0.0078125, %v3126_v46 }
0x1cfc   :  { %v3131_v60 = vadd.f32 1e-05, %v3129_v14 }
0x1cfd   :  { %v3128_v40 = vpop.xlane.xlu0 %3127 }
0x1cfe   :  { %5169 = vrsqrt.f32 %v3131_v60  ;;  %v3130_v42 = vmul.f32 0.0078125, %v3128_v40 }
0x1d00   :  { %v3132_v8 = vadd.f32 1e-05, %v3130_v42 }
0x1d02   :  { %5171 = vrsqrt.f32 %v3132_v8 }
0x1d08   :  { %v5170_v29 = vpop.eup %5169 }
0x1d09   :  { %v3135_v30 = vmul.f32 %v5170_v29, %v6053_v43  ;;  %v5045_v43 = vld [vmem:[#allocation11 + $0x150] sm:$0xff]  }
0x1d0b   :  { %v3141_v48 = vmul.f32 %v4289_v54, %v3135_v30 }
0x1d0c   :  { %v5172_v27 = vpop.eup %5171 }
0x1d0d   :  { %v3136_v31 = vmul.f32 %v5172_v27, %v6058_v49  ;;  %v3147_v55 = vadd.f32 %v4290_v32, %v3141_v48  ;;  %v5049_v49 = vld [vmem:[#allocation11 + $0x158] sm:$0xff]  }
0x1d0f   :  { %v3142_v52 = vmul.f32 %v4289_v54, %v3136_v31 }
0x1d11   :  { %v3148_v0 = vadd.f32 %v4290_v32, %v3142_v52 }
0x1d13   :  { %v3149_v33 = vpack.c.bf16 %v3148_v0, %v3147_v55 }
0x1d15   :  { %3397 = vmatmul.mubr.bf16.vlgmr.msra.gmra.mrb[60].mxu0 %v3149_v33  ;;  %3440 = vmatmul.mubr.bf16.vlgmr.msra.gmra.mrb[72].mxu1 %v3149_v33 }
0x1d16   :  { %4496 = vmatpush3.bf16.msra.mxu0 %v5039_v36  ;;  %4518 = vmatpush3.bf16.msra.mxu1 %v5040_v37 }
0x1d17   :  { %4497 = vmatprep.subr.bf16.mxu0 %v5041_v23  ;;  %4519 = vmatprep.subr.bf16.mxu1 %v5042_v51 }
0x1d1a   :  { %4498 = vmatpush3.bf16.msra.mxu0 %v5043_v38  ;;  %4520 = vmatpush3.bf16.msra.mxu1 %v5044_v39 }
0x1d1b   :  { %4499 = vmatprep.subr.bf16.mxu0 %v5045_v43  ;;  %4521 = vmatprep.subr.bf16.mxu1 %v5046_v41 }
0x1d1e   :  { %4500 = vmatpush3.bf16.msra.mxu0 %v5047_v45  ;;  %4522 = vmatpush3.bf16.msra.mxu1 %v5048_v47 }
0x1d1f   :  { %4501 = vmatprep.subr.bf16.mxu0 %v5049_v49  ;;  %4523 = vmatprep.subr.bf16.mxu1 %v5050_v53 }
0x1d22   :  { %4502 = vmatpush3.bf16.msra.mxu0 %v5051_v56  ;;  %4524 = vmatpush3.bf16.msra.mxu1 %v5052_v57 }
0x1d23   :  { %4503 = vmatprep.subr.bf16.mxu0 %v5053_v58  ;;  %4525 = vmatprep.subr.bf16.mxu1 %v5054_v59 }
0x1d26   :  { %4504 = vmatpush3.bf16.msra.mxu0 %v5055_v62  ;;  %4526 = vmatpush3.bf16.msra.mxu1 %v5056_v63 }
0x1d27   :  { %4505 = vmatprep.subr.bf16.mxu0 %v5057_v28  ;;  %4527 = vmatprep.subr.bf16.mxu1 %v5058_v16 }
0x1d2a   :  { %4506 = vmatpush3.bf16.msra.mxu0 %v5059_v61  ;;  %4528 = vmatpush3.bf16.msra.mxu1 %v5060_v1 }
0x1d2b   :  { %4507 = vmatprep.subr.bf16.mxu0 %v5061_v7  ;;  %4529 = vmatprep.subr.bf16.mxu1 %v5062_v2 }
0x1d2e   :  { %4508 = vmatpush3.bf16.msra.mxu0 %v5063_v3  ;;  %4530 = vmatpush3.bf16.msra.mxu1 %v5064_v6 }
0x1d2f   :  { %4509 = vmatprep.subr.bf16.mxu0 %v5065_v25  ;;  %4531 = vmatprep.subr.bf16.mxu1 %v5066_v9 }
0x1d32   :  { %4510 = vmatpush3.bf16.msra.mxu0 %v5067_v11  ;;  %4532 = vmatpush3.bf16.msra.mxu1 %v5068_v12 }
0x1d33   :  { %4767 = vmatprep.subr.bf16.mxu0 %v5411_v10 }
0x1de8   :  { %v3398_v50 = vpop.f32.mrb[60].mxu0  ;;  %v3441_v46 = vpop.f32.mrb[72].mxu1 }
0x1de9   :  { %v6070_v14 = vadd.f32 %v3398_v50, %v3187_v20  ;;  %v6072_v60 = vadd.f32 %v3441_v46, %v3195_v22  ;;  %v3400_v40 = vpop.f32.mrb[61].mxu0  ;;  %v3443_v42 = vpop.f32.mrb[73].mxu1 }
0x1dea   :  { %v6074_v8 = vadd.f32 %v3400_v40, %v3191_v24  ;;  %v6076_v29 = vadd.f32 %v3443_v42, %v3199_v26  ;;  %v3402_v18 = vpop.f32.mrb[62].mxu0  ;;  %v3445_v30 = vpop.f32.mrb[74].mxu1 }
0x1deb   :  { %v3458_v19 = vmul.f32 0.044715, %v6070_v14  ;;  %v3460_v21 = vmul.f32 0.044715, %v6072_v60  ;;  %v3403_v15 = vadd.f32 %v3402_v18, %v3187_v20  ;;  %v3446_v44 = vadd.f32 %v3445_v30, %v3195_v22  ;;  %v3404_v54 = vpop.f32.mrb[63].mxu0  ;;  %v3447_v27 = vpop.f32.mrb[75].mxu1 }
0x1dec   :  { %v3459_v31 = vmul.f32 0.044715, %v6074_v8  ;;  %v3461_v48 = vmul.f32 0.044715, %v6076_v29  ;;  %v6082_v32 = vadd.f32 %v3404_v54, %v3191_v24  ;;  %v6084_v52 = vadd.f32 %v3447_v27, %v3199_v26 }
0x1ded   :  { %v3466_v55 = vmul.f32 %v3458_v19, %v6070_v14  ;;  %v3468_v0 = vmul.f32 %v3460_v21, %v6072_v60  ;;  %v3462_v33 = vmul.f32 0.044715, %v3403_v15  ;;  %v3464_v34 = vmul.f32 0.044715, %v3446_v44 }
0x1dee   :  { %v3467_v35 = vmul.f32 %v3459_v31, %v6074_v8  ;;  %v3469_v36 = vmul.f32 %v3461_v48, %v6076_v29  ;;  %v3463_v37 = vmul.f32 0.044715, %v6082_v32  ;;  %v3465_v23 = vmul.f32 0.044715, %v6084_v52 }
0x1def   :  { %v3474_v51 = vmul.f32 %v3466_v55, %v6070_v14  ;;  %v3476_v38 = vmul.f32 %v3468_v0, %v6072_v60  ;;  %v3470_v39 = vmul.f32 %v3462_v33, %v3403_v15  ;;  %v3472_v43 = vmul.f32 %v3464_v34, %v3446_v44 }
0x1df0   :  { %v3475_v41 = vmul.f32 %v3467_v35, %v6074_v8  ;;  %v3477_v45 = vmul.f32 %v3469_v36, %v6076_v29  ;;  %v3471_v47 = vmul.f32 %v3463_v37, %v6082_v32  ;;  %v3473_v49 = vmul.f32 %v3465_v23, %v6084_v52 }
0x1df1   :  { %v3482_v53 = vadd.f32 %v3474_v51, %v6070_v14  ;;  %v3484_v56 = vadd.f32 %v3476_v38, %v6072_v60  ;;  %v3478_v57 = vmul.f32 %v3470_v39, %v3403_v15  ;;  %v3480_v58 = vmul.f32 %v3472_v43, %v3446_v44 }
0x1df2   :  { %v3479_v59 = vmul.f32 %v3471_v47, %v6082_v32  ;;  %v3481_v62 = vmul.f32 %v3473_v49, %v6084_v52  ;;  %v3483_v1 = vadd.f32 %v3475_v41, %v6074_v8  ;;  %v3485_v6 = vadd.f32 %v3477_v45, %v6076_v29 }
0x1df3   :  { %v3490_v63 = vmul.f32 0.7978846, %v3482_v53  ;;  %v3492_v28 = vmul.f32 0.7978846, %v3484_v56  ;;  %v3486_v16 = vadd.f32 %v3478_v57, %v3403_v15  ;;  %v3488_v61 = vadd.f32 %v3480_v58, %v3446_v44 }
0x1df4   :  { %v3487_v7 = vadd.f32 %v3479_v59, %v6082_v32  ;;  %v3491_v25 = vmul.f32 0.7978846, %v3483_v1  ;;  %v3489_v11 = vadd.f32 %v3481_v62, %v6084_v52  ;;  %v3493_v12 = vmul.f32 0.7978846, %v3485_v6 }
0x1df5   :  { %5173 = vtanh.f32 %v3490_v63  ;;  %v3494_v2 = vmul.f32 0.7978846, %v3486_v16  ;;  %v3496_v3 = vmul.f32 0.7978846, %v3488_v61  ;;  %v3450_v40 = vmul.f32 0.5, %v6070_v14 }
0x1df6   :  { %5175 = vtanh.f32 %v3492_v28  ;;  %v3495_v9 = vmul.f32 0.7978846, %v3487_v7  ;;  %v3497_v13 = vmul.f32 0.7978846, %v3489_v11  ;;  %v3454_v42 = vmul.f32 0.5, %v3403_v15 }
0x1df7   :  { %5177 = vtanh.f32 %v3494_v2  ;;  %v3452_v19 = vmul.f32 0.5, %v6072_v60  ;;  %v3456_v21 = vmul.f32 0.5, %v3446_v44  ;;  %v3451_v31 = vmul.f32 0.5, %v6074_v8  ;;  %v2066_v61 = vld [vmem:[#allocation7 + $0x7] ss:$0 sm:$0xff] }
0x1df8   :  { %5179 = vtanh.f32 %v3496_v3  ;;  %v3455_v34 = vmul.f32 0.5, %v6082_v32  ;;  %v3453_v15 = vmul.f32 0.5, %v6076_v29  ;;  %v3457_v23 = vmul.f32 0.5, %v6084_v52 }
0x1df9   :  { %5181 = vtanh.f32 %v3491_v25  ;;  %v5069_v25 = vld [vmem:[#allocation13] sm:$0xff]  }
0x1dfa   :  { %5183 = vtanh.f32 %v3495_v9 }
0x1dfb   :  { %5185 = vtanh.f32 %v3493_v12 }
0x1dfc   :  { %5187 = vtanh.f32 %v3497_v13 }
0x1dff   :  { %v5174_v20 = vpop.eup %5173 }
0x1e00   :  { %v5176_v22 = vpop.eup %5175  ;;  %v3506_v24 = vadd.f32 1.0, %v5174_v20 }
0x1e01   :  { %v5178_v26 = vpop.eup %5177  ;;  %v3508_v50 = vadd.f32 1.0, %v5176_v22 }
0x1e02   :  { %v5180_v46 = vpop.eup %5179  ;;  %v3510_v18 = vadd.f32 1.0, %v5178_v26  ;;  %v3514_v55 = vmul.f32 %v3506_v24, %v3450_v40  ;;  %v5074_v40 = vld [vmem:[#allocation13 + $0x28] sm:$0xff]  }
0x1e03   :  { %v5182_v30 = vpop.eup %5181  ;;  %v3512_v54 = vadd.f32 1.0, %v5180_v46  ;;  %v3516_v36 = vmul.f32 %v3508_v50, %v3452_v19  ;;  %v5072_v50 = vld [vmem:[#allocation13 + $0x18] sm:$0xff]   ;;  %v5073_v46 = vld [vmem:[#allocation13 + $0x20] sm:$0xff]  }
0x1e04   :  { %v5184_v27 = vpop.eup %5183  ;;  %v3507_v48 = vadd.f32 1.0, %v5182_v30  ;;  %v3518_v0 = vmul.f32 %v3510_v18, %v3454_v42  ;;  %v5075_v42 = vld [vmem:[#allocation13 + $0x30] sm:$0xff]   ;;  %v5414_v18 = vmov 1   ;;  %v5076_v30 = vld [vmem:[#allocation13 + $0x38] sm:$0xff]  }
0x1e05   :  { %v5186_v33 = vpop.eup %5185  ;;  %v3511_v35 = vadd.f32 1.0, %v5184_v27  ;;  %v3520_v37 = vmul.f32 %v3512_v54, %v3456_v21  ;;  %4828 = vset.pattern.permute.xlu1 %v5414_v18  ;;  %4827 = vset.pattern.permute.xlu0 %v5414_v18  ;;  %v6125_v19 = vld [vmem:[%s6160_s0 + $0x8] sm:$0xff] }
0x1e06   :  { %v5188_v14 = vpop.eup %5187  ;;  %v3509_v60 = vadd.f32 1.0, %v5186_v33  ;;  %v3522_v44 = vpack.c.bf16 %v3518_v0, %v3514_v55  ;;  %v3515_v51 = vmul.f32 %v3507_v48, %v3451_v31  ;;  %vm4052_vm10 = vcmp.ne.s32.totalorder %v6125_v19, 4294967196 }
0x1e07   :  { %v3519_v38 = vmul.f32 %v3511_v35, %v3455_v34  ;;  %v3513_v39 = vadd.f32 1.0, %v5188_v14  ;;  %v3524_v8 = vpack.c.bf16 %v3520_v37, %v3516_v36  ;;  %v4355_v34 = vld [vmem:[#allocation5 + $0x8] ss:$0 sm:$0xff]  ;;  %v4356_v14 = vld [vmem:[#allocation5 + $0x9] ss:$0 sm:$0xff] }
0x1e08   :  { %v3517_v41 = vmul.f32 %v3509_v60, %v3453_v15 }
0x1e09   :  { %v3523_v43 = vpack.c.bf16 %v3519_v38, %v3515_v51  ;;  %v3521_v45 = vmul.f32 %v3513_v39, %v3457_v23  ;;  %v3871_v51 = vld [vmem:[#allocation7 + $0x20] ss:$0 sm:$0xff] }
0x1e0b   :  { %3815 = vmatprep.mubr.bf16.mxu0 %v3523_v43  ;;  %v3525_v47 = vpack.c.bf16 %v3521_v45, %v3517_v41 }
0x1e0c   :  { %3816 = vmatmul.mubr.bf16.vlgmr.msra.gmra.mrb[64].mxu0 %v3522_v44 }
0x1e0d   :  { %3856 = vmatprep.mubr.bf16.mxu1 %v3525_v47  ;;  %4783 = vmatprep.mubr.msk.bf16.mxu0 %vm5412_vm3, %v5411_v10 }
0x1e0e   :  { %3857 = vmatmul.mubr.bf16.vlgmr.msra.gmra.mrb[76].mxu1 %v3524_v8  ;;  %4768 = vmatpush3.bf16.msra.mxu0 %v5069_v25 }
0x1e0f   :  { %4769 = vmatprep.subr.bf16.mxu0 %v5411_v10 }
0x1edf   :  { %v4511_v29 = vpop.f32.mrb[64].mxu0 }
0x1ee0   :  { %v4512_v32 = vpop.f32.mrb[65].mxu0 }
0x1ee1   :  { %v4533_v52 = vpop.f32.mrb[76].mxu1  ;;  %v4513_v49 = vadd.f32 %v4512_v32, %v4511_v29  ;;  %v4514_v53 = vpop.f32.mrb[66].mxu0  ;;  %v5206_v32 = vld [vmem:[%s6160_s0] sm:$0xff]  ;;  %s5415_s0 = smov [#allocation14]  }
0x1ee2   :  { %v4534_v56 = vpop.f32.mrb[77].mxu1  ;;  %v4515_v57 = vpop.f32.mrb[67].mxu0  ;;  %vm4051_vm9 = vcmp.ne.s32.totalorder %v5206_v32, 4294967196 }
0x1ee3   :  { %v4535_v58 = vadd.f32 %v4534_v56, %v4533_v52  ;;  %v4536_v59 = vpop.f32.mrb[78].mxu1  ;;  %v4516_v62 = vadd.f32 %v4515_v57, %v4514_v53 }
0x1ee4   :  { %v4537_v63 = vpop.f32.mrb[79].mxu1 }
0x1ee5   :  { %v3859_v28 = vadd.f32 %v4535_v58, %v4513_v49  ;;  %v4538_v16 = vadd.f32 %v4537_v63, %v4536_v59 }
0x1ee7   :  { %v3862_v1 = vadd.f32 %v4538_v16, %v4516_v62  ;;  %v3865_v7 = vadd.f32 %v3859_v28, %v6046_v4  ;;  %v5070_v4 = vld [vmem:[#allocation13 + $0x8] sm:$0xff]  }
0x1ee8   :  { %4770 = vmatpush3.bf16.msra.mxu0 %v5070_v4 }
0x1ee9   :  { %v3867_v2 = vadd.f32 %v3865_v7, %v2066_v61  ;;  %v3866_v3 = vadd.f32 %v3862_v1, %v6049_v5  ;;  %4771 = vmatprep.subr.bf16.mxu0 %v5411_v10  ;;  %v5071_v5 = vld [vmem:[#allocation13 + $0x10] sm:$0xff]   ;;  %v4365_v1 = vsel %vm4051_vm9, 1.0, %v5411_v10  ;;  %v4366_v7 = vsel %vm4052_vm10, 1.0, %v5411_v10 }
0x1eeb   :  { %3872 = vadd.xlane.f32.xlu1 %v3867_v2  ;;  %v3868_v6 = vadd.f32 %v3866_v3, %v2066_v61  ;;  %v4072_v3 = vsel %vm4061_vm11, %v4366_v7, 0.0 }
0x1eec   :  { %4772 = vmatpush3.bf16.msra.mxu0 %v5071_v5 }
0x1eed   :  { %3874 = vadd.xlane.f32.xlu0 %v3868_v6  ;;  %4773 = vmatprep.subr.bf16.mxu0 %v5411_v10 }
0x1ef0   :  { %4774 = vmatpush3.bf16.msra.mxu0 %v5072_v50 }
0x1ef1   :  { %4775 = vmatprep.subr.bf16.mxu0 %v5411_v10 }
0x1ef4   :  { %4776 = vmatpush3.bf16.msra.mxu0 %v5073_v46 }
0x1ef5   :  { %4777 = vmatprep.subr.bf16.mxu0 %v5411_v10 }
0x1ef8   :  { %4778 = vmatpush3.bf16.msra.mxu0 %v5074_v40 }
0x1ef9   :  { %4779 = vmatprep.subr.bf16.mxu0 %v5411_v10 }
0x1efc   :  { %4780 = vmatpush3.bf16.msra.mxu0 %v5075_v42  ;;  %4041 = vperm.xlu1 %4828, %v6125_v19  }
0x1efd   :  { %4781 = vmatprep.subr.bf16.mxu0 %v5411_v10 }
0x1f00   :  { %4782 = vmatpush3.bf16.msra.mxu0 %v5076_v30 }
0x1f78   :  { %v3873_v9 = vpop.xlane.xlu1 %3872 }
0x1f79   :  { %v3876_v11 = vmul.f32 0.0078125, %v3873_v9 }
0x1f7a   :  { %v3875_v12 = vpop.xlane.xlu0 %3874 }
0x1f7b   :  { %v3878_v13 = vsub.f32 %v3867_v2, %v3876_v11  ;;  %v3877_v20 = vmul.f32 0.0078125, %v3875_v12  ;;  %v4071_v2 = vsel %vm4061_vm11, %v4365_v1, 0.0 }
0x1f7c   :  { %v4042_v63 = vpop.permute.xlu1 %4041 }
0x1f7d   :  { %v3879_v22 = vsub.f32 %v3868_v6, %v3877_v20  ;;  %v3880_v24 = vmul.f32 %v3878_v13, %v3878_v13  ;;  %vm4044_vm8 = vcmp.eq.s32.totalorder %v5594_v17, %v4042_v63  ;;  %v4073_v6 = vadd.f32 %v4072_v3, %v4071_v2 }
0x1f7f   :  { %3882 = vadd.xlane.f32.xlu0 %v3880_v24  ;;  %v3881_v26 = vmul.f32 %v3879_v22, %v3879_v22  ;;  %v4074_v25 = vrot.slane %v4073_v6, 4 }
0x1f83   :  { %3884 = vadd.xlane.f32.xlu0 %v3881_v26 }
0x200c   :  { %v3883_v21 = vpop.xlane.xlu0 %3882 }
0x200d   :  { %v3886_v54 = vmul.f32 0.0078125, %v3883_v21 }
0x200f   :  { %v3888_v27 = vadd.f32 1e-05, %v3886_v54 }
0x2010   :  { %v3885_v31 = vpop.xlane.xlu0 %3884 }
0x2011   :  { %5189 = vrsqrt.f32 %v3888_v27  ;;  %v3887_v48 = vmul.f32 0.0078125, %v3885_v31 }
0x2013   :  { %v3889_v55 = vadd.f32 1e-05, %v3887_v48 }
0x2015   :  { %5191 = vrsqrt.f32 %v3889_v55 }
0x201b   :  { %v5190_v0 = vpop.eup %5189 }
0x201c   :  { %v3892_v33 = vmul.f32 %v5190_v0, %v3878_v13 }
0x201e   :  { %v3898_v37 = vmul.f32 %v4355_v34, %v3892_v33 }
0x201f   :  { %v5192_v35 = vpop.eup %5191 }
0x2020   :  { %v3893_v36 = vmul.f32 %v5192_v35, %v3879_v22  ;;  %v3904_v23 = vadd.f32 %v4356_v14, %v3898_v37 }
0x2022   :  { %v3899_v15 = vmul.f32 %v4355_v34, %v3893_v36 }
0x2024   :  { %v3905_v60 = vadd.f32 %v4356_v14, %v3899_v15 }
0x2026   :  { %v3906_v44 = vpack.c.bf16 %v3905_v60, %v3904_v23 }
0x2028   :  { %4784 = vmatmul.mubr.bf16.vlgmr.msra.gmra.mrb[68].mxu0 %v3906_v44 }
0x20fb   :  { %v4005_v38 = vpop.f32.mrb[68].mxu0 }
0x20fc   :  { %v4006_v39 = vadd.f32 %v4005_v38, %v3871_v51  ;;  %v4785_v8 = vpop.f32.mrb[69].mxu0 }
0x20fd   :  { %v4008_v43 = vpop.f32.mrb[70].mxu0 }
0x20fe   :  { %4012 = vst [vmem:[%s6171_s11] sm:$0xff] %v4006_v39  ;;  %v4009_v41 = vadd.f32 %v4008_v43, %v3871_v51  ;;  %v4786_v45 = vpop.f32.mrb[71].mxu0  ;;  %v4015_v47 = vsel %vm4014_vm6, %v4006_v39, -1e+09 }
0x20ff   :  { %4017 = vmax.xlane.f32.xlu0 %v4015_v47 }
0x2100   :  { %4013 = vst [vmem:[%s6171_s11 + $0x8] sm:$0xff] %v4009_v41  ;;  %v4016_v29 = vsel %vm4014_vm6, %v4009_v41, -1e+09  ;;  %v4046_v61 = vsel %vm4044_vm8, %v4009_v41, 0.0  ;;  %s4097_s11 = sshll.u32 %s5415_s0, 4  ;;  %s4098_s11 = int_to_ptr.vmem [resolvable:$true] %s4097_s11 }
0x2101   :  { %s5361_s27 = scalar_lea.vmem %s4098_s11, 16  ;;  %s5365_s28 = scalar_lea.vmem %s4098_s11, 32 }
0x2102   :  { %p5362_p0 = scmp.ne.s32.totalorder %s4098_s11, %s5361_s27  ;;  %p5366_p1 = scmp.lt.s32.totalorder %s4098_s11, %s4098_s11 }
0x2103   :  { %4019 = vmax.xlane.f32.xlu0 %v4016_v29  ;;  %p5367_p2 = scmp.lt.s32.totalorder %s5365_s28, %s5361_s27 }
0x2105   :  { %p5368_p3 = por %p5367_p2, %p5366_p1 }
0x2107   :  { %p5369_p4 = pnand %p5368_p3, %p5362_p0 }
0x2119   :  { %4038 = vperm.xlu0 %4827, %v5206_v32  }
0x218c   :  { %v4018_v52 = vpop.xlane.xlu0 %4017 }
0x218d   :  { %v4021_v49 = vsub.f32 %v4015_v47, %v4018_v52 }
0x218f   :  { %v4023_v53 = vmul.f32 1.442695, %v4021_v49 }
0x2190   :  { %v4020_v56 = vpop.xlane.xlu0 %4019 }
0x2191   :  { %5193 = vpow2.f32 %v4023_v53  ;;  %v4022_v57 = vsub.f32 %v4016_v29, %v4020_v56 }
0x2193   :  { %v4025_v58 = vmul.f32 1.442695, %v4022_v57 }
0x2195   :  { %5195 = vpow2.f32 %v4025_v58 }
0x2198   :  { %v4039_v59 = vpop.permute.xlu0 %4038 }
0x2199   :  { %vm4043_vm7 = vcmp.eq.s32.totalorder %v5594_v17, %v4039_v59  ;;  %v4075_v17 = vadd.f32 %v4074_v25, %v4073_v6 }
0x219a   :  { %v4045_v16 = vsel %vm4043_vm7, %v4006_v39, 0.0 }
0x219b   :  { %v5194_v62 = vpop.eup %5193  ;;  %v4076_v12 = vrot.slane %v4075_v17, 2 }
0x219c   :  { %4027 = vadd.xlane.f32.xlu1 %v5194_v62 }
0x219d   :  { %v4077_v13 = vadd.f32 %v4076_v12, %v4075_v17 }
0x219f   :  { %v5196_v28 = vpop.eup %5195  ;;  %v4078_v4 = vrot.slane %v4077_v13, 1 }
0x21a0   :  { %4029 = vadd.xlane.f32.xlu0 %v5196_v28  ;;  %4047 = vadd.xlane.f32.xlu1 %v4045_v16 }
0x21a1   :  { %v4079_v40 = vadd.f32 %v4078_v4, %v4077_v13 }
0x21a3   :  { %v4080_v21 = vmax.f32 %v4079_v40, 1.0 }
0x21a4   :  { %4049 = vadd.xlane.f32.xlu1 %v4046_v61 }
0x2229   :  { %v4028_v9 = vpop.xlane.xlu1 %4027 }
0x222a   :  { %5197 = vlog2.f32 %v4028_v9 }
0x222d   :  { %v4030_v11 = vpop.xlane.xlu0 %4029  ;;  %v4048_v24 = vpop.xlane.xlu1 %4047 }
0x222e   :  { %5199 = vlog2.f32 %v4030_v11 }
0x222f   :  { %5201 = vrcp.f32 %v4080_v21 }
0x2231   :  { %v4050_v42 = vpop.xlane.xlu1 %4049 }
0x2234   :  { %v5198_v20 = vpop.eup %5197 }
0x2235   :  { %v4032_v22 = vmul.f32 0.6931472, %v5198_v20 }
0x2237   :  { %v4035_v26 = vadd.f32 %v4032_v22, %v4018_v52 }
0x2238   :  { %v5200_v5 = vpop.eup %5199 }
0x2239   :  { %v4034_v10 = vmul.f32 0.6931472, %v5200_v5  ;;  %v4057_v50 = vsub.f32 %v4035_v26, %v4048_v24  ;;  %v5202_v35 = vpop.eup %5201 }
0x223b   :  { %v4036_v46 = vadd.f32 %v4034_v10, %v4020_v56  ;;  %v4059_v18 = vmul.f32 %v4365_v1, %v4057_v50 }
0x223d   :  { %v4058_v30 = vsub.f32 %v4036_v46, %v4050_v42  ;;  %v4062_v54 = vsel %vm4061_vm11, %v4059_v18, 0.0 }
0x223f   :  { %v4060_v19 = vmul.f32 %v4366_v7, %v4058_v30 }
0x2241   :  { %v4063_v27 = vsel %vm4061_vm11, %v4060_v19, 0.0 }
0x2242   :  { %v4064_v31 = vadd.f32 %v4063_v27, %v4062_v54 }
0x2244   :  { %v4065_v48 = vrot.slane %v4064_v31, 4 }
0x2246   :  { %v4066_v55 = vadd.f32 %v4065_v48, %v4064_v31 }
0x2248   :  { %v4067_v0 = vrot.slane %v4066_v55, 2 }
0x224a   :  { %v4068_v33 = vadd.f32 %v4067_v0, %v4066_v55 }
0x224c   :  { %v4069_v34 = vrot.slane %v4068_v33, 1 }
0x224e   :  { %v4070_v36 = vadd.f32 %v4069_v34, %v4068_v33 }
0x2250   :  { %v4082_v37 = vmul.f32 %v5202_v35, %v4070_v36 }
0x2252   :  { %4085 = vperm.xlu0 %4827, %v4082_v37  }
0x22d1   :  { %v4086_v14 = vpop.permute.xlu0 %4085 }
0x22d2   :  { %4088 = vst [vmem:[#allocation14] sm:$0x1] %v4086_v14 }
0x22d3   :  { %5372 = shalt.err (!%p5369_p4)
}
0x22d4   :  { %s5373_s1 = scalar_lea.hbm %s6172_s12, 16 }
0x22d5   :  { %p5374_p5 = scmp.ne.s32.totalorder %s6172_s12, %s5373_s1  ;;  %p5377_p6 = scmp.lt.u32.totalorder %s5373_s1, %s6172_s12 }
0x22d7   :  { %p5379_p7 = pnand %p5377_p6, %p5374_p5 }
0x22d9   :  { %5382 = shalt.err (!%p5379_p7)
}
0x22da   :  { %4100 = dma.vmem_to_hbm [thread:$0]  %s4098_s11, 16, %s6172_s12, [#allocation4]  }
0x22db   :  { %5391 = dma.done.wait [#allocation4], 16  }
0x22dc   :  { %5392 = vsyncadd [#allocation4], 4294967280 }
0x22dd   :  { %4106 = vsyncpa [#allocation3], 1 }
0x22de   :  { %4107 = vsyncpa [#allocation6], 1 }
0x22df   :  { %4108 = vsyncpa [#allocation9], 1 }
0x22e0   :  { %4109 = vsyncpa [#allocation12], 1 }
0x22e1   :  { %4110 = vsyncpa [#allocation4], 1 }

</bundles_post_ra>
